<compile_context>
chip_gen: v5e
topology: v5e:2x2
jax: 0.10.0
libtpu: 0.0.40
codegen_flags: <defaults>
</compile_context>

<pallas_src>
import functools

import jax
import jax.numpy as jnp
from jax.experimental import pallas as pl
from jax.experimental.pallas import tpu as pltpu

KSIZE = 7            # kernel_size = 7 (module default)
PAD = 3              # padding = 3 for kernel_size 7
_MiB = 1024 * 1024


def _tpu_hw():
    """(vmem_capacity_bytes, tensorcores_per_chip) with conservative fallbacks."""
    vmem = 128 * _MiB
    cores = 1
    try:
        info = pltpu.get_tpu_info()
        v = getattr(info, "vmem_capacity_bytes", None)
        if v:
            vmem = int(v)
        for name in ("num_cores", "num_tensorcores", "tensorcore_count", "cores_per_chip"):
            c = getattr(info, name, None)
            if c:
                cores = int(c)
                break
    except Exception:
        pass
    try:
        kind = str(getattr(jax.devices()[0], "device_kind", "")).lower()
        if "v7" in kind or "7x" in kind:      # v7x: 2 TensorCores, 64 MiB VMEM per TC
            cores = max(cores, 2)
            vmem = min(vmem, 64 * _MiB)
    except Exception:
        pass
    return vmem, cores


def _round_up(n, m):
    return ((n + m - 1) // m) * m


def _pick_rs(H, W, Bt):
    """Row-strip size for the conv epilogue: keep the strip accumulator ~<= 16 vregs
    (64 KiB) while bounding the unrolled strip count."""
    rs = max(1, (64 * 1024) // max(1, Bt * W * 4))
    rs = min(rs, H)
    rs = max(rs, -(-H // 32))
    if rs >= 8:
        rs -= rs % 8
    return max(1, min(rs, H))


def _spatial_attn_kernel(w_ref, x_ref, o_ref, pad_ref, mx_ref, *,
                         H, W, Bt, Ct, C, NC, RS, FLAT, CH_REM, NEG):
    # w_ref:   (49,) f32 in SMEM (scalar weight table)
    # x_ref:   (Bt, Ct, H*W) [FLAT] or (Bt, Ct, H, W) input block
    # o_ref:   (Bt, H, W) output block (channel dim squeezed via BlockSpec)
    # pad_ref: VMEM scratch (Bt, H+6, W+6) f32 zero-padded feature map
    # mx_ref:  VMEM scratch running channel max: (Bt, 1, H*W) [FLAT] or (Bt, H, W), f32
    c = pl.program_id(1)
    Hp = H + 2 * PAD
    Wp = W + 2 * PAD

    # ---- streaming phase: channel max of this (Bt, Ct) block ----------------------
    xb = x_ref[...]
    if CH_REM:
        # last channel chunk is partially out of bounds -> mask the garbage rows
        ch = jax.lax.broadcasted_iota(jnp.int32, xb.shape, 1)
        limit = jnp.minimum(C - c * Ct, Ct)
        xb = jnp.where(ch < limit, xb, jnp.array(NEG, dtype=xb.dtype))
    if FLAT:
        cm = jnp.max(xb, axis=1, keepdims=True).astype(jnp.float32)   # (Bt, 1, H*W)
    else:
        cm = jnp.max(xb, axis=1).astype(jnp.float32)                  # (Bt, H, W)

    @pl.when(c == 0)
    def _():
        # Init the running max and zero the 3-wide border of the padded map here so the
        # lane-masked border writes hide under the channel-loop DMA streaming; the
        # interior is fully overwritten in the epilogue.
        mx_ref[...] = cm
        pad_ref[:, :PAD, :] = jnp.zeros((Bt, PAD, Wp), jnp.float32)
        pad_ref[:, PAD + H:, :] = jnp.zeros((Bt, PAD, Wp), jnp.float32)
        pad_ref[:, :, :PAD] = jnp.zeros((Bt, Hp, PAD), jnp.float32)
        pad_ref[:, :, PAD + W:] = jnp.zeros((Bt, Hp, PAD), jnp.float32)

    @pl.when(c > 0)
    def _():
        mx_ref[...] = jnp.maximum(mx_ref[...], cm)

    # ---- epilogue on the last channel chunk: pad, 7x7 conv, sigmoid, store --------
    @pl.when(c == NC - 1)
    def _():
        if FLAT:
            # One-time (Bt, H*W) -> (Bt, H, W) relayout of the max map, row by row
            # (static slices + stores only; no in-kernel reshape).
            for r in range(H):
                pad_ref[:, PAD + r:PAD + r + 1, PAD:PAD + W] = \
                    mx_ref[:, :, r * W:(r + 1) * W]
        else:
            pad_ref[:, PAD:PAD + H, PAD:PAD + W] = mx_ref[...]

        wv = [w_ref[i] for i in range(KSIZE * KSIZE)]   # hoisted scalar reads from SMEM

        for r0 in range(0, H, RS):
            rs = min(RS, H - r0)
            # Per-strip load keeps the 7 dx-shifted copies' live bytes bounded
            # (~7 * Bt * (rs+6) * W * 4), while still reusing each lane shift for
            # all 7 dy taps (dy slices are sublane-only).
            strip = pad_ref[:, r0:r0 + rs + 2 * PAD, :]             # (Bt, rs+6, Wp)
            cols = [strip[:, :, dx:dx + W] for dx in range(KSIZE)]  # 7 lane shifts
            accs = [jnp.zeros((Bt, rs, W), jnp.float32) for _ in range(2)]
            for dy in range(KSIZE):
                a = accs[dy & 1]
                for dx in range(KSIZE):
                    a = a + wv[dy * KSIZE + dx] * cols[dx][:, dy:dy + rs, :]
                accs[dy & 1] = a
            acc = accs[0] + accs[1]
            # sigmoid(x) = 0.5*(tanh(x/2)+1): keeps the transcendental on the EUP slot
            o_ref[:, r0:r0 + rs, :] = (0.5 * (jnp.tanh(0.5 * acc) + 1.0)).astype(o_ref.dtype)


def spatial_attention(x, weight, *, block_bytes_target=None):
    """x: [B, C, H, W]; weight: [1, 1, 7, 7] -> sigmoid(conv7x7(max_c(x))) : [B, 1, H, W]."""
    B, C, H, W = x.shape
    assert weight.shape == (1, 1, KSIZE, KSIZE)
    itemsize = jnp.dtype(x.dtype).itemsize
    HW = H * W

    vmem_cap, n_cores = _tpu_hw()
    small_vmem = vmem_cap <= 80 * _MiB                 # v7x-class parts (64 MiB per TC)
    if block_bytes_target is None:
        block_bytes_target = (4 if small_vmem else 8) * _MiB
    vmem_ceiling = (40 if small_vmem else 64) * _MiB

    # Lane-dense streaming: with NCHW and W < 128 only W/128 of each DMA row / vreg is
    # useful, so stream the channel-max phase over a flattened (B, C, H*W) view (free,
    # NCHW is contiguous over H,W) and only relayout the small f32 max map for the conv.
    FLAT = W < 128
    x_in = x.reshape(B, C, HW) if FLAT else x

    # --- channels per block (FLAT blocks need Ct % 8 == 0 unless Ct == C) ---
    per_c = HW * itemsize
    cap_c = max(1, block_bytes_target // per_c)
    if C <= cap_c:
        Ct = C
    elif FLAT:
        Ct = min(C, max(8, (cap_c // 8) * 8))
    else:
        Ct = max(1, min(C, cap_c))
    NC = -(-C // Ct)
    ch_rem = (C % Ct) != 0

    # --- images per block (count input + output bytes per image) ---
    per_img = Ct * per_c + _round_up(H, 8) * _round_up(W, 128) * itemsize
    bt_cap = max(1, block_bytes_target // per_img)
    if n_cores >= 2 and B >= 2:
        bt_cap = min(bt_cap, max(1, B // 2))   # keep >= 2 parallel steps only on 2-TC parts
    Bt = max(1, min(B, bt_cap))
    NB = -(-B // Bt)
    # TODO(synk): when NB == 1 on a 2-TensorCore part (v7x), add a second parallel grid
    # axis splitting H into two PAD-row-halo'd halves so both cores get work.

    RS = _pick_rs(H, W, Bt)

    if jnp.issubdtype(x.dtype, jnp.floating):
        NEG = float(jnp.finfo(x.dtype).min)
    else:
        NEG = int(jnp.iinfo(x.dtype).min)

    # --- VMEM budget (double-buffered in/out blocks + scratch), per-generation limit ---
    if FLAT:
        in_blk = Bt * _round_up(Ct, 16) * _round_up(HW, 128) * itemsize
        mx_scr = Bt * 8 * _round_up(HW, 128) * 4
    else:
        in_blk = Bt * Ct * _round_up(H, 16) * _round_up(W, 128) * itemsize
        mx_scr = Bt * _round_up(H, 8) * _round_up(W, 128) * 4
    out_blk = Bt * _round_up(H, 8) * _round_up(W, 128) * itemsize
    pad_scr = Bt * _round_up(H + 2 * PAD, 8) * _round_up(W + 2 * PAD, 128) * 4
    need = 2 * in_blk + 2 * out_blk + pad_scr + mx_scr + 2 * _MiB
    vmem_limit = int(min(max(vmem_ceiling, need + 8 * _MiB),
                         max(32 * _MiB, vmem_cap - 16 * _MiB)))

    w_flat = weight.reshape(-1).astype(jnp.float32)    # (49,) scalar table for SMEM

    kernel = functools.partial(
        _spatial_attn_kernel, H=H, W=W, Bt=Bt, Ct=Ct, C=C, NC=NC, RS=RS,
        FLAT=FLAT, CH_REM=ch_rem, NEG=NEG)

    if FLAT:
        x_spec = pl.BlockSpec((Bt, Ct, HW), lambda b, c: (b, c, 0))
        mx_shape = (Bt, 1, HW)
    else:
        x_spec = pl.BlockSpec((Bt, Ct, H, W), lambda b, c: (b, c, 0, 0))
        mx_shape = (Bt, H, W)

    return pl.pallas_call(
        kernel,
        out_shape=jax.ShapeDtypeStruct((B, 1, H, W), x.dtype),
        grid=(NB, NC),   # (parallel batch-blocks, arbitrary channel-chunks; c iterates fastest)
        in_specs=[
            # small weight table lives whole in SMEM (cheap scalar reads)
            pl.BlockSpec(memory_space=pltpu.MemorySpace.SMEM),
            x_spec,
        ],
        # channel dim squeezed from the kernel view; same block across the c axis
        out_specs=pl.BlockSpec((Bt, None, H, W), lambda b, c: (b, 0, 0, 0)),
        scratch_shapes=[
            pltpu.VMEM((Bt, H + 2 * PAD, W + 2 * PAD), jnp.float32),  # padded map
            pltpu.VMEM(mx_shape, jnp.float32),                        # running channel max
        ],
        compiler_params=pltpu.CompilerParams(
            dimension_semantics=("parallel", "arbitrary"),
            vmem_limit_bytes=vmem_limit,
        ),
    )(w_flat, x_in)


def _reference(x, weight):
    max_out = jnp.max(x, axis=1, keepdims=True)
    conv = jax.lax.conv_general_dilated(
        max_out, weight, window_strides=(1, 1),
        padding=((PAD, PAD), (PAD, PAD)),
        dimension_numbers=("NCHW", "OIHW", "NCHW"))
    return jax.nn.sigmoid(conv)


if __name__ == "__main__":
    key = jax.random.PRNGKey(0)
    kw, k1, k2, k3, k4 = jax.random.split(key, 5)

    # Deterministic Conv2d(1, 1, 7, 7, bias=False) init: kaiming_uniform(a=sqrt(5))
    # -> bound = 1/sqrt(fan_in) = 1/7 for fan_in = 1*7*7.
    bound = 1.0 / float(KSIZE)
    weight = jax.random.uniform(kw, (1, 1, KSIZE, KSIZE), jnp.float32, -bound, bound)

    # 1) base small case
    x1 = jax.random.normal(k1, (2, 4, 16, 16), jnp.float32)
    out1 = jax.block_until_ready(spatial_attention(x1, weight))
    assert out1.shape == (2, 1, 16, 16), out1.shape
    assert jnp.allclose(out1, _reference(x1, weight), atol=1e-5, rtol=1e-5), "mismatch (base)"

    # 2) batch-blocked path with a non-divisor batch remainder (Bt=2 over B=5)
    x2 = jax.random.normal(k2, (5, 4, 16, 16), jnp.float32)
    out2 = jax.block_until_ready(spatial_attention(x2, weight, block_bytes_target=24 * 1024))
    assert jnp.allclose(out2, _reference(x2, weight), atol=1e-5, rtol=1e-5), "mismatch (batch rem)"

    # 3) channel-chunked running max with a channel remainder (C=19 -> Ct=8, 3 chunks)
    x3 = jax.random.normal(k3, (3, 19, 16, 16), jnp.float32)
    out3 = jax.block_until_ready(spatial_attention(x3, weight, block_bytes_target=4 * 1024))
    assert jnp.allclose(out3, _reference(x3, weight), atol=1e-5, rtol=1e-5), "mismatch (C chunks)"

    # 4) bf16 streaming path (f32 accumulation in-kernel)
    x4 = jax.random.normal(k4, (4, 32, 16, 16), jnp.float32).astype(jnp.bfloat16)
    out4 = jax.block_until_ready(spatial_attention(x4, weight))
    ref4 = _reference(x4.astype(jnp.float32), weight)
    assert jnp.allclose(out4.astype(jnp.float32), ref4, atol=2e-2, rtol=2e-2), "mismatch (bf16)"

    print("KERNEL_OK")
</pallas_src>

<mosaic_0001>
module attributes {stable_mosaic.version = 11 : i64} {
  func.func @_spatial_attn_kernel(%arg0: i32, %arg1: i32, %arg2: memref<49xf32, #tpu.memory_space<smem>>, %arg3: memref<2x4x256xf32, #tpu.memory_space<vmem>>, %arg4: memref<2x1x16x16xf32, #tpu.memory_space<vmem>>, %arg5: memref<2x22x22xf32, #tpu.memory_space<vmem>>, %arg6: memref<2x1x256xf32, #tpu.memory_space<vmem>>) attributes {dimension_semantics = [#tpu.dimension_semantics<parallel>, #tpu.dimension_semantics<arbitrary>], iteration_bounds = array<i64: 1, 1>, scalar_prefetch = 0 : i64, scratch_operands = 2 : i64, tpu.core_type = #tpu.core_type<tc>, window_params = [{transform_indices = @transform_0, window_bounds = array<i64: 49>}, {transform_indices = @transform_1, window_bounds = array<i64: 2, 4, 256>}, {transform_indices = @transform_2, window_bounds = array<i64: 2, 1, 16, 16>}]} {
    %c0 = arith.constant 0 : index
    %c0_0 = arith.constant 0 : index
    %c0_1 = arith.constant 0 : index
    %0 = vector.load %arg3[%c0, %c0_0, %c0_1] : memref<2x4x256xf32, #tpu.memory_space<vmem>>, vector<2x4x256xf32>
    %cst = arith.constant dense<0xFF800000> : vector<2x256xf32>
    %1 = vector.multi_reduction <maximumf>, %0, %cst [1] : vector<2x4x256xf32> to vector<2x256xf32>
    %2 = vector.shape_cast %1 : vector<2x256xf32> to vector<2x1x256xf32>
    %c0_i32 = arith.constant 0 : i32
    %3 = arith.cmpi eq, %arg1, %c0_i32 : i32
    %4 = arith.extui %3 : i1 to i32
    %c0_i32_2 = arith.constant 0 : i32
    %5 = arith.cmpi ne, %4, %c0_i32_2 : i32
    scf.if %5 {
      %c0_7 = arith.constant 0 : index
      %c0_8 = arith.constant 0 : index
      %c0_9 = arith.constant 0 : index
      %12 = vector.load %arg6[%c0_7, %c0_8, %c0_9] : memref<2x1x256xf32, #tpu.memory_space<vmem>>, vector<2x1x256xf32>
      tpu.vector_store %arg6[%c0_7, %c0_8, %c0_9], %2 {strides = array<i32>} : memref<2x1x256xf32, #tpu.memory_space<vmem>>, vector<2x1x256xf32>,
      %cst_10 = arith.constant 0.000000e+00 : f32
      %13 = vector.broadcast %cst_10 : f32 to vector<2x3x22xf32>
      %c0_11 = arith.constant 0 : index
      %c0_12 = arith.constant 0 : index
      %c0_13 = arith.constant 0 : index
      %14 = vector.load %arg5[%c0_11, %c0_12, %c0_13] : memref<2x22x22xf32, #tpu.memory_space<vmem>>, vector<2x3x22xf32>
      tpu.vector_store %arg5[%c0_11, %c0_12, %c0_13], %13 {strides = array<i32>} : memref<2x22x22xf32, #tpu.memory_space<vmem>>, vector<2x3x22xf32>,
      %cst_14 = arith.constant 0.000000e+00 : f32
      %15 = vector.broadcast %cst_14 : f32 to vector<2x3x22xf32>
      %c0_15 = arith.constant 0 : index
      %c19 = arith.constant 19 : index
      %c0_16 = arith.constant 0 : index
      %16 = vector.load %arg5[%c0_15, %c19, %c0_16] : memref<2x22x22xf32, #tpu.memory_space<vmem>>, vector<2x3x22xf32>
      tpu.vector_store %arg5[%c0_15, %c19, %c0_16], %15 {strides = array<i32>} : memref<2x22x22xf32, #tpu.memory_space<vmem>>, vector<2x3x22xf32>,
      %cst_17 = arith.constant 0.000000e+00 : f32
      %17 = vector.broadcast %cst_17 : f32 to vector<2x22x3xf32>
      %c0_18 = arith.constant 0 : index
      %c0_19 = arith.constant 0 : index
      %c0_20 = arith.constant 0 : index
      %18 = vector.load %arg5[%c0_18, %c0_19, %c0_20] : memref<2x22x22xf32, #tpu.memory_space<vmem>>, vector<2x22x3xf32>
      tpu.vector_store %arg5[%c0_18, %c0_19, %c0_20], %17 {strides = array<i32>} : memref<2x22x22xf32, #tpu.memory_space<vmem>>, vector<2x22x3xf32>,
      %cst_21 = arith.constant 0.000000e+00 : f32
      %19 = vector.broadcast %cst_21 : f32 to vector<2x22x3xf32>
      %c0_22 = arith.constant 0 : index
      %c0_23 = arith.constant 0 : index
      %c19_24 = arith.constant 19 : index
      %20 = vector.load %arg5[%c0_22, %c0_23, %c19_24] : memref<2x22x22xf32, #tpu.memory_space<vmem>>, vector<2x22x3xf32>
      tpu.vector_store %arg5[%c0_22, %c0_23, %c19_24], %19 {strides = array<i32>} : memref<2x22x22xf32, #tpu.memory_space<vmem>>, vector<2x22x3xf32>,
    } else {
    }
    %c0_i32_3 = arith.constant 0 : i32
    %6 = arith.cmpi sgt, %arg1, %c0_i32_3 : i32
    %7 = arith.extui %6 : i1 to i32
    %c0_i32_4 = arith.constant 0 : i32
    %8 = arith.cmpi ne, %7, %c0_i32_4 : i32
    scf.if %8 {
      %c0_7 = arith.constant 0 : index
      %c0_8 = arith.constant 0 : index
      %c0_9 = arith.constant 0 : index
      %12 = vector.load %arg6[%c0_7, %c0_8, %c0_9] : memref<2x1x256xf32, #tpu.memory_space<vmem>>, vector<2x1x256xf32>
      %13 = arith.maximumf %12, %2 : vector<2x1x256xf32>
      %c0_10 = arith.constant 0 : index
      %c0_11 = arith.constant 0 : index
      %c0_12 = arith.constant 0 : index
      %14 = vector.load %arg6[%c0_10, %c0_11, %c0_12] : memref<2x1x256xf32, #tpu.memory_space<vmem>>, vector<2x1x256xf32>
      tpu.vector_store %arg6[%c0_10, %c0_11, %c0_12], %13 {strides = array<i32>} : memref<2x1x256xf32, #tpu.memory_space<vmem>>, vector<2x1x256xf32>,
    } else {
    }
    %c0_i32_5 = arith.constant 0 : i32
    %9 = arith.cmpi eq, %arg1, %c0_i32_5 : i32
    %10 = arith.extui %9 : i1 to i32
    %c0_i32_6 = arith.constant 0 : i32
    %11 = arith.cmpi ne, %10, %c0_i32_6 : i32
    scf.if %11 {
      %c0_7 = arith.constant 0 : index
      %c0_8 = arith.constant 0 : index
      %c0_9 = arith.constant 0 : index
      %12 = vector.load %arg6[%c0_7, %c0_8, %c0_9] : memref<2x1x256xf32, #tpu.memory_space<vmem>>, vector<2x1x16xf32>
      %c0_10 = arith.constant 0 : index
      %c3 = arith.constant 3 : index
      %c3_11 = arith.constant 3 : index
      %13 = vector.load %arg5[%c0_10, %c3, %c3_11] : memref<2x22x22xf32, #tpu.memory_space<vmem>>, vector<2x1x16xf32>
      tpu.vector_store %arg5[%c0_10, %c3, %c3_11], %12 {strides = array<i32>} : memref<2x22x22xf32, #tpu.memory_space<vmem>>, vector<2x1x16xf32>,
      %c0_12 = arith.constant 0 : index
      %c0_13 = arith.constant 0 : index
      %c16 = arith.constant 16 : index
      %14 = vector.load %arg6[%c0_12, %c0_13, %c16] : memref<2x1x256xf32, #tpu.memory_space<vmem>>, vector<2x1x16xf32>
      %c0_14 = arith.constant 0 : index
      %c4 = arith.constant 4 : index
      %c3_15 = arith.constant 3 : index
      %15 = vector.load %arg5[%c0_14, %c4, %c3_15] : memref<2x22x22xf32, #tpu.memory_space<vmem>>, vector<2x1x16xf32>
      tpu.vector_store %arg5[%c0_14, %c4, %c3_15], %14 {strides = array<i32>} : memref<2x22x22xf32, #tpu.memory_space<vmem>>, vector<2x1x16xf32>,
      %c0_16 = arith.constant 0 : index
      %c0_17 = arith.constant 0 : index
      %c32 = arith.constant 32 : index
      %16 = vector.load %arg6[%c0_16, %c0_17, %c32] : memref<2x1x256xf32, #tpu.memory_space<vmem>>, vector<2x1x16xf32>
      %c0_18 = arith.constant 0 : index
      %c5 = arith.constant 5 : index
      %c3_19 = arith.constant 3 : index
      %17 = vector.load %arg5[%c0_18, %c5, %c3_19] : memref<2x22x22xf32, #tpu.memory_space<vmem>>, vector<2x1x16xf32>
      tpu.vector_store %arg5[%c0_18, %c5, %c3_19], %16 {strides = array<i32>} : memref<2x22x22xf32, #tpu.memory_space<vmem>>, vector<2x1x16xf32>,
      %c0_20 = arith.constant 0 : index
      %c0_21 = arith.constant 0 : index
      %c48 = arith.constant 48 : index
      %18 = vector.load %arg6[%c0_20, %c0_21, %c48] : memref<2x1x256xf32, #tpu.memory_space<vmem>>, vector<2x1x16xf32>
      %c0_22 = arith.constant 0 : index
      %c6 = arith.constant 6 : index
      %c3_23 = arith.constant 3 : index
      %19 = vector.load %arg5[%c0_22, %c6, %c3_23] : memref<2x22x22xf32, #tpu.memory_space<vmem>>, vector<2x1x16xf32>
      tpu.vector_store %arg5[%c0_22, %c6, %c3_23], %18 {strides = array<i32>} : memref<2x22x22xf32, #tpu.memory_space<vmem>>, vector<2x1x16xf32>,
      %c0_24 = arith.constant 0 : index
      %c0_25 = arith.constant 0 : index
      %c64 = arith.constant 64 : index
      %20 = vector.load %arg6[%c0_24, %c0_25, %c64] : memref<2x1x256xf32, #tpu.memory_space<vmem>>, vector<2x1x16xf32>
      %c0_26 = arith.constant 0 : index
      %c7 = arith.constant 7 : index
      %c3_27 = arith.constant 3 : index
      %21 = vector.load %arg5[%c0_26, %c7, %c3_27] : memref<2x22x22xf32, #tpu.memory_space<vmem>>, vector<2x1x16xf32>
      tpu.vector_store %arg5[%c0_26, %c7, %c3_27], %20 {strides = array<i32>} : memref<2x22x22xf32, #tpu.memory_space<vmem>>, vector<2x1x16xf32>,
      %c0_28 = arith.constant 0 : index
      %c0_29 = arith.constant 0 : index
      %c80 = arith.constant 80 : index
      %22 = vector.load %arg6[%c0_28, %c0_29, %c80] : memref<2x1x256xf32, #tpu.memory_space<vmem>>, vector<2x1x16xf32>
      %c0_30 = arith.constant 0 : index
      %c8 = arith.constant 8 : index
      %c3_31 = arith.constant 3 : index
      %23 = vector.load %arg5[%c0_30, %c8, %c3_31] : memref<2x22x22xf32, #tpu.memory_space<vmem>>, vector<2x1x16xf32>
      tpu.vector_store %arg5[%c0_30, %c8, %c3_31], %22 {strides = array<i32>} : memref<2x22x22xf32, #tpu.memory_space<vmem>>, vector<2x1x16xf32>,
      %c0_32 = arith.constant 0 : index
      %c0_33 = arith.constant 0 : index
      %c96 = arith.constant 96 : index
      %24 = vector.load %arg6[%c0_32, %c0_33, %c96] : memref<2x1x256xf32, #tpu.memory_space<vmem>>, vector<2x1x16xf32>
      %c0_34 = arith.constant 0 : index
      %c9 = arith.constant 9 : index
      %c3_35 = arith.constant 3 : index
      %25 = vector.load %arg5[%c0_34, %c9, %c3_35] : memref<2x22x22xf32, #tpu.memory_space<vmem>>, vector<2x1x16xf32>
      tpu.vector_store %arg5[%c0_34, %c9, %c3_35], %24 {strides = array<i32>} : memref<2x22x22xf32, #tpu.memory_space<vmem>>, vector<2x1x16xf32>,
      %c0_36 = arith.constant 0 : index
      %c0_37 = arith.constant 0 : index
      %c112 = arith.constant 112 : index
      %26 = vector.load %arg6[%c0_36, %c0_37, %c112] : memref<2x1x256xf32, #tpu.memory_space<vmem>>, vector<2x1x16xf32>
      %c0_38 = arith.constant 0 : index
      %c10 = arith.constant 10 : index
      %c3_39 = arith.constant 3 : index
      %27 = vector.load %arg5[%c0_38, %c10, %c3_39] : memref<2x22x22xf32, #tpu.memory_space<vmem>>, vector<2x1x16xf32>
      tpu.vector_store %arg5[%c0_38, %c10, %c3_39], %26 {strides = array<i32>} : memref<2x22x22xf32, #tpu.memory_space<vmem>>, vector<2x1x16xf32>,
      %c0_40 = arith.constant 0 : index
      %c0_41 = arith.constant 0 : index
      %c128 = arith.constant 128 : index
      %28 = vector.load %arg6[%c0_40, %c0_41, %c128] : memref<2x1x256xf32, #tpu.memory_space<vmem>>, vector<2x1x16xf32>
      %c0_42 = arith.constant 0 : index
      %c11 = arith.constant 11 : index
      %c3_43 = arith.constant 3 : index
      %29 = vector.load %arg5[%c0_42, %c11, %c3_43] : memref<2x22x22xf32, #tpu.memory_space<vmem>>, vector<2x1x16xf32>
      tpu.vector_store %arg5[%c0_42, %c11, %c3_43], %28 {strides = array<i32>} : memref<2x22x22xf32, #tpu.memory_space<vmem>>, vector<2x1x16xf32>,
      %c0_44 = arith.constant 0 : index
      %c0_45 = arith.constant 0 : index
      %c144 = arith.constant 144 : index
      %30 = vector.load %arg6[%c0_44, %c0_45, %c144] : memref<2x1x256xf32, #tpu.memory_space<vmem>>, vector<2x1x16xf32>
      %c0_46 = arith.constant 0 : index
      %c12 = arith.constant 12 : index
      %c3_47 = arith.constant 3 : index
      %31 = vector.load %arg5[%c0_46, %c12, %c3_47] : memref<2x22x22xf32, #tpu.memory_space<vmem>>, vector<2x1x16xf32>
      tpu.vector_store %arg5[%c0_46, %c12, %c3_47], %30 {strides = array<i32>} : memref<2x22x22xf32, #tpu.memory_space<vmem>>, vector<2x1x16xf32>,
      %c0_48 = arith.constant 0 : index
      %c0_49 = arith.constant 0 : index
      %c160 = arith.constant 160 : index
      %32 = vector.load %arg6[%c0_48, %c0_49, %c160] : memref<2x1x256xf32, #tpu.memory_space<vmem>>, vector<2x1x16xf32>
      %c0_50 = arith.constant 0 : index
      %c13 = arith.constant 13 : index
      %c3_51 = arith.constant 3 : index
      %33 = vector.load %arg5[%c0_50, %c13, %c3_51] : memref<2x22x22xf32, #tpu.memory_space<vmem>>, vector<2x1x16xf32>
      tpu.vector_store %arg5[%c0_50, %c13, %c3_51], %32 {strides = array<i32>} : memref<2x22x22xf32, #tpu.memory_space<vmem>>, vector<2x1x16xf32>,
      %c0_52 = arith.constant 0 : index
      %c0_53 = arith.constant 0 : index
      %c176 = arith.constant 176 : index
      %34 = vector.load %arg6[%c0_52, %c0_53, %c176] : memref<2x1x256xf32, #tpu.memory_space<vmem>>, vector<2x1x16xf32>
      %c0_54 = arith.constant 0 : index
      %c14 = arith.constant 14 : index
      %c3_55 = arith.constant 3 : index
      %35 = vector.load %arg5[%c0_54, %c14, %c3_55] : memref<2x22x22xf32, #tpu.memory_space<vmem>>, vector<2x1x16xf32>
      tpu.vector_store %arg5[%c0_54, %c14, %c3_55], %34 {strides = array<i32>} : memref<2x22x22xf32, #tpu.memory_space<vmem>>, vector<2x1x16xf32>,
      %c0_56 = arith.constant 0 : index
      %c0_57 = arith.constant 0 : index
      %c192 = arith.constant 192 : index
      %36 = vector.load %arg6[%c0_56, %c0_57, %c192] : memref<2x1x256xf32, #tpu.memory_space<vmem>>, vector<2x1x16xf32>
      %c0_58 = arith.constant 0 : index
      %c15 = arith.constant 15 : index
      %c3_59 = arith.constant 3 : index
      %37 = vector.load %arg5[%c0_58, %c15, %c3_59] : memref<2x22x22xf32, #tpu.memory_space<vmem>>, vector<2x1x16xf32>
      tpu.vector_store %arg5[%c0_58, %c15, %c3_59], %36 {strides = array<i32>} : memref<2x22x22xf32, #tpu.memory_space<vmem>>, vector<2x1x16xf32>,
      %c0_60 = arith.constant 0 : index
      %c0_61 = arith.constant 0 : index
      %c208 = arith.constant 208 : index
      %38 = vector.load %arg6[%c0_60, %c0_61, %c208] : memref<2x1x256xf32, #tpu.memory_space<vmem>>, vector<2x1x16xf32>
      %c0_62 = arith.constant 0 : index
      %c16_63 = arith.constant 16 : index
      %c3_64 = arith.constant 3 : index
      %39 = vector.load %arg5[%c0_62, %c16_63, %c3_64] : memref<2x22x22xf32, #tpu.memory_space<vmem>>, vector<2x1x16xf32>
      tpu.vector_store %arg5[%c0_62, %c16_63, %c3_64], %38 {strides = array<i32>} : memref<2x22x22xf32, #tpu.memory_space<vmem>>, vector<2x1x16xf32>,
      %c0_65 = arith.constant 0 : index
      %c0_66 = arith.constant 0 : index
      %c224 = arith.constant 224 : index
      %40 = vector.load %arg6[%c0_65, %c0_66, %c224] : memref<2x1x256xf32, #tpu.memory_space<vmem>>, vector<2x1x16xf32>
      %c0_67 = arith.constant 0 : index
      %c17 = arith.constant 17 : index
      %c3_68 = arith.constant 3 : index
      %41 = vector.load %arg5[%c0_67, %c17, %c3_68] : memref<2x22x22xf32, #tpu.memory_space<vmem>>, vector<2x1x16xf32>
      tpu.vector_store %arg5[%c0_67, %c17, %c3_68], %40 {strides = array<i32>} : memref<2x22x22xf32, #tpu.memory_space<vmem>>, vector<2x1x16xf32>,
      %c0_69 = arith.constant 0 : index
      %c0_70 = arith.constant 0 : index
      %c240 = arith.constant 240 : index
      %42 = vector.load %arg6[%c0_69, %c0_70, %c240] : memref<2x1x256xf32, #tpu.memory_space<vmem>>, vector<2x1x16xf32>
      %c0_71 = arith.constant 0 : index
      %c18 = arith.constant 18 : index
      %c3_72 = arith.constant 3 : index
      %43 = vector.load %arg5[%c0_71, %c18, %c3_72] : memref<2x22x22xf32, #tpu.memory_space<vmem>>, vector<2x1x16xf32>
      tpu.vector_store %arg5[%c0_71, %c18, %c3_72], %42 {strides = array<i32>} : memref<2x22x22xf32, #tpu.memory_space<vmem>>, vector<2x1x16xf32>,
      %c0_73 = arith.constant 0 : index
      %44 = memref.load %arg2[%c0_73] : memref<49xf32, #tpu.memory_space<smem>>
      %c1 = arith.constant 1 : index
      %45 = memref.load %arg2[%c1] : memref<49xf32, #tpu.memory_space<smem>>
      %c2 = arith.constant 2 : index
      %46 = memref.load %arg2[%c2] : memref<49xf32, #tpu.memory_space<smem>>
      %c3_74 = arith.constant 3 : index
      %47 = memref.load %arg2[%c3_74] : memref<49xf32, #tpu.memory_space<smem>>
      %c4_75 = arith.constant 4 : index
      %48 = memref.load %arg2[%c4_75] : memref<49xf32, #tpu.memory_space<smem>>
      %c5_76 = arith.constant 5 : index
      %49 = memref.load %arg2[%c5_76] : memref<49xf32, #tpu.memory_space<smem>>
      %c6_77 = arith.constant 6 : index
      %50 = memref.load %arg2[%c6_77] : memref<49xf32, #tpu.memory_space<smem>>
      %c7_78 = arith.constant 7 : index
      %51 = memref.load %arg2[%c7_78] : memref<49xf32, #tpu.memory_space<smem>>
      %c8_79 = arith.constant 8 : index
      %52 = memref.load %arg2[%c8_79] : memref<49xf32, #tpu.memory_space<smem>>
      %c9_80 = arith.constant 9 : index
      %53 = memref.load %arg2[%c9_80] : memref<49xf32, #tpu.memory_space<smem>>
      %c10_81 = arith.constant 10 : index
      %54 = memref.load %arg2[%c10_81] : memref<49xf32, #tpu.memory_space<smem>>
      %c11_82 = arith.constant 11 : index
      %55 = memref.load %arg2[%c11_82] : memref<49xf32, #tpu.memory_space<smem>>
      %c12_83 = arith.constant 12 : index
      %56 = memref.load %arg2[%c12_83] : memref<49xf32, #tpu.memory_space<smem>>
      %c13_84 = arith.constant 13 : index
      %57 = memref.load %arg2[%c13_84] : memref<49xf32, #tpu.memory_space<smem>>
      %c14_85 = arith.constant 14 : index
      %58 = memref.load %arg2[%c14_85] : memref<49xf32, #tpu.memory_space<smem>>
      %c15_86 = arith.constant 15 : index
      %59 = memref.load %arg2[%c15_86] : memref<49xf32, #tpu.memory_space<smem>>
      %c16_87 = arith.constant 16 : index
      %60 = memref.load %arg2[%c16_87] : memref<49xf32, #tpu.memory_space<smem>>
      %c17_88 = arith.constant 17 : index
      %61 = memref.load %arg2[%c17_88] : memref<49xf32, #tpu.memory_space<smem>>
      %c18_89 = arith.constant 18 : index
      %62 = memref.load %arg2[%c18_89] : memref<49xf32, #tpu.memory_space<smem>>
      %c19 = arith.constant 19 : index
      %63 = memref.load %arg2[%c19] : memref<49xf32, #tpu.memory_space<smem>>
      %c20 = arith.constant 20 : index
      %64 = memref.load %arg2[%c20] : memref<49xf32, #tpu.memory_space<smem>>
      %c21 = arith.constant 21 : index
      %65 = memref.load %arg2[%c21] : memref<49xf32, #tpu.memory_space<smem>>
      %c22 = arith.constant 22 : index
      %66 = memref.load %arg2[%c22] : memref<49xf32, #tpu.memory_space<smem>>
      %c23 = arith.constant 23 : index
      %67 = memref.load %arg2[%c23] : memref<49xf32, #tpu.memory_space<smem>>
      %c24 = arith.constant 24 : index
      %68 = memref.load %arg2[%c24] : memref<49xf32, #tpu.memory_space<smem>>
      %c25 = arith.constant 25 : index
      %69 = memref.load %arg2[%c25] : memref<49xf32, #tpu.memory_space<smem>>
      %c26 = arith.constant 26 : index
      %70 = memref.load %arg2[%c26] : memref<49xf32, #tpu.memory_space<smem>>
      %c27 = arith.constant 27 : index
      %71 = memref.load %arg2[%c27] : memref<49xf32, #tpu.memory_space<smem>>
      %c28 = arith.constant 28 : index
      %72 = memref.load %arg2[%c28] : memref<49xf32, #tpu.memory_space<smem>>
      %c29 = arith.constant 29 : index
      %73 = memref.load %arg2[%c29] : memref<49xf32, #tpu.memory_space<smem>>
      %c30 = arith.constant 30 : index
      %74 = memref.load %arg2[%c30] : memref<49xf32, #tpu.memory_space<smem>>
      %c31 = arith.constant 31 : index
      %75 = memref.load %arg2[%c31] : memref<49xf32, #tpu.memory_space<smem>>
      %c32_90 = arith.constant 32 : index
      %76 = memref.load %arg2[%c32_90] : memref<49xf32, #tpu.memory_space<smem>>
      %c33 = arith.constant 33 : index
      %77 = memref.load %arg2[%c33] : memref<49xf32, #tpu.memory_space<smem>>
      %c34 = arith.constant 34 : index
      %78 = memref.load %arg2[%c34] : memref<49xf32, #tpu.memory_space<smem>>
      %c35 = arith.constant 35 : index
      %79 = memref.load %arg2[%c35] : memref<49xf32, #tpu.memory_space<smem>>
      %c36 = arith.constant 36 : index
      %80 = memref.load %arg2[%c36] : memref<49xf32, #tpu.memory_space<smem>>
      %c37 = arith.constant 37 : index
      %81 = memref.load %arg2[%c37] : memref<49xf32, #tpu.memory_space<smem>>
      %c38 = arith.constant 38 : index
      %82 = memref.load %arg2[%c38] : memref<49xf32, #tpu.memory_space<smem>>
      %c39 = arith.constant 39 : index
      %83 = memref.load %arg2[%c39] : memref<49xf32, #tpu.memory_space<smem>>
      %c40 = arith.constant 40 : index
      %84 = memref.load %arg2[%c40] : memref<49xf32, #tpu.memory_space<smem>>
      %c41 = arith.constant 41 : index
      %85 = memref.load %arg2[%c41] : memref<49xf32, #tpu.memory_space<smem>>
      %c42 = arith.constant 42 : index
      %86 = memref.load %arg2[%c42] : memref<49xf32, #tpu.memory_space<smem>>
      %c43 = arith.constant 43 : index
      %87 = memref.load %arg2[%c43] : memref<49xf32, #tpu.memory_space<smem>>
      %c44 = arith.constant 44 : index
      %88 = memref.load %arg2[%c44] : memref<49xf32, #tpu.memory_space<smem>>
      %c45 = arith.constant 45 : index
      %89 = memref.load %arg2[%c45] : memref<49xf32, #tpu.memory_space<smem>>
      %c46 = arith.constant 46 : index
      %90 = memref.load %arg2[%c46] : memref<49xf32, #tpu.memory_space<smem>>
      %c47 = arith.constant 47 : index
      %91 = memref.load %arg2[%c47] : memref<49xf32, #tpu.memory_space<smem>>
      %c48_91 = arith.constant 48 : index
      %92 = memref.load %arg2[%c48_91] : memref<49xf32, #tpu.memory_space<smem>>
      %c0_92 = arith.constant 0 : index
      %c0_93 = arith.constant 0 : index
      %c0_94 = arith.constant 0 : index
      %93 = vector.load %arg5[%c0_92, %c0_93, %c0_94] : memref<2x22x22xf32, #tpu.memory_space<vmem>>, vector<2x22x22xf32>
      %94 = vector.extract_strided_slice %93 {offsets = [0, 0, 0], sizes = [2, 22, 16], strides = [1, 1, 1]} : vector<2x22x22xf32> to vector<2x22x16xf32>
      %95 = vector.extract_strided_slice %93 {offsets = [0, 0, 1], sizes = [2, 22, 16], strides = [1, 1, 1]} : vector<2x22x22xf32> to vector<2x22x16xf32>
      %96 = vector.extract_strided_slice %93 {offsets = [0, 0, 2], sizes = [2, 22, 16], strides = [1, 1, 1]} : vector<2x22x22xf32> to vector<2x22x16xf32>
      %97 = vector.extract_strided_slice %93 {offsets = [0, 0, 3], sizes = [2, 22, 16], strides = [1, 1, 1]} : vector<2x22x22xf32> to vector<2x22x16xf32>
      %98 = vector.extract_strided_slice %93 {offsets = [0, 0, 4], sizes = [2, 22, 16], strides = [1, 1, 1]} : vector<2x22x22xf32> to vector<2x22x16xf32>
      %99 = vector.extract_strided_slice %93 {offsets = [0, 0, 5], sizes = [2, 22, 16], strides = [1, 1, 1]} : vector<2x22x22xf32> to vector<2x22x16xf32>
      %100 = vector.extract_strided_slice %93 {offsets = [0, 0, 6], sizes = [2, 22, 16], strides = [1, 1, 1]} : vector<2x22x22xf32> to vector<2x22x16xf32>
      %cst_95 = arith.constant 0.000000e+00 : f32
      %101 = vector.broadcast %cst_95 : f32 to vector<2x16x16xf32>
      %cst_96 = arith.constant 0.000000e+00 : f32
      %102 = vector.broadcast %cst_96 : f32 to vector<2x16x16xf32>
      %103 = vector.extract_strided_slice %94 {offsets = [0, 0, 0], sizes = [2, 16, 16], strides = [1, 1, 1]} : vector<2x22x16xf32> to vector<2x16x16xf32>
      %104 = vector.broadcast %44 : f32 to vector<2x16x16xf32>
      %105 = arith.mulf %104, %103 : vector<2x16x16xf32>
      %106 = arith.addf %101, %105 : vector<2x16x16xf32>
      %107 = vector.extract_strided_slice %95 {offsets = [0, 0, 0], sizes = [2, 16, 16], strides = [1, 1, 1]} : vector<2x22x16xf32> to vector<2x16x16xf32>
      %108 = vector.broadcast %45 : f32 to vector<2x16x16xf32>
      %109 = arith.mulf %108, %107 : vector<2x16x16xf32>
      %110 = arith.addf %106, %109 : vector<2x16x16xf32>
      %111 = vector.extract_strided_slice %96 {offsets = [0, 0, 0], sizes = [2, 16, 16], strides = [1, 1, 1]} : vector<2x22x16xf32> to vector<2x16x16xf32>
      %112 = vector.broadcast %46 : f32 to vector<2x16x16xf32>
      %113 = arith.mulf %112, %111 : vector<2x16x16xf32>
      %114 = arith.addf %110, %113 : vector<2x16x16xf32>
      %115 = vector.extract_strided_slice %97 {offsets = [0, 0, 0], sizes = [2, 16, 16], strides = [1, 1, 1]} : vector<2x22x16xf32> to vector<2x16x16xf32>
      %116 = vector.broadcast %47 : f32 to vector<2x16x16xf32>
      %117 = arith.mulf %116, %115 : vector<2x16x16xf32>
      %118 = arith.addf %114, %117 : vector<2x16x16xf32>
      %119 = vector.extract_strided_slice %98 {offsets = [0, 0, 0], sizes = [2, 16, 16], strides = [1, 1, 1]} : vector<2x22x16xf32> to vector<2x16x16xf32>
      %120 = vector.broadcast %48 : f32 to vector<2x16x16xf32>
      %121 = arith.mulf %120, %119 : vector<2x16x16xf32>
      %122 = arith.addf %118, %121 : vector<2x16x16xf32>
      %123 = vector.extract_strided_slice %99 {offsets = [0, 0, 0], sizes = [2, 16, 16], strides = [1, 1, 1]} : vector<2x22x16xf32> to vector<2x16x16xf32>
      %124 = vector.broadcast %49 : f32 to vector<2x16x16xf32>
      %125 = arith.mulf %124, %123 : vector<2x16x16xf32>
      %126 = arith.addf %122, %125 : vector<2x16x16xf32>
      %127 = vector.extract_strided_slice %100 {offsets = [0, 0, 0], sizes = [2, 16, 16], strides = [1, 1, 1]} : vector<2x22x16xf32> to vector<2x16x16xf32>
      %128 = vector.broadcast %50 : f32 to vector<2x16x16xf32>
      %129 = arith.mulf %128, %127 : vector<2x16x16xf32>
      %130 = arith.addf %126, %129 : vector<2x16x16xf32>
      %131 = vector.extract_strided_slice %94 {offsets = [0, 1, 0], sizes = [2, 16, 16], strides = [1, 1, 1]} : vector<2x22x16xf32> to vector<2x16x16xf32>
      %132 = vector.broadcast %51 : f32 to vector<2x16x16xf32>
      %133 = arith.mulf %132, %131 : vector<2x16x16xf32>
      %134 = arith.addf %102, %133 : vector<2x16x16xf32>
      %135 = vector.extract_strided_slice %95 {offsets = [0, 1, 0], sizes = [2, 16, 16], strides = [1, 1, 1]} : vector<2x22x16xf32> to vector<2x16x16xf32>
      %136 = vector.broadcast %52 : f32 to vector<2x16x16xf32>
      %137 = arith.mulf %136, %135 : vector<2x16x16xf32>
      %138 = arith.addf %134, %137 : vector<2x16x16xf32>
      %139 = vector.extract_strided_slice %96 {offsets = [0, 1, 0], sizes = [2, 16, 16], strides = [1, 1, 1]} : vector<2x22x16xf32> to vector<2x16x16xf32>
      %140 = vector.broadcast %53 : f32 to vector<2x16x16xf32>
      %141 = arith.mulf %140, %139 : vector<2x16x16xf32>
      %142 = arith.addf %138, %141 : vector<2x16x16xf32>
      %143 = vector.extract_strided_slice %97 {offsets = [0, 1, 0], sizes = [2, 16, 16], strides = [1, 1, 1]} : vector<2x22x16xf32> to vector<2x16x16xf32>
      %144 = vector.broadcast %54 : f32 to vector<2x16x16xf32>
      %145 = arith.mulf %144, %143 : vector<2x16x16xf32>
      %146 = arith.addf %142, %145 : vector<2x16x16xf32>
      %147 = vector.extract_strided_slice %98 {offsets = [0, 1, 0], sizes = [2, 16, 16], strides = [1, 1, 1]} : vector<2x22x16xf32> to vector<2x16x16xf32>
      %148 = vector.broadcast %55 : f32 to vector<2x16x16xf32>
      %149 = arith.mulf %148, %147 : vector<2x16x16xf32>
      %150 = arith.addf %146, %149 : vector<2x16x16xf32>
      %151 = vector.extract_strided_slice %99 {offsets = [0, 1, 0], sizes = [2, 16, 16], strides = [1, 1, 1]} : vector<2x22x16xf32> to vector<2x16x16xf32>
      %152 = vector.broadcast %56 : f32 to vector<2x16x16xf32>
      %153 = arith.mulf %152, %151 : vector<2x16x16xf32>
      %154 = arith.addf %150, %153 : vector<2x16x16xf32>
      %155 = vector.extract_strided_slice %100 {offsets = [0, 1, 0], sizes = [2, 16, 16], strides = [1, 1, 1]} : vector<2x22x16xf32> to vector<2x16x16xf32>
      %156 = vector.broadcast %57 : f32 to vector<2x16x16xf32>
      %157 = arith.mulf %156, %155 : vector<2x16x16xf32>
      %158 = arith.addf %154, %157 : vector<2x16x16xf32>
      %159 = vector.extract_strided_slice %94 {offsets = [0, 2, 0], sizes = [2, 16, 16], strides = [1, 1, 1]} : vector<2x22x16xf32> to vector<2x16x16xf32>
      %160 = vector.broadcast %58 : f32 to vector<2x16x16xf32>
      %161 = arith.mulf %160, %159 : vector<2x16x16xf32>
      %162 = arith.addf %130, %161 : vector<2x16x16xf32>
      %163 = vector.extract_strided_slice %95 {offsets = [0, 2, 0], sizes = [2, 16, 16], strides = [1, 1, 1]} : vector<2x22x16xf32> to vector<2x16x16xf32>
      %164 = vector.broadcast %59 : f32 to vector<2x16x16xf32>
      %165 = arith.mulf %164, %163 : vector<2x16x16xf32>
      %166 = arith.addf %162, %165 : vector<2x16x16xf32>
      %167 = vector.extract_strided_slice %96 {offsets = [0, 2, 0], sizes = [2, 16, 16], strides = [1, 1, 1]} : vector<2x22x16xf32> to vector<2x16x16xf32>
      %168 = vector.broadcast %60 : f32 to vector<2x16x16xf32>
      %169 = arith.mulf %168, %167 : vector<2x16x16xf32>
      %170 = arith.addf %166, %169 : vector<2x16x16xf32>
      %171 = vector.extract_strided_slice %97 {offsets = [0, 2, 0], sizes = [2, 16, 16], strides = [1, 1, 1]} : vector<2x22x16xf32> to vector<2x16x16xf32>
      %172 = vector.broadcast %61 : f32 to vector<2x16x16xf32>
      %173 = arith.mulf %172, %171 : vector<2x16x16xf32>
      %174 = arith.addf %170, %173 : vector<2x16x16xf32>
      %175 = vector.extract_strided_slice %98 {offsets = [0, 2, 0], sizes = [2, 16, 16], strides = [1, 1, 1]} : vector<2x22x16xf32> to vector<2x16x16xf32>
      %176 = vector.broadcast %62 : f32 to vector<2x16x16xf32>
      %177 = arith.mulf %176, %175 : vector<2x16x16xf32>
      %178 = arith.addf %174, %177 : vector<2x16x16xf32>
      %179 = vector.extract_strided_slice %99 {offsets = [0, 2, 0], sizes = [2, 16, 16], strides = [1, 1, 1]} : vector<2x22x16xf32> to vector<2x16x16xf32>
      %180 = vector.broadcast %63 : f32 to vector<2x16x16xf32>
      %181 = arith.mulf %180, %179 : vector<2x16x16xf32>
      %182 = arith.addf %178, %181 : vector<2x16x16xf32>
      %183 = vector.extract_strided_slice %100 {offsets = [0, 2, 0], sizes = [2, 16, 16], strides = [1, 1, 1]} : vector<2x22x16xf32> to vector<2x16x16xf32>
      %184 = vector.broadcast %64 : f32 to vector<2x16x16xf32>
      %185 = arith.mulf %184, %183 : vector<2x16x16xf32>
      %186 = arith.addf %182, %185 : vector<2x16x16xf32>
      %187 = vector.extract_strided_slice %94 {offsets = [0, 3, 0], sizes = [2, 16, 16], strides = [1, 1, 1]} : vector<2x22x16xf32> to vector<2x16x16xf32>
      %188 = vector.broadcast %65 : f32 to vector<2x16x16xf32>
      %189 = arith.mulf %188, %187 : vector<2x16x16xf32>
      %190 = arith.addf %158, %189 : vector<2x16x16xf32>
      %191 = vector.extract_strided_slice %95 {offsets = [0, 3, 0], sizes = [2, 16, 16], strides = [1, 1, 1]} : vector<2x22x16xf32> to vector<2x16x16xf32>
      %192 = vector.broadcast %66 : f32 to vector<2x16x16xf32>
      %193 = arith.mulf %192, %191 : vector<2x16x16xf32>
      %194 = arith.addf %190, %193 : vector<2x16x16xf32>
      %195 = vector.extract_strided_slice %96 {offsets = [0, 3, 0], sizes = [2, 16, 16], strides = [1, 1, 1]} : vector<2x22x16xf32> to vector<2x16x16xf32>
      %196 = vector.broadcast %67 : f32 to vector<2x16x16xf32>
      %197 = arith.mulf %196, %195 : vector<2x16x16xf32>
      %198 = arith.addf %194, %197 : vector<2x16x16xf32>
      %199 = vector.extract_strided_slice %97 {offsets = [0, 3, 0], sizes = [2, 16, 16], strides = [1, 1, 1]} : vector<2x22x16xf32> to vector<2x16x16xf32>
      %200 = vector.broadcast %68 : f32 to vector<2x16x16xf32>
      %201 = arith.mulf %200, %199 : vector<2x16x16xf32>
      %202 = arith.addf %198, %201 : vector<2x16x16xf32>
      %203 = vector.extract_strided_slice %98 {offsets = [0, 3, 0], sizes = [2, 16, 16], strides = [1, 1, 1]} : vector<2x22x16xf32> to vector<2x16x16xf32>
      %204 = vector.broadcast %69 : f32 to vector<2x16x16xf32>
      %205 = arith.mulf %204, %203 : vector<2x16x16xf32>
      %206 = arith.addf %202, %205 : vector<2x16x16xf32>
      %207 = vector.extract_strided_slice %99 {offsets = [0, 3, 0], sizes = [2, 16, 16], strides = [1, 1, 1]} : vector<2x22x16xf32> to vector<2x16x16xf32>
      %208 = vector.broadcast %70 : f32 to vector<2x16x16xf32>
      %209 = arith.mulf %208, %207 : vector<2x16x16xf32>
      %210 = arith.addf %206, %209 : vector<2x16x16xf32>
      %211 = vector.extract_strided_slice %100 {offsets = [0, 3, 0], sizes = [2, 16, 16], strides = [1, 1, 1]} : vector<2x22x16xf32> to vector<2x16x16xf32>
      %212 = vector.broadcast %71 : f32 to vector<2x16x16xf32>
      %213 = arith.mulf %212, %211 : vector<2x16x16xf32>
      %214 = arith.addf %210, %213 : vector<2x16x16xf32>
      %215 = vector.extract_strided_slice %94 {offsets = [0, 4, 0], sizes = [2, 16, 16], strides = [1, 1, 1]} : vector<2x22x16xf32> to vector<2x16x16xf32>
      %216 = vector.broadcast %72 : f32 to vector<2x16x16xf32>
      %217 = arith.mulf %216, %215 : vector<2x16x16xf32>
      %218 = arith.addf %186, %217 : vector<2x16x16xf32>
      %219 = vector.extract_strided_slice %95 {offsets = [0, 4, 0], sizes = [2, 16, 16], strides = [1, 1, 1]} : vector<2x22x16xf32> to vector<2x16x16xf32>
      %220 = vector.broadcast %73 : f32 to vector<2x16x16xf32>
      %221 = arith.mulf %220, %219 : vector<2x16x16xf32>
      %222 = arith.addf %218, %221 : vector<2x16x16xf32>
      %223 = vector.extract_strided_slice %96 {offsets = [0, 4, 0], sizes = [2, 16, 16], strides = [1, 1, 1]} : vector<2x22x16xf32> to vector<2x16x16xf32>
      %224 = vector.broadcast %74 : f32 to vector<2x16x16xf32>
      %225 = arith.mulf %224, %223 : vector<2x16x16xf32>
      %226 = arith.addf %222, %225 : vector<2x16x16xf32>
      %227 = vector.extract_strided_slice %97 {offsets = [0, 4, 0], sizes = [2, 16, 16], strides = [1, 1, 1]} : vector<2x22x16xf32> to vector<2x16x16xf32>
      %228 = vector.broadcast %75 : f32 to vector<2x16x16xf32>
      %229 = arith.mulf %228, %227 : vector<2x16x16xf32>
      %230 = arith.addf %226, %229 : vector<2x16x16xf32>
      %231 = vector.extract_strided_slice %98 {offsets = [0, 4, 0], sizes = [2, 16, 16], strides = [1, 1, 1]} : vector<2x22x16xf32> to vector<2x16x16xf32>
      %232 = vector.broadcast %76 : f32 to vector<2x16x16xf32>
      %233 = arith.mulf %232, %231 : vector<2x16x16xf32>
      %234 = arith.addf %230, %233 : vector<2x16x16xf32>
      %235 = vector.extract_strided_slice %99 {offsets = [0, 4, 0], sizes = [2, 16, 16], strides = [1, 1, 1]} : vector<2x22x16xf32> to vector<2x16x16xf32>
      %236 = vector.broadcast %77 : f32 to vector<2x16x16xf32>
      %237 = arith.mulf %236, %235 : vector<2x16x16xf32>
      %238 = arith.addf %234, %237 : vector<2x16x16xf32>
      %239 = vector.extract_strided_slice %100 {offsets = [0, 4, 0], sizes = [2, 16, 16], strides = [1, 1, 1]} : vector<2x22x16xf32> to vector<2x16x16xf32>
      %240 = vector.broadcast %78 : f32 to vector<2x16x16xf32>
      %241 = arith.mulf %240, %239 : vector<2x16x16xf32>
      %242 = arith.addf %238, %241 : vector<2x16x16xf32>
      %243 = vector.extract_strided_slice %94 {offsets = [0, 5, 0], sizes = [2, 16, 16], strides = [1, 1, 1]} : vector<2x22x16xf32> to vector<2x16x16xf32>
      %244 = vector.broadcast %79 : f32 to vector<2x16x16xf32>
      %245 = arith.mulf %244, %243 : vector<2x16x16xf32>
      %246 = arith.addf %214, %245 : vector<2x16x16xf32>
      %247 = vector.extract_strided_slice %95 {offsets = [0, 5, 0], sizes = [2, 16, 16], strides = [1, 1, 1]} : vector<2x22x16xf32> to vector<2x16x16xf32>
      %248 = vector.broadcast %80 : f32 to vector<2x16x16xf32>
      %249 = arith.mulf %248, %247 : vector<2x16x16xf32>
      %250 = arith.addf %246, %249 : vector<2x16x16xf32>
      %251 = vector.extract_strided_slice %96 {offsets = [0, 5, 0], sizes = [2, 16, 16], strides = [1, 1, 1]} : vector<2x22x16xf32> to vector<2x16x16xf32>
      %252 = vector.broadcast %81 : f32 to vector<2x16x16xf32>
      %253 = arith.mulf %252, %251 : vector<2x16x16xf32>
      %254 = arith.addf %250, %253 : vector<2x16x16xf32>
      %255 = vector.extract_strided_slice %97 {offsets = [0, 5, 0], sizes = [2, 16, 16], strides = [1, 1, 1]} : vector<2x22x16xf32> to vector<2x16x16xf32>
      %256 = vector.broadcast %82 : f32 to vector<2x16x16xf32>
      %257 = arith.mulf %256, %255 : vector<2x16x16xf32>
      %258 = arith.addf %254, %257 : vector<2x16x16xf32>
      %259 = vector.extract_strided_slice %98 {offsets = [0, 5, 0], sizes = [2, 16, 16], strides = [1, 1, 1]} : vector<2x22x16xf32> to vector<2x16x16xf32>
      %260 = vector.broadcast %83 : f32 to vector<2x16x16xf32>
      %261 = arith.mulf %260, %259 : vector<2x16x16xf32>
      %262 = arith.addf %258, %261 : vector<2x16x16xf32>
      %263 = vector.extract_strided_slice %99 {offsets = [0, 5, 0], sizes = [2, 16, 16], strides = [1, 1, 1]} : vector<2x22x16xf32> to vector<2x16x16xf32>
      %264 = vector.broadcast %84 : f32 to vector<2x16x16xf32>
      %265 = arith.mulf %264, %263 : vector<2x16x16xf32>
      %266 = arith.addf %262, %265 : vector<2x16x16xf32>
      %267 = vector.extract_strided_slice %100 {offsets = [0, 5, 0], sizes = [2, 16, 16], strides = [1, 1, 1]} : vector<2x22x16xf32> to vector<2x16x16xf32>
      %268 = vector.broadcast %85 : f32 to vector<2x16x16xf32>
      %269 = arith.mulf %268, %267 : vector<2x16x16xf32>
      %270 = arith.addf %266, %269 : vector<2x16x16xf32>
      %271 = vector.extract_strided_slice %94 {offsets = [0, 6, 0], sizes = [2, 16, 16], strides = [1, 1, 1]} : vector<2x22x16xf32> to vector<2x16x16xf32>
      %272 = vector.broadcast %86 : f32 to vector<2x16x16xf32>
      %273 = arith.mulf %272, %271 : vector<2x16x16xf32>
      %274 = arith.addf %242, %273 : vector<2x16x16xf32>
      %275 = vector.extract_strided_slice %95 {offsets = [0, 6, 0], sizes = [2, 16, 16], strides = [1, 1, 1]} : vector<2x22x16xf32> to vector<2x16x16xf32>
      %276 = vector.broadcast %87 : f32 to vector<2x16x16xf32>
      %277 = arith.mulf %276, %275 : vector<2x16x16xf32>
      %278 = arith.addf %274, %277 : vector<2x16x16xf32>
      %279 = vector.extract_strided_slice %96 {offsets = [0, 6, 0], sizes = [2, 16, 16], strides = [1, 1, 1]} : vector<2x22x16xf32> to vector<2x16x16xf32>
      %280 = vector.broadcast %88 : f32 to vector<2x16x16xf32>
      %281 = arith.mulf %280, %279 : vector<2x16x16xf32>
      %282 = arith.addf %278, %281 : vector<2x16x16xf32>
      %283 = vector.extract_strided_slice %97 {offsets = [0, 6, 0], sizes = [2, 16, 16], strides = [1, 1, 1]} : vector<2x22x16xf32> to vector<2x16x16xf32>
      %284 = vector.broadcast %89 : f32 to vector<2x16x16xf32>
      %285 = arith.mulf %284, %283 : vector<2x16x16xf32>
      %286 = arith.addf %282, %285 : vector<2x16x16xf32>
      %287 = vector.extract_strided_slice %98 {offsets = [0, 6, 0], sizes = [2, 16, 16], strides = [1, 1, 1]} : vector<2x22x16xf32> to vector<2x16x16xf32>
      %288 = vector.broadcast %90 : f32 to vector<2x16x16xf32>
      %289 = arith.mulf %288, %287 : vector<2x16x16xf32>
      %290 = arith.addf %286, %289 : vector<2x16x16xf32>
      %291 = vector.extract_strided_slice %99 {offsets = [0, 6, 0], sizes = [2, 16, 16], strides = [1, 1, 1]} : vector<2x22x16xf32> to vector<2x16x16xf32>
      %292 = vector.broadcast %91 : f32 to vector<2x16x16xf32>
      %293 = arith.mulf %292, %291 : vector<2x16x16xf32>
      %294 = arith.addf %290, %293 : vector<2x16x16xf32>
      %295 = vector.extract_strided_slice %100 {offsets = [0, 6, 0], sizes = [2, 16, 16], strides = [1, 1, 1]} : vector<2x22x16xf32> to vector<2x16x16xf32>
      %296 = vector.broadcast %92 : f32 to vector<2x16x16xf32>
      %297 = arith.mulf %296, %295 : vector<2x16x16xf32>
      %298 = arith.addf %294, %297 : vector<2x16x16xf32>
      %299 = arith.addf %298, %270 : vector<2x16x16xf32>
      %cst_97 = arith.constant 5.000000e-01 : f32
      %300 = vector.broadcast %cst_97 : f32 to vector<2x16x16xf32>
      %301 = arith.mulf %300, %299 : vector<2x16x16xf32>
      %302 = math.tanh %301 : vector<2x16x16xf32>
      %cst_98 = arith.constant 1.000000e+00 : f32
      %303 = vector.broadcast %cst_98 : f32 to vector<2x16x16xf32>
      %304 = arith.addf %302, %303 : vector<2x16x16xf32>
      %cst_99 = arith.constant 5.000000e-01 : f32
      %305 = vector.broadcast %cst_99 : f32 to vector<2x16x16xf32>
      %306 = arith.mulf %305, %304 : vector<2x16x16xf32>
      %c0_100 = arith.constant 0 : index
      %c0_101 = arith.constant 0 : index
      %c0_102 = arith.constant 0 : index
      %c0_103 = arith.constant 0 : index
      %307 = vector.load %arg4[%c0_100, %c0_101, %c0_102, %c0_103] : memref<2x1x16x16xf32, #tpu.memory_space<vmem>>, vector<2x1x16x16xf32>
      %308 = vector.shape_cast %307 : vector<2x1x16x16xf32> to vector<2x16x16xf32>
      %309 = vector.shape_cast %306 : vector<2x16x16xf32> to vector<2x1x16x16xf32>
      tpu.vector_store %arg4[%c0_100, %c0_101, %c0_102, %c0_103], %309 {strides = array<i32>} : memref<2x1x16x16xf32, #tpu.memory_space<vmem>>, vector<2x1x16x16xf32>,
    } else {
    }
    return
  }
  func.func @transform_0(%arg0: i32, %arg1: i32) -> i32 {
    %c0_i32 = arith.constant 0 : i32
    %c0_i32_0 = arith.constant 0 : i32
    return %c0_i32 : i32
  }
  func.func @transform_1(%arg0: i32, %arg1: i32) -> (i32, i32, i32) {
    %c0_i32 = arith.constant 0 : i32
    %c0_i32_0 = arith.constant 0 : i32
    return %arg0, %arg1, %c0_i32 : i32, i32, i32
  }
  func.func @transform_2(%arg0: i32, %arg1: i32) -> (i32, i32, i32, i32) {
    %c0_i32 = arith.constant 0 : i32
    %c0_i32_0 = arith.constant 0 : i32
    %c0_i32_1 = arith.constant 0 : i32
    %c0_i32_2 = arith.constant 0 : i32
    return %arg0, %c0_i32, %c0_i32_0, %c0_i32_1 : i32, i32, i32, i32
  }
}

</mosaic_0001>

<bundles_post_ra>
// kernel: tpu_custom_call.1
= control target key start
LH: loop header
LB: loop body
LE: loop exit
PB: predicated region body
PF: predicated region fallthrough
CT: control target
= control target key end

     0   :  { %7 = vsyncpa [#allocation7], 0  ;;  %s3748_s0 = inlined_call_operand.hbm [shape: f32[49], index: 0, kind: input, shape index: {}]   ;;  %s3749_s1 = inlined_call_operand.hbm [shape: f32[2,4,256], index: 1, kind: input, shape index: {}]   ;;  %s3750_s2 = inlined_call_operand.hbm [shape: f32[2,1,16,16], index: 2, kind: output, shape index: {}]  }
   0x1   :  { %8 = vsyncpa [#allocation5], 0 }
   0x2   :  { %9 = vsyncpa [#allocation6], 0  ;;  %s15_s11 = sshll.u32 %s3748_s0, 4  ;;  %s23_s14 = sshll.u32 %s3749_s1, 4  ;;  %s16_s11 = int_to_ptr.hbm [resolvable:$true] %s15_s11  ;;  %s24_s14 = int_to_ptr.hbm [resolvable:$true] %s23_s14 }
   0x3   :  { %s2512_s15 = smov [#allocation4]   ;;  %s2513_s16 = smov [#allocation8]  }
   0x4   :  { %18 = dma.hbm_to_smem %s16_s11, 16, %s2512_s15, [#allocation7]  }
   0x5   :  { %s25_s17 = sshll.u32 %s2513_s16, 4  ;;  %s2514_s18 = smov 128   ;;  %s26_s17 = int_to_ptr.vmem [resolvable:$true] %s25_s17 }
   0x6   :  { %s2515_s19 = smov 8  }
   0x7   :  { %31 = dma.hbm_to_vmem [thread:$0]  %s24_s14, 256, %s26_s17, [#allocation5], %s2514_s18, %s2514_s18, %s2515_s19  }
   0x8   :  { %2506 = dma.done.wait [#allocation7], 16  }
   0x9   :  { %2507 = vsyncadd [#allocation7], 4294967280 }
   0xa   :  { %2508 = dma.done.wait [#allocation5], 256  }
   0xb   :  { %2509 = vsyncadd [#allocation5], 4294967040 }
   0xc   :  { %40 = sfence }
   0xd   :  { %v41_v0 = vld [vmem:[#allocation8] sm:$0xff]  ;;  %v42_v1 = vld [vmem:[#allocation8 + $0x8] sm:$0xff]  ;;  %vm56_vm0 = vcmask 1043456   ;;  %v100_v26 = vlaneseq  ;;  %vm95_vm1 = vcmask 1040384   ;;  %s2516_s0 = smov 115   ;;  %s2517_s1 = smov 3  }
   0xe   :  { %45 = vst [vmem:[#allocation1] ss:$2 sm:$0xff] %v41_v0  ;;  %s2518_s20 = smov 99   ;;  %s2519_s21 = smov 83   ;;  %vm106_vm3 = vcmask 174080   ;;  %vm111_vm4 = vcmask 23552  }
   0xf   :  { %49 = vst [vmem:[#allocation1 + $0x10] ss:$2 sm:$0xff] %v42_v1  ;;  %vm102_vm2 = vcmp.lt.s32.totalorder %v100_v26, 256  ;;  %s2520_s22 = smov 67   ;;  %s2521_s23 = smov 51   ;;  %vm119_vm5 = vcmask 179352  }
  0x10   :  { %s2522_s24 = smov 35   ;;  %s2523_s25 = smov 19   ;;  %v2524_v60 = vmov 0.0   ;;  %vm167_vm6 = vcmask 147480   ;;  %vm114_vm7 = vcmask 21504   ;;  %vm122_vm8 = vcmask 177304  }
  0x11   :  { %107 = vst.msk [vmem:[#allocation2] sm:$0x7] %vm106_vm3, %v2524_v60  ;;  %s2326_s26 = sld [smem:[#allocation4 + $0x1]]  ;;  %s2525_s27 = smov 127   ;;  %vm842_vm9 = vcmask 1045504   ;;  %vm2007_vm10 = vcmask 1041408  }
  0x12   :  { %112 = vst.msk [vmem:[#allocation2] sm:$0xff] %vm111_vm4, %v2524_v60  ;;  %s2327_s28 = sld [smem:[#allocation4 + $0x2]]  ;;  %s2526_s30 = smov 126   ;;  %vm2266_vm11 = vcmask 1046528   ;;  %vm2301_vm12 = vcmask 130048  }
  0x13   :  { %120 = vst.msk [vmem:[#allocation2] sm:$0xff] %vm119_vm5, %v2524_v60  ;;  %s2328_s29 = sld [smem:[#allocation4 + $0x3]]  ;;  %s2527_s3 = smov 125  }
  0x14   :  { %108 = vst.msk [vmem:[#allocation2 + $0x18] sm:$0x7] %vm106_vm3, %v2524_v60  ;;  %s2329_s4 = sld [smem:[#allocation4 + $0x4]]  ;;  %s2528_s6 = smov 124  }
  0x15   :  { %v46_v2 = vld.sshfl [vmem:[#allocation1] sm:$0xff pattern:$0x75316420]  ;;  %v47_v3 = vld.sshfl [vmem:[#allocation1 + $0x8] sm:$0xff pattern:$0x75316420] }
  0x16   :  { %v50_v4 = vld.sshfl [vmem:[#allocation1 + $0x10] sm:$0xff pattern:$0x75316420]  ;;  %v51_v5 = vld.sshfl [vmem:[#allocation1 + $0x18] sm:$0xff pattern:$0x75316420] }
  0x17   :  { %v57_v6 = vsel %vm56_vm0, %v46_v2, -inf  ;;  %v64_v7 = vsel %vm56_vm0, %v47_v3, -inf  ;;  %v71_v8 = vsel %vm56_vm0, %v50_v4, -inf  ;;  %v78_v9 = vsel %vm56_vm0, %v51_v5, -inf  ;;  %109 = vst.msk [vmem:[#allocation2 + $0x13] sm:$0x7] %vm106_vm3, %v2524_v60 }
  0x18   :  { %v58_v10 = vrot.slane %v57_v6, 4  ;;  %v65_v11 = vrot.slane %v64_v7, 4  ;;  %v72_v12 = vrot.slane %v71_v8, 4  ;;  %v79_v13 = vrot.slane %v78_v9, 4  ;;  %110 = vst.msk [vmem:[#allocation2 + $0x2b] sm:$0x7] %vm106_vm3, %v2524_v60 }
  0x19   :  { %113 = vst.msk [vmem:[#allocation2 + $0x8] sm:$0xff] %vm111_vm4, %v2524_v60  ;;  %s2330_s5 = sld [smem:[#allocation4 + $0x5]]  ;;  %s2529_s8 = smov 123  }
  0x1a   :  { %v59_v14 = vmax.f32 %v57_v6, %v58_v10  ;;  %v66_v15 = vmax.f32 %v64_v7, %v65_v11  ;;  %v73_v16 = vmax.f32 %v71_v8, %v72_v12  ;;  %v80_v17 = vmax.f32 %v78_v9, %v79_v13  ;;  %117 = vst.msk [vmem:[#allocation2 + $0x20] sm:$0xff] %vm111_vm4, %v2524_v60  ;;  %s2331_s7 = sld [smem:[#allocation4 + $0x6]]  ;;  %s2530_s9 = smov 122  }
  0x1b   :  { %116 = vst.msk [vmem:[#allocation2 + $0x18] sm:$0xff] %vm111_vm4, %v2524_v60  ;;  %s2333_s10 = sld [smem:[#allocation4 + $0x8]] }
  0x1c   :  { %v60_v18 = vrot.slane %v59_v14, 2  ;;  %v67_v19 = vrot.slane %v66_v15, 2  ;;  %v74_v20 = vrot.slane %v73_v16, 2  ;;  %v81_v21 = vrot.slane %v80_v17, 2  ;;  %121 = vst.msk [vmem:[#allocation2 + $0x8] sm:$0xff] %vm119_vm5, %v2524_v60  ;;  %s2334_s11 = sld [smem:[#allocation4 + $0x9]] }
  0x1d   :  { %125 = vst.msk [vmem:[#allocation2 + $0x20] sm:$0xff] %vm119_vm5, %v2524_v60  ;;  %s2335_s12 = sld [smem:[#allocation4 + $0xa]] }
  0x1e   :  { %v61_v22 = vmax.f32 %v59_v14, %v60_v18  ;;  %v68_v23 = vmax.f32 %v66_v15, %v67_v19  ;;  %v75_v24 = vmax.f32 %v73_v16, %v74_v20  ;;  %v82_v25 = vmax.f32 %v80_v17, %v81_v21  ;;  %124 = vst.msk [vmem:[#allocation2 + $0x18] sm:$0xff] %vm119_vm5, %v2524_v60  ;;  %s2336_s13 = sld [smem:[#allocation4 + $0xb]] }
  0x1f   :  { %v444_v20 = vstv %s2326_s26  ;;  %115 = vst.msk [vmem:[#allocation2 + $0x10] sm:$0x3f] %vm114_vm7, %v2524_v60  ;;  %s2337_s14 = sld [smem:[#allocation4 + $0xc]] }
  0x20   :  { %v62_v27 = vrot.slane %v61_v22, 1  ;;  %v69_v28 = vrot.slane %v68_v23, 1  ;;  %v76_v29 = vrot.slane %v75_v24, 1  ;;  %v83_v30 = vrot.slane %v82_v25, 1  ;;  %123 = vst.msk [vmem:[#allocation2 + $0x10] sm:$0x3f] %vm122_vm8, %v2524_v60 }
  0x21   :  { %118 = vst.msk [vmem:[#allocation2 + $0x28] sm:$0x3f] %vm114_vm7, %v2524_v60  ;;  %s2338_s15 = sld [smem:[#allocation4 + $0xd]] }
  0x22   :  { %v63_v31 = vmax.f32 %v61_v22, %v62_v27  ;;  %v70_v32 = vmax.f32 %v68_v23, %v69_v28  ;;  %v77_v33 = vmax.f32 %v75_v24, %v76_v29  ;;  %v84_v34 = vmax.f32 %v82_v25, %v83_v30  ;;  %126 = vst.msk [vmem:[#allocation2 + $0x28] sm:$0x3f] %vm122_vm8, %v2524_v60  ;;  %s2340_s16 = sld [smem:[#allocation4 + $0xf]] }
  0x23   :  { %s2341_s17 = sld [smem:[#allocation4 + $0x10]] }
  0x24   :  { %v93_v35 = vrot.slane %v70_v32, 7  ;;  %v94_v36 = vrot.slane %v84_v34, 7  ;;  %s2332_s26 = sld [smem:[#allocation4 + $0x7]] }
  0x26   :  { %v96_v37 = vsel %vm95_vm1, %v63_v31, %v93_v35  ;;  %v97_v38 = vsel %vm95_vm1, %v77_v33, %v94_v36 }
  0x27   :  { %104 = vst.msk [vmem:[#allocation3] sm:$0x3] %vm102_vm2, %v96_v37 }
  0x28   :  { %105 = vst.msk [vmem:[#allocation3 + $0x2] sm:$0x3] %vm102_vm2, %v97_v38 }
  0x2e   :  { %v2394_v39 = vld [vmem:[#allocation3] ss:$0 sm:$0xff]  ;;  %v2407_v54 = vld [vmem:[#allocation3 + $0x1] ss:$0 sm:$0xff] }
  0x2f   :  { %v2395_v40 = vld [vmem:[#allocation3] ss:$0 sm:$0xff]  ;;  %176 = vrot.lane.b32.xlu1 %v2394_v39, %s2516_s0  ;;  %v2396_v42 = vld [vmem:[#allocation3 + $0x2] ss:$0 sm:$0xff]  ;;  %v2417_v56 = vld [vmem:[#allocation3 + $0x3] ss:$0 sm:$0xff] }
  0x30   :  { %161 = vrot.lane.b32.xlu0 %v2395_v40, %s2517_s1  ;;  %v2400_v41 = vld [vmem:[#allocation3] ss:$0 sm:$0xff]  ;;  %v2397_v43 = vld [vmem:[#allocation3 + $0x2] ss:$0 sm:$0xff]  ;;  %v2409_v57 = vld [vmem:[#allocation3 + $0x3] ss:$0 sm:$0xff] }
  0x31   :  { %190 = vrot.lane.b32.xlu2 %v2400_v41, %s2518_s20  ;;  %v2403_v44 = vld [vmem:[#allocation3 + $0x2] ss:$0 sm:$0xff]  ;;  %v2399_v46 = vld [vmem:[#allocation3] ss:$0 sm:$0xff]  ;;  %v2410_v58 = vld [vmem:[#allocation3 + $0x1] ss:$0 sm:$0xff] }
  0x32   :  { %v2398_v45 = vld [vmem:[#allocation3 + $0x2] ss:$0 sm:$0xff]  ;;  %v2406_v47 = vld [vmem:[#allocation3] ss:$0 sm:$0xff]  ;;  %v2420_v59 = vld [vmem:[#allocation3 + $0x1] ss:$0 sm:$0xff] }
  0x33   :  { %v2401_v48 = vld [vmem:[#allocation3] ss:$0 sm:$0xff]  ;;  %v2402_v49 = vld [vmem:[#allocation3 + $0x2] ss:$0 sm:$0xff]  ;;  %v2412_v61 = vld [vmem:[#allocation3 + $0x1] ss:$0 sm:$0xff] }
  0x34   :  { %v2411_v50 = vld [vmem:[#allocation3 + $0x2] ss:$0 sm:$0xff]  ;;  %v2405_v52 = vld [vmem:[#allocation3] ss:$0 sm:$0xff]  ;;  %v2413_v62 = vld [vmem:[#allocation3 + $0x3] ss:$0 sm:$0xff] }
  0x35   :  { %v2404_v51 = vld [vmem:[#allocation3 + $0x2] ss:$0 sm:$0xff]  ;;  %v2414_v53 = vld [vmem:[#allocation3] ss:$0 sm:$0xff]  ;;  %v2423_v63 = vld [vmem:[#allocation3 + $0x3] ss:$0 sm:$0xff] }
  0x36   :  { %v2408_v55 = vld [vmem:[#allocation3 + $0x2] ss:$0 sm:$0xff]  ;;  %v2415_v0 = vld [vmem:[#allocation3 + $0x3] ss:$0 sm:$0xff]  ;;  %v2416_v1 = vld [vmem:[#allocation3 + $0x1] ss:$0 sm:$0xff] }
  0x37   :  { %178 = vrot.lane.b32.xlu1 %v2396_v42, %s2516_s0  ;;  %v2424_v2 = vld [vmem:[#allocation3 + $0x1] ss:$0 sm:$0xff]  ;;  %v2419_v4 = vld [vmem:[#allocation3 + $0x3] ss:$0 sm:$0xff] }
  0x38   :  { %163 = vrot.lane.b32.xlu0 %v2397_v43, %s2517_s1  ;;  %v2418_v3 = vld [vmem:[#allocation3 + $0x1] ss:$0 sm:$0xff]  ;;  %v2425_v5 = vld [vmem:[#allocation3 + $0x3] ss:$0 sm:$0xff] }
  0x39   :  { %192 = vrot.lane.b32.xlu2 %v2403_v44, %s2518_s20  ;;  %v2421_v6 = vld [vmem:[#allocation3 + $0x3] ss:$0 sm:$0xff]  ;;  %v2422_v7 = vld [vmem:[#allocation3 + $0x1] ss:$0 sm:$0xff] }
  0x3f   :  { %206 = vrot.lane.b32.xlu1 %v2398_v45, %s2519_s21 }
  0x40   :  { %204 = vrot.lane.b32.xlu0 %v2399_v46, %s2519_s21  ;;  %v469_v46 = vstv %s2327_s28  ;;  %s2349_s28 = sld [smem:[#allocation4 + $0x18]] }
  0x41   :  { %218 = vrot.lane.b32.xlu2 %v2406_v47, %s2520_s22 }
  0x47   :  { %232 = vrot.lane.b32.xlu1 %v2401_v48, %s2521_s23 }
  0x48   :  { %220 = vrot.lane.b32.xlu0 %v2402_v49, %s2520_s22  ;;  %v494_v49 = vstv %s2328_s29  ;;  %s2346_s29 = sld [smem:[#allocation4 + $0x15]] }
  0x49   :  { %234 = vrot.lane.b32.xlu2 %v2411_v50, %s2521_s23 }
  0x4f   :  { %248 = vrot.lane.b32.xlu1 %v2404_v51, %s2522_s24 }
  0x50   :  { %246 = vrot.lane.b32.xlu0 %v2405_v52, %s2522_s24 }
  0x51   :  { %260 = vrot.lane.b32.xlu2 %v2414_v53, %s2523_s25 }
  0x57   :  { %274 = vrot.lane.b32.xlu1 %v2407_v54, %s2517_s1 }
  0x58   :  { %262 = vrot.lane.b32.xlu0 %v2408_v55, %s2523_s25 }
  0x59   :  { %276 = vrot.lane.b32.xlu2 %v2417_v56, %s2517_s1  ;;  %s2343_s1 = sld [smem:[#allocation4 + $0x12]] }
  0x5f   :  { %290 = vrot.lane.b32.xlu1 %v2409_v57, %s2516_s0 }
  0x60   :  { %288 = vrot.lane.b32.xlu0 %v2410_v58, %s2516_s0  ;;  %v519_v58 = vstv %s2329_s4  ;;  %s2342_s0 = sld [smem:[#allocation4 + $0x11]] }
  0x61   :  { %302 = vrot.lane.b32.xlu2 %v2420_v59, %s2518_s20  ;;  %s2350_s4 = sld [smem:[#allocation4 + $0x19]] }
  0x67   :  { %316 = vrot.lane.b32.xlu1 %v2412_v61, %s2519_s21 }
  0x68   :  { %304 = vrot.lane.b32.xlu0 %v2413_v62, %s2518_s20  ;;  %s2344_s20 = sld [smem:[#allocation4 + $0x13]] }
  0x69   :  { %318 = vrot.lane.b32.xlu2 %v2423_v63, %s2519_s21  ;;  %v544_v63 = vstv %s2330_s5  ;;  %s2345_s21 = sld [smem:[#allocation4 + $0x14]] }
  0x6a   :  { %s2351_s5 = sld [smem:[#allocation4 + $0x1a]] }
  0x6f   :  { %332 = vrot.lane.b32.xlu1 %v2415_v0, %s2520_s22 }
  0x70   :  { %330 = vrot.lane.b32.xlu0 %v2416_v1, %s2520_s22  ;;  %s2347_s22 = sld [smem:[#allocation4 + $0x16]] }
  0x71   :  { %344 = vrot.lane.b32.xlu2 %v2424_v2, %s2521_s23  ;;  %v569_v2 = vstv %s2331_s7  ;;  %s2352_s7 = sld [smem:[#allocation4 + $0x1b]] }
  0x77   :  { %358 = vrot.lane.b32.xlu1 %v2418_v3, %s2522_s24 }
  0x78   :  { %346 = vrot.lane.b32.xlu0 %v2419_v4, %s2521_s23  ;;  %s380_s23 = sld [smem:[#allocation4]] }
  0x79   :  { %360 = vrot.lane.b32.xlu2 %v2425_v5, %s2522_s24  ;;  %s2348_s24 = sld [smem:[#allocation4 + $0x17]] }
  0x7f   :  { %374 = vrot.lane.b32.xlu1 %v2421_v6, %s2523_s25 }
  0x80   :  { %372 = vrot.lane.b32.xlu0 %v2422_v7, %s2523_s25  ;;  %s2339_s25 = sld [smem:[#allocation4 + $0xe]] }
  0x8b   :  { %v191_v8 = vpop.permute.xlu2 %190 }
  0x8c   :  { %196 = vst.msk [vmem:[#allocation2 + $0x5] sm:$0x1] %vm167_vm6, %v191_v8 }
  0x93   :  { %v193_v9 = vpop.permute.xlu2 %192 }
  0x94   :  { %197 = vst.msk [vmem:[#allocation2 + $0x1d] sm:$0x1] %vm167_vm6, %v193_v9  ;;  %v607_v9 = vstv %s2333_s10  ;;  %s2354_s10 = sld [smem:[#allocation4 + $0x1d]] }
  0x9b   :  { %v219_v10 = vpop.permute.xlu2 %218 }
  0x9c   :  { %224 = vst.msk [vmem:[#allocation2 + $0x7] sm:$0x1] %vm167_vm6, %v219_v10 }
  0xa1   :  { %v177_v11 = vpop.permute.xlu1 %176 }
  0xa2   :  { %182 = vst.msk [vmem:[#allocation2 + $0x4] sm:$0x1] %vm167_vm6, %v177_v11  ;;  %v162_v12 = vpop.permute.xlu0 %161 }
  0xa3   :  { %168 = vst.msk [vmem:[#allocation2 + $0x3] sm:$0x1] %vm167_vm6, %v162_v12  ;;  %v235_v13 = vpop.permute.xlu2 %234 }
  0xa4   :  { %239 = vst.msk [vmem:[#allocation2 + $0x20] sm:$0x1] %vm167_vm6, %v235_v13 }
  0xa9   :  { %v179_v14 = vpop.permute.xlu1 %178 }
  0xaa   :  { %183 = vst.msk [vmem:[#allocation2 + $0x1c] sm:$0x1] %vm167_vm6, %v179_v14  ;;  %v164_v15 = vpop.permute.xlu0 %163 }
  0xab   :  { %169 = vst.msk [vmem:[#allocation2 + $0x1b] sm:$0x1] %vm167_vm6, %v164_v15  ;;  %v261_v16 = vpop.permute.xlu2 %260 }
  0xac   :  { %266 = vst.msk [vmem:[#allocation2 + $0xa] sm:$0x1] %vm167_vm6, %v261_v16 }
  0xb1   :  { %v207_v17 = vpop.permute.xlu1 %206 }
  0xb2   :  { %211 = vst.msk [vmem:[#allocation2 + $0x1e] sm:$0x1] %vm167_vm6, %v207_v17  ;;  %v205_v18 = vpop.permute.xlu0 %204 }
  0xb3   :  { %210 = vst.msk [vmem:[#allocation2 + $0x6] sm:$0x1] %vm167_vm6, %v205_v18  ;;  %v277_v19 = vpop.permute.xlu2 %276  ;;  %v644_v18 = vstv %s2334_s11  ;;  %s2355_s11 = sld [smem:[#allocation4 + $0x1e]] }
  0xb4   :  { %281 = vst.msk [vmem:[#allocation2 + $0x23] sm:$0x1] %vm167_vm6, %v277_v19 }
  0xb9   :  { %v233_v21 = vpop.permute.xlu1 %232 }
  0xba   :  { %v2624_v22 = vld [vmem:[#allocation2] sm:$0xff]  ;;  %238 = vst.msk [vmem:[#allocation2 + $0x8] sm:$0x1] %vm167_vm6, %v233_v21  ;;  %v221_v23 = vpop.permute.xlu0 %220 }
  0xbb   :  { %225 = vst.msk [vmem:[#allocation2 + $0x1f] sm:$0x1] %vm167_vm6, %v221_v23  ;;  %v445_v24 = vmul.f32 %v444_v20, %v2624_v22  ;;  %v303_v25 = vpop.permute.xlu2 %302  ;;  %v495_v53 = vmul.f32 %v494_v49, %v2624_v22  ;;  %v470_v54 = vmul.f32 %v469_v46, %v2624_v22  ;;  %v520_v59 = vmul.f32 %v519_v58, %v2624_v22 }
  0xbc   :  { %308 = vst.msk [vmem:[#allocation2 + $0xd] sm:$0x1] %vm167_vm6, %v303_v25  ;;  %v570_v4 = vmul.f32 %v569_v2, %v2624_v22  ;;  %v545_v5 = vmul.f32 %v544_v63, %v2624_v22  ;;  %v608_v12 = vmul.f32 %v607_v9, %v2624_v22  ;;  %v645_v19 = vmul.f32 %v644_v18, %v2624_v22 }
  0xbd   :  { %453 = vrot.lane.b32.xlu2 %v445_v24, %s2525_s27 }
  0xc1   :  { %v249_v26 = vpop.permute.xlu1 %248 }
  0xc2   :  { %v2631_v27 = vld [vmem:[#allocation2 + $0x18] sm:$0xff]  ;;  %253 = vst.msk [vmem:[#allocation2 + $0x21] sm:$0x1] %vm167_vm6, %v249_v26  ;;  %v247_v28 = vpop.permute.xlu0 %246 }
  0xc3   :  { %252 = vst.msk [vmem:[#allocation2 + $0x9] sm:$0x1] %vm167_vm6, %v247_v28  ;;  %v447_v29 = vmul.f32 %v444_v20, %v2631_v27  ;;  %v319_v30 = vpop.permute.xlu2 %318  ;;  %v472_v52 = vmul.f32 %v469_v46, %v2631_v27  ;;  %v522_v60 = vmul.f32 %v519_v58, %v2631_v27  ;;  %v497_v61 = vmul.f32 %v494_v49, %v2631_v27 }
  0xc4   :  { %323 = vst.msk [vmem:[#allocation2 + $0x26] sm:$0x1] %vm167_vm6, %v319_v30  ;;  %v547_v3 = vmul.f32 %v544_v63, %v2631_v27  ;;  %v572_v13 = vmul.f32 %v569_v2, %v2631_v27  ;;  %v611_v15 = vmul.f32 %v607_v9, %v2631_v27  ;;  %v648_v23 = vmul.f32 %v644_v18, %v2631_v27 }
  0xc5   :  { %457 = vrot.lane.b32.xlu1 %v447_v29, %s2525_s27  ;;  %v681_v28 = vstv %s2335_s12  ;;  %s2356_s12 = sld [smem:[#allocation4 + $0x1f]] }
  0xc6   :  { %v682_v29 = vmul.f32 %v681_v28, %v2624_v22 }
  0xc9   :  { %v275_v31 = vpop.permute.xlu1 %274 }
  0xca   :  { %280 = vst.msk [vmem:[#allocation2 + $0xb] sm:$0x1] %vm167_vm6, %v275_v31  ;;  %v263_v32 = vpop.permute.xlu0 %262 }
  0xcb   :  { %267 = vst.msk [vmem:[#allocation2 + $0x22] sm:$0x1] %vm167_vm6, %v263_v32  ;;  %v345_v33 = vpop.permute.xlu2 %344 }
  0xcc   :  { %350 = vst.msk [vmem:[#allocation2 + $0x10] sm:$0x1] %vm167_vm6, %v345_v33  ;;  %v685_v33 = vmul.f32 %v681_v28, %v2631_v27 }
  0xd1   :  { %v291_v34 = vpop.permute.xlu1 %290 }
  0xd2   :  { %295 = vst.msk [vmem:[#allocation2 + $0x24] sm:$0x1] %vm167_vm6, %v291_v34  ;;  %v289_v35 = vpop.permute.xlu0 %288 }
  0xd3   :  { %294 = vst.msk [vmem:[#allocation2 + $0xc] sm:$0x1] %vm167_vm6, %v289_v35  ;;  %v361_v36 = vpop.permute.xlu2 %360 }
  0xd4   :  { %365 = vst.msk [vmem:[#allocation2 + $0x29] sm:$0x1] %vm167_vm6, %v361_v36 }
  0xd9   :  { %v317_v37 = vpop.permute.xlu1 %316 }
  0xda   :  { %322 = vst.msk [vmem:[#allocation2 + $0xe] sm:$0x1] %vm167_vm6, %v317_v37  ;;  %v305_v38 = vpop.permute.xlu0 %304  ;;  %v718_v37 = vstv %s2336_s13  ;;  %s3288_s13 = sld [smem:[#allocation4 + $0x20]] }
  0xdb   :  { %309 = vst.msk [vmem:[#allocation2 + $0x25] sm:$0x1] %vm167_vm6, %v305_v38  ;;  %v719_v38 = vmul.f32 %v718_v37, %v2624_v22 }
  0xe1   :  { %v333_v39 = vpop.permute.xlu1 %332 }
  0xe2   :  { %337 = vst.msk [vmem:[#allocation2 + $0x27] sm:$0x1] %vm167_vm6, %v333_v39  ;;  %v331_v40 = vpop.permute.xlu0 %330 }
  0xe3   :  { %336 = vst.msk [vmem:[#allocation2 + $0xf] sm:$0x1] %vm167_vm6, %v331_v40 }
  0xe9   :  { %v2652_v41 = vld [vmem:[#allocation2 + $0x20] sm:$0xff]  ;;  %v359_v42 = vpop.permute.xlu1 %358 }
  0xea   :  { %v2654_v43 = vld [vmem:[#allocation2 + $0x8] sm:$0xff]  ;;  %364 = vst.msk [vmem:[#allocation2 + $0x11] sm:$0x1] %vm167_vm6, %v359_v42  ;;  %v347_v44 = vpop.permute.xlu0 %346  ;;  %v448_v45 = vmul.f32 %v444_v20, %v2652_v41  ;;  %v498_v56 = vmul.f32 %v494_v49, %v2652_v41  ;;  %v473_v57 = vmul.f32 %v469_v46, %v2652_v41  ;;  %v523_v62 = vmul.f32 %v519_v58, %v2652_v41 }
  0xeb   :  { %351 = vst.msk [vmem:[#allocation2 + $0x28] sm:$0x1] %vm167_vm6, %v347_v44  ;;  %v471_v47 = vmul.f32 %v469_v46, %v2654_v43  ;;  %v446_v48 = vmul.f32 %v444_v20, %v2654_v43  ;;  %v496_v55 = vmul.f32 %v494_v49, %v2654_v43  ;;  %v546_v0 = vmul.f32 %v544_v63, %v2654_v43 }
  0xec   :  { %459 = vrot.lane.b32.xlu2 %v448_v45, %s2525_s27  ;;  %v521_v1 = vmul.f32 %v519_v58, %v2654_v43  ;;  %v571_v6 = vmul.f32 %v569_v2, %v2654_v43  ;;  %v573_v7 = vmul.f32 %v569_v2, %v2652_v41  ;;  %v548_v8 = vmul.f32 %v544_v63, %v2652_v41 }
  0xed   :  { %480 = vrot.lane.b32.xlu1 %v471_v47, %s2526_s30  ;;  %455 = vrot.lane.b32.xlu0 %v446_v48, %s2525_s27  ;;  %v609_v16 = vmul.f32 %v607_v9, %v2654_v43  ;;  %v612_v20 = vmul.f32 %v607_v9, %v2652_v41  ;;  %v646_v24 = vmul.f32 %v644_v18, %v2654_v43 }
  0xee   :  { %v649_v30 = vmul.f32 %v644_v18, %v2652_v41  ;;  %v683_v34 = vmul.f32 %v681_v28, %v2654_v43  ;;  %v686_v39 = vmul.f32 %v681_v28, %v2652_v41  ;;  %v722_v45 = vmul.f32 %v718_v37, %v2631_v27 }
  0xef   :  { %v720_v46 = vmul.f32 %v718_v37, %v2654_v43 }
  0xf1   :  { %v375_v50 = vpop.permute.xlu1 %374 }
  0xf2   :  { %379 = vst.msk [vmem:[#allocation2 + $0x2a] sm:$0x1] %vm167_vm6, %v375_v50  ;;  %v373_v51 = vpop.permute.xlu0 %372 }
  0xf3   :  { %378 = vst.msk [vmem:[#allocation2 + $0x12] sm:$0x1] %vm167_vm6, %v373_v51  ;;  %v755_v51 = vstv %s2337_s14  ;;  %s2358_s14 = sld [smem:[#allocation4 + $0x21]] }
  0xf4   :  { %482 = vrot.lane.b32.xlu2 %v472_v52, %s2526_s30  ;;  %v756_v52 = vmul.f32 %v755_v51, %v2624_v22  ;;  %v759_v58 = vmul.f32 %v755_v51, %v2631_v27  ;;  %v760_v2 = vmul.f32 %v755_v51, %v2652_v41 }
  0xf5   :  { %503 = vrot.lane.b32.xlu1 %v495_v53, %s2527_s3  ;;  %478 = vrot.lane.b32.xlu0 %v470_v54, %s2526_s30  ;;  %v723_v53 = vmul.f32 %v718_v37, %v2652_v41 }
  0xf9   :  { %v2710_v14 = vld [vmem:[#allocation2 + $0x28] sm:$0x3f] }
  0xfa   :  { %v2702_v10 = vld [vmem:[#allocation2 + $0x10] sm:$0x3f]  ;;  %v613_v17 = vmul.f32 %v607_v9, %v2710_v14  ;;  %v650_v25 = vmul.f32 %v644_v18, %v2710_v14  ;;  %v687_v35 = vmul.f32 %v681_v28, %v2710_v14  ;;  %v724_v47 = vmul.f32 %v718_v37, %v2710_v14 }
  0xfb   :  { %v610_v11 = vmul.f32 %v607_v9, %v2702_v10  ;;  %v647_v21 = vmul.f32 %v644_v18, %v2702_v10  ;;  %v684_v31 = vmul.f32 %v681_v28, %v2702_v10  ;;  %v721_v40 = vmul.f32 %v718_v37, %v2702_v10 }
  0xfc   :  { %505 = vrot.lane.b32.xlu2 %v496_v55, %s2527_s3  ;;  %v758_v54 = vmul.f32 %v755_v51, %v2702_v10 }
  0xfd   :  { %509 = vrot.lane.b32.xlu1 %v498_v56, %s2527_s3  ;;  %484 = vrot.lane.b32.xlu0 %v473_v57, %s2526_s30 }
 0x104   :  { %528 = vrot.lane.b32.xlu2 %v520_v59, %s2528_s6  ;;  %v757_v59 = vmul.f32 %v755_v51, %v2654_v43 }
 0x105   :  { %532 = vrot.lane.b32.xlu1 %v522_v60, %s2528_s6  ;;  %507 = vrot.lane.b32.xlu0 %v497_v61, %s2527_s3  ;;  %v761_v60 = vmul.f32 %v755_v51, %v2710_v14 }
 0x10c   :  { %534 = vrot.lane.b32.xlu2 %v523_v62, %s2528_s6 }
 0x10d   :  { %555 = vrot.lane.b32.xlu1 %v546_v0, %s2529_s8  ;;  %530 = vrot.lane.b32.xlu0 %v521_v1, %s2528_s6  ;;  %v792_v0 = vstv %s2338_s15  ;;  %s2359_s15 = sld [smem:[#allocation4 + $0x22]] }
 0x10e   :  { %v793_v1 = vmul.f32 %v792_v0, %v2624_v22  ;;  %v794_v9 = vmul.f32 %v792_v0, %v2654_v43  ;;  %v797_v28 = vmul.f32 %v792_v0, %v2652_v41 }
 0x114   :  { %557 = vrot.lane.b32.xlu2 %v547_v3, %s2529_s8  ;;  %v795_v3 = vmul.f32 %v792_v0, %v2702_v10 }
 0x115   :  { %578 = vrot.lane.b32.xlu1 %v570_v4, %s2530_s9  ;;  %553 = vrot.lane.b32.xlu0 %v545_v5, %s2529_s8 }
 0x117   :  { %v2730_v26 = vpop.permute.xlu2 %453 }
 0x11c   :  { %580 = vrot.lane.b32.xlu2 %v571_v6, %s2530_s9 }
 0x11d   :  { %584 = vrot.lane.b32.xlu1 %v573_v7, %s2530_s9  ;;  %559 = vrot.lane.b32.xlu0 %v548_v8, %s2529_s8  ;;  %v796_v7 = vmul.f32 %v792_v0, %v2631_v27  ;;  %v861_v8 = vstv %s2340_s16  ;;  %s2361_s16 = sld [smem:[#allocation4 + $0x24]] }
 0x124   :  { %620 = vrot.lane.b32.xlu2 %v608_v12, %s2525_s27  ;;  %v863_v12 = vmul.f32 %v861_v8, %v2654_v43 }
 0x125   :  { %582 = vrot.lane.b32.xlu0 %v572_v13, %s2530_s9  ;;  %624 = vrot.lane.b32.xlu1 %v610_v11, %s2525_s27  ;;  %v798_v11 = vmul.f32 %v792_v0, %v2710_v14  ;;  %v866_v13 = vmul.f32 %v861_v8, %v2652_v41 }
 0x12c   :  { %626 = vrot.lane.b32.xlu2 %v611_v15, %s2525_s27  ;;  %v862_v15 = vmul.f32 %v861_v8, %v2624_v22 }
 0x12d   :  { %622 = vrot.lane.b32.xlu0 %v609_v16, %s2525_s27  ;;  %630 = vrot.lane.b32.xlu1 %v613_v17, %s2525_s27  ;;  %v865_v17 = vmul.f32 %v861_v8, %v2631_v27 }
 0x134   :  { %657 = vrot.lane.b32.xlu2 %v645_v19, %s2526_s30 }
 0x135   :  { %628 = vrot.lane.b32.xlu0 %v612_v20, %s2525_s27  ;;  %661 = vrot.lane.b32.xlu1 %v647_v21, %s2526_s30  ;;  %v875_v20 = vrot.slane %v863_v12, 2  ;;  %v880_v21 = vrot.slane %v866_v13, 2 }
 0x137   :  { %v2756_v44 = vpop.permute.xlu1 %457 }
 0x13c   :  { %663 = vrot.lane.b32.xlu2 %v648_v23, %s2526_s30  ;;  %v874_v23 = vrot.slane %v862_v15, 2 }
 0x13d   :  { %659 = vrot.lane.b32.xlu0 %v646_v24, %s2526_s30  ;;  %667 = vrot.lane.b32.xlu1 %v650_v25, %s2526_s30  ;;  %v879_v24 = vrot.slane %v865_v17, 2 }
 0x13e   :  { %v876_v25 = vsel %vm842_vm9, %v874_v23, %v875_v20 }
 0x144   :  { %694 = vrot.lane.b32.xlu2 %v682_v29, %s2527_s3  ;;  %v867_v29 = vmul.f32 %v861_v8, %v2710_v14 }
 0x145   :  { %665 = vrot.lane.b32.xlu0 %v649_v30, %s2526_s30  ;;  %698 = vrot.lane.b32.xlu1 %v684_v31, %s2527_s3  ;;  %v900_v30 = vstv %s2341_s17  ;;  %v881_v31 = vsel %vm842_vm9, %v879_v24, %v880_v21  ;;  %s2362_s17 = sld [smem:[#allocation4 + $0x25]] }
 0x146   :  { %v2738_v32 = vpop.permute.xlu2 %459  ;;  %v902_v37 = vmul.f32 %v900_v30, %v2654_v43  ;;  %v906_v23 = vmul.f32 %v900_v30, %v2710_v14 }
 0x14c   :  { %700 = vrot.lane.b32.xlu2 %v685_v33, %s2527_s3  ;;  %v864_v33 = vmul.f32 %v861_v8, %v2702_v10 }
 0x14d   :  { %696 = vrot.lane.b32.xlu0 %v683_v34, %s2527_s3  ;;  %704 = vrot.lane.b32.xlu1 %v687_v35, %s2527_s3  ;;  %v903_v34 = vmul.f32 %v900_v30, %v2702_v10 }
 0x14e   :  { %v2746_v36 = vpop.permute.xlu2 %482 }
 0x154   :  { %731 = vrot.lane.b32.xlu2 %v719_v38, %s2528_s6 }
 0x155   :  { %702 = vrot.lane.b32.xlu0 %v686_v39, %s2527_s3  ;;  %735 = vrot.lane.b32.xlu1 %v721_v40, %s2528_s6  ;;  %v882_v40 = vrot.slane %v867_v29, 2 }
 0x156   :  { %v2754_v42 = vpop.permute.xlu2 %505 }
 0x157   :  { %v883_v51 = vsel %vm842_vm9, %v880_v21, %v882_v40 }
 0x15c   :  { %737 = vrot.lane.b32.xlu2 %v722_v45, %s2528_s6  ;;  %v877_v45 = vrot.slane %v864_v33, 2 }
 0x15d   :  { %733 = vrot.lane.b32.xlu0 %v720_v46, %s2528_s6  ;;  %741 = vrot.lane.b32.xlu1 %v724_v47, %s2528_s6  ;;  %v916_v46 = vrot.slane %v903_v34, 2  ;;  %v914_v47 = vrot.slane %v902_v37, 2  ;;  %v921_v34 = vrot.slane %v906_v23, 2 }
 0x15e   :  { %v2764_v48 = vpop.permute.xlu2 %528 }
 0x15f   :  { %v2766_v49 = vpop.permute.xlu1 %480  ;;  %v2768_v50 = vpop.permute.xlu0 %455 }
 0x164   :  { %768 = vrot.lane.b32.xlu2 %v756_v52, %s2529_s8  ;;  %v905_v52 = vmul.f32 %v900_v30, %v2652_v41 }
 0x165   :  { %739 = vrot.lane.b32.xlu0 %v723_v53, %s2528_s6  ;;  %772 = vrot.lane.b32.xlu1 %v758_v54, %s2529_s8  ;;  %v939_v53 = vstv %s2342_s0  ;;  %v878_v54 = vsel %vm842_vm9, %v875_v20, %v877_v45  ;;  %v978_v45 = vstv %s2343_s1  ;;  %s2353_s0 = sld [smem:[#allocation4 + $0x1c]] }
 0x166   :  { %v2776_v55 = vpop.permute.xlu2 %534  ;;  %v919_v8 = vrot.slane %v905_v52, 2  ;;  %v942_v17 = vmul.f32 %v939_v53, %v2702_v10  ;;  %v945_v24 = vmul.f32 %v939_v53, %v2710_v14  ;;  %v983_v52 = vmul.f32 %v978_v45, %v2652_v41  ;;  %s2363_s1 = sld [smem:[#allocation4 + $0x26]] }
 0x167   :  { %v2778_v56 = vpop.permute.xlu1 %503  ;;  %v2780_v57 = vpop.permute.xlu0 %478  ;;  %v981_v23 = vmul.f32 %v978_v45, %v2702_v10 }
 0x168   :  { %v955_v33 = vrot.slane %v942_v17, 2  ;;  %v960_v37 = vrot.slane %v945_v24, 2  ;;  %v984_v17 = vmul.f32 %v978_v45, %v2710_v14 }
 0x16c   :  { %774 = vrot.lane.b32.xlu2 %v759_v58, %s2529_s8  ;;  %v917_v58 = vsel %vm842_vm9, %v914_v47, %v916_v46  ;;  %v980_v46 = vmul.f32 %v978_v45, %v2654_v43 }
 0x16d   :  { %770 = vrot.lane.b32.xlu0 %v757_v59, %s2529_s8  ;;  %778 = vrot.lane.b32.xlu1 %v761_v60, %s2529_s8  ;;  %v941_v59 = vmul.f32 %v939_v53, %v2654_v43  ;;  %v904_v60 = vmul.f32 %v900_v30, %v2631_v27 }
 0x16e   :  { %v2788_v61 = vpop.permute.xlu2 %557 }
 0x16f   :  { %v2790_v62 = vpop.permute.xlu1 %509  ;;  %v2792_v63 = vpop.permute.xlu0 %484 }
 0x174   :  { %805 = vrot.lane.b32.xlu2 %v793_v1, %s2530_s9  ;;  %v901_v1 = vmul.f32 %v900_v30, %v2624_v22 }
 0x175   :  { %776 = vrot.lane.b32.xlu0 %v760_v2, %s2529_s8  ;;  %809 = vrot.lane.b32.xlu1 %v795_v3, %s2530_s9  ;;  %v940_v2 = vmul.f32 %v939_v53, %v2624_v22 }
 0x176   :  { %v2800_v4 = vpop.permute.xlu2 %580  ;;  %v913_v12 = vrot.slane %v901_v1, 2 }
 0x177   :  { %v2802_v5 = vpop.permute.xlu1 %532  ;;  %v2804_v6 = vpop.permute.xlu0 %507  ;;  %v952_v13 = vrot.slane %v940_v2, 2 }
 0x178   :  { %v915_v20 = vsel %vm842_vm9, %v913_v12, %v914_v47  ;;  %v922_v47 = vsel %vm842_vm9, %v919_v8, %v921_v34 }
 0x17c   :  { %811 = vrot.lane.b32.xlu2 %v796_v7, %s2530_s9 }
 0x17d   :  { %807 = vrot.lane.b32.xlu0 %v794_v9, %s2530_s9  ;;  %815 = vrot.lane.b32.xlu1 %v798_v11, %s2530_s9  ;;  %v953_v9 = vrot.slane %v941_v59, 2  ;;  %v918_v11 = vrot.slane %v904_v60, 2  ;;  %v943_v59 = vmul.f32 %v939_v53, %v2631_v27  ;;  %v982_v60 = vmul.f32 %v978_v45, %v2631_v27 }
 0x17e   :  { %v2815_v16 = vpop.permute.xlu2 %620 }
 0x17f   :  { %v2818_v18 = vpop.permute.xlu1 %555  ;;  %v2820_v19 = vpop.permute.xlu0 %530  ;;  %v920_v15 = vsel %vm842_vm9, %v918_v11, %v919_v8  ;;  %v954_v21 = vsel %vm842_vm9, %v952_v13, %v953_v9  ;;  %v956_v30 = vsel %vm842_vm9, %v953_v9, %v955_v33  ;;  %v992_v8 = vrot.slane %v980_v46, 2 }
 0x180   :  { %v997_v9 = vrot.slane %v983_v52, 2  ;;  %v957_v12 = vrot.slane %v943_v59, 2  ;;  %v996_v13 = vrot.slane %v982_v60, 2  ;;  %v1056_v52 = vstv %s2345_s21  ;;  %s2365_s21 = sld [smem:[#allocation4 + $0x28]] }
 0x181   :  { %v1058_v60 = vmul.f32 %v1056_v52, %v2654_v43 }
 0x184   :  { %884 = vrot.lane.b32.xlu2 %v876_v25, %s2525_s27 }
 0x185   :  { %813 = vrot.lane.b32.xlu0 %v797_v28, %s2530_s9  ;;  %888 = vrot.lane.b32.xlu1 %v881_v31, %s2525_s27  ;;  %v944_v28 = vmul.f32 %v939_v53, %v2652_v41 }
 0x186   :  { %v2831_v35 = vpop.permute.xlu2 %626 }
 0x187   :  { %v2834_v38 = vpop.permute.xlu1 %578  ;;  %v2836_v39 = vpop.permute.xlu0 %553  ;;  %v958_v40 = vrot.slane %v944_v28, 2 }
 0x189   :  { %v959_v53 = vsel %vm842_vm9, %v957_v12, %v958_v40 }
 0x18c   :  { %890 = vrot.lane.b32.xlu2 %v883_v51, %s2525_s27  ;;  %v961_v51 = vsel %vm842_vm9, %v958_v40, %v960_v37  ;;  %v994_v40 = vrot.slane %v981_v23, 2 }
 0x18d   :  { %886 = vrot.lane.b32.xlu0 %v878_v54, %s2525_s27  ;;  %925 = vrot.lane.b32.xlu1 %v917_v58, %s2526_s30  ;;  %v979_v54 = vmul.f32 %v978_v45, %v2624_v22 }
 0x18e   :  { %v2847_v0 = vpop.permute.xlu2 %657 }
 0x18f   :  { %v2851_v3 = vpop.permute.xlu1 %584  ;;  %v2853_v7 = vpop.permute.xlu0 %559  ;;  %v991_v11 = vrot.slane %v979_v54, 2  ;;  %v995_v54 = vsel %vm842_vm9, %v992_v8, %v994_v40 }
 0x194   :  { %927 = vrot.lane.b32.xlu2 %v920_v15, %s2526_s30  ;;  %v993_v15 = vsel %vm842_vm9, %v991_v11, %v992_v8 }
 0x195   :  { %923 = vrot.lane.b32.xlu0 %v915_v20, %s2526_s30  ;;  %962 = vrot.lane.b32.xlu1 %v954_v21, %s2527_s3  ;;  %v1017_v20 = vstv %s2344_s20  ;;  %v998_v21 = vsel %vm842_vm9, %v996_v13, %v997_v9  ;;  %v1057_v13 = vmul.f32 %v1056_v52, %v2624_v22  ;;  %s2364_s20 = sld [smem:[#allocation4 + $0x27]] }
 0x196   :  { %v2864_v25 = vpop.permute.xlu2 %663  ;;  %v1020_v24 = vmul.f32 %v1017_v20, %v2702_v10  ;;  %v1019_v33 = vmul.f32 %v1017_v20, %v2654_v43  ;;  %v1021_v11 = vmul.f32 %v1017_v20, %v2631_v27 }
 0x197   :  { %v2867_v29 = vpop.permute.xlu1 %624  ;;  %v2869_v31 = vpop.permute.xlu0 %582 }
 0x198   :  { %3751 = vst [vmem:[#allocation13_spill] sm:$0xff] %v2867_v29  ;;  %v1033_v46 = vrot.slane %v1020_v24, 2  ;;  %v1069_v24 = vrot.slane %v1057_v13, 2 }
 0x19c   :  { %964 = vrot.lane.b32.xlu2 %v956_v30, %s2527_s3  ;;  %v999_v30 = vrot.slane %v984_v17, 2 }
 0x19d   :  { %929 = vrot.lane.b32.xlu0 %v922_v47, %s2526_s30  ;;  %968 = vrot.lane.b32.xlu1 %v961_v51, %s2527_s3  ;;  %v1031_v47 = vrot.slane %v1019_v33, 2  ;;  %v1022_v51 = vmul.f32 %v1017_v20, %v2652_v41 }
 0x19e   :  { %v2880_v58 = vpop.permute.xlu2 %694  ;;  %v1000_v45 = vsel %vm842_vm9, %v997_v9, %v999_v30  ;;  %v1018_v9 = vmul.f32 %v1017_v20, %v2624_v22  ;;  %v1059_v30 = vmul.f32 %v1056_v52, %v2702_v10 }
 0x19f   :  { %v2884_v1 = vpop.permute.xlu1 %630  ;;  %v2886_v2 = vpop.permute.xlu0 %622  ;;  %v1034_v59 = vsel %vm842_vm9, %v1031_v47, %v1033_v46  ;;  %v1036_v8 = vrot.slane %v1022_v51, 2 }
 0x1a0   :  { %v1030_v23 = vrot.slane %v1018_v9, 2  ;;  %v1072_v9 = vrot.slane %v1059_v30, 2 }
 0x1a2   :  { %v1032_v40 = vsel %vm842_vm9, %v1030_v23, %v1031_v47  ;;  %v1130_v23 = vstv %s2347_s22  ;;  %s2366_s22 = sld [smem:[#allocation4 + $0x29]] }
 0x1a3   :  { %v1131_v30 = vmul.f32 %v1130_v23, %v2624_v22 }
 0x1a4   :  { %1001 = vrot.lane.b32.xlu2 %v993_v15, %s2528_s6 }
 0x1a5   :  { %966 = vrot.lane.b32.xlu0 %v959_v53, %s2527_s3  ;;  %1005 = vrot.lane.b32.xlu1 %v998_v21, %s2528_s6  ;;  %v1070_v53 = vrot.slane %v1058_v60, 2  ;;  %v1035_v21 = vrot.slane %v1021_v11, 2 }
 0x1a6   :  { %v2897_v28 = vpop.permute.xlu2 %700 }
 0x1a7   :  { %v2900_v34 = vpop.permute.xlu1 %661  ;;  %v2902_v37 = vpop.permute.xlu0 %628  ;;  %v1037_v33 = vsel %vm842_vm9, %v1035_v21, %v1036_v8  ;;  %v1071_v46 = vsel %vm842_vm9, %v1069_v24, %v1070_v53  ;;  %v1132_v24 = vmul.f32 %v1130_v23, %v2654_v43 }
 0x1a8   :  { %3752 = vst [vmem:[#allocation14_spill] sm:$0xff] %v2900_v34 }
 0x1ac   :  { %1007 = vrot.lane.b32.xlu2 %v1000_v45, %s2528_s6  ;;  %v1023_v45 = vmul.f32 %v1017_v20, %v2710_v14  ;;  %v1073_v20 = vsel %vm842_vm9, %v1070_v53, %v1072_v9  ;;  %v1133_v9 = vmul.f32 %v1130_v23, %v2702_v10 }
 0x1ad   :  { %1003 = vrot.lane.b32.xlu0 %v995_v54, %s2528_s6  ;;  %1042 = vrot.lane.b32.xlu1 %v1034_v59, %s2529_s8  ;;  %v1062_v54 = vmul.f32 %v1056_v52, %v2710_v14  ;;  %v1061_v59 = vmul.f32 %v1056_v52, %v2652_v41 }
 0x1ae   :  { %v2913_v12 = vpop.permute.xlu2 %731  ;;  %v1038_v47 = vrot.slane %v1023_v45, 2  ;;  %v1060_v45 = vmul.f32 %v1056_v52, %v2631_v27 }
 0x1af   :  { %v2917_v15 = vpop.permute.xlu1 %667  ;;  %v2919_v17 = vpop.permute.xlu0 %659  ;;  %v1077_v13 = vrot.slane %v1062_v54, 2  ;;  %v1075_v21 = vrot.slane %v1061_v59, 2  ;;  %v1144_v59 = vrot.slane %v1132_v24, 2  ;;  %v1134_v24 = vmul.f32 %v1130_v23, %v2631_v27 }
 0x1b4   :  { %1044 = vrot.lane.b32.xlu2 %v1037_v33, %s2529_s8  ;;  %v1039_v33 = vsel %vm842_vm9, %v1036_v8, %v1038_v47  ;;  %v1143_v8 = vrot.slane %v1131_v30, 2  ;;  %v1074_v47 = vrot.slane %v1060_v45, 2 }
 0x1b5   :  { %1040 = vrot.lane.b32.xlu0 %v1032_v40, %s2529_s8  ;;  %1079 = vrot.lane.b32.xlu1 %v1071_v46, %s2530_s9  ;;  %v1078_v40 = vsel %vm842_vm9, %v1075_v21, %v1077_v13 }
 0x1b6   :  { %v2930_v51 = vpop.permute.xlu2 %737  ;;  %v1145_v13 = vsel %vm842_vm9, %v1143_v8, %v1144_v59  ;;  %v1076_v52 = vsel %vm842_vm9, %v1074_v47, %v1075_v21  ;;  %v1148_v47 = vrot.slane %v1134_v24, 2 }
 0x1b7   :  { %v2933_v60 = vpop.permute.xlu1 %698  ;;  %v2935_v11 = vpop.permute.xlu0 %665 }
 0x1b8   :  { %3753 = vst [vmem:[#allocation15_spill] sm:$0xff] %v2933_v60 }
 0x1bc   :  { %1081 = vrot.lane.b32.xlu2 %v1073_v20, %s2530_s9  ;;  %v1146_v20 = vrot.slane %v1133_v9, 2 }
 0x1bd   :  { %1046 = vrot.lane.b32.xlu0 %v1039_v33, %s2529_s8  ;;  %1085 = vrot.lane.b32.xlu1 %v1078_v40, %s2530_s9  ;;  %v1135_v33 = vmul.f32 %v1130_v23, %v2652_v41  ;;  %v2955_v40 = vstv %s380_s23  ;;  %s2360_s23 = sld [smem:[#allocation4 + $0x23]] }
 0x1be   :  { %v2945_v46 = vpop.permute.xlu2 %768  ;;  %v436_v45 = vmul.f32 %v2955_v40, %v2624_v22  ;;  %v439_v24 = vmul.f32 %v2955_v40, %v2652_v41 }
 0x1bf   :  { %v2948_v53 = vpop.permute.xlu1 %704  ;;  %v2950_v54 = vpop.permute.xlu0 %696  ;;  %v1149_v60 = vrot.slane %v1135_v33, 2 }
 0x1c0   :  { %3754 = vst [vmem:[#allocation16_spill] sm:$0xff] %v2948_v53  ;;  %v465_v21 = vadd.f32 %v2730_v26, %v436_v45 }
 0x1c1   :  { %3755 = vst [vmem:[#allocation17_spill] sm:$0xff] %v2950_v54  ;;  %v1150_v54 = vsel %vm842_vm9, %v1148_v47, %v1149_v60 }
 0x1c2   :  { %v490_v29 = vadd.f32 %v2780_v57, %v465_v21  ;;  %v2992_v21 = vstv %s2339_s25  ;;  %s2369_s25 = sld [smem:[#allocation4 + $0x2c]] }
 0x1c4   :  { %1153 = vrot.lane.b32.xlu2 %v1145_v13, %s2525_s27  ;;  %v1136_v13 = vmul.f32 %v1130_v23, %v2710_v14  ;;  %v515_v57 = vadd.f32 %v2778_v56, %v490_v29 }
 0x1c5   :  { %1083 = vrot.lane.b32.xlu0 %v1076_v52, %s2530_s9  ;;  %1157 = vrot.lane.b32.xlu1 %v1146_v20, %s2525_s27  ;;  %v1177_v52 = vstv %s2348_s24  ;;  %s2368_s24 = sld [smem:[#allocation4 + $0x2b]] }
 0x1c6   :  { %v2962_v30 = vpop.permute.xlu2 %774  ;;  %v1179_v34 = vmul.f32 %v1177_v52, %v2654_v43  ;;  %v1151_v53 = vrot.slane %v1136_v13, 2  ;;  %v1178_v33 = vmul.f32 %v1177_v52, %v2624_v22  ;;  %v540_v47 = vadd.f32 %v2764_v48, %v515_v57 }
 0x1c7   :  { %v2966_v9 = vpop.permute.xlu1 %735  ;;  %v2968_v8 = vpop.permute.xlu0 %702  ;;  %v1182_v29 = vmul.f32 %v1177_v52, %v2652_v41 }
 0x1c8   :  { %3756 = vst [vmem:[#allocation18_spill] sm:$0xff] %v2966_v9  ;;  %v1147_v9 = vsel %vm842_vm9, %v1144_v59, %v1146_v20  ;;  %v1191_v23 = vrot.slane %v1179_v34, 2  ;;  %v1190_v59 = vrot.slane %v1178_v33, 2  ;;  %v468_v20 = vadd.f32 %v2738_v32, %v439_v24 }
 0x1c9   :  { %v3001_v33 = vmul.f32 %v2992_v21, %v2654_v43  ;;  %v565_v32 = vadd.f32 %v2836_v39, %v540_v47  ;;  %v830_v24 = vmul.f32 %v2992_v21, %v2624_v22  ;;  %v1183_v39 = vmul.f32 %v1177_v52, %v2710_v14 }
 0x1ca   :  { %v493_v34 = vadd.f32 %v2792_v63, %v468_v20  ;;  %v1181_v63 = vmul.f32 %v1177_v52, %v2631_v27  ;;  %v1224_v47 = vstv %s2349_s28  ;;  %s2372_s28 = sld [smem:[#allocation4 + $0x2f]] }
 0x1cb   :  { %v590_v20 = vadd.f32 %v2834_v38, %v565_v32  ;;  %v3760_v38 = vrot.slane %v3001_v33, 2 }
 0x1cc   :  { %1159 = vrot.lane.b32.xlu2 %v1150_v54, %s2525_s27  ;;  %v1180_v54 = vmul.f32 %v1177_v52, %v2702_v10  ;;  %v518_v57 = vadd.f32 %v2790_v62, %v493_v34  ;;  %v843_v62 = vrot.slane %v830_v24, 2  ;;  %v3026_v52 = vmul.f32 %v1224_v47, %v2654_v43 }
 0x1cd   :  { %1155 = vrot.lane.b32.xlu0 %v1147_v9, %s2525_s27  ;;  %1163 = vrot.lane.b32.xlu1 %v1151_v53, %s2525_s27  ;;  %v1192_v9 = vsel %vm842_vm9, %v1190_v59, %v1191_v23  ;;  %v3018_v59 = vstv %s2332_s26  ;;  %v835_v24 = vmul.f32 %v2992_v21, %v2710_v14  ;;  %s2370_s26 = sld [smem:[#allocation4 + $0x2d]] }
 0x1ce   :  { %v2980_v26 = vpop.permute.xlu2 %805  ;;  %v1193_v56 = vrot.slane %v1180_v54, 2  ;;  %v1196_v54 = vrot.slane %v1182_v29, 2  ;;  %v543_v34 = vadd.f32 %v2776_v55, %v518_v57  ;;  %v1198_v29 = vrot.slane %v1183_v39, 2 }
 0x1cf   :  { %v2985_v45 = vpop.permute.xlu1 %741  ;;  %v2987_v13 = vpop.permute.xlu0 %733  ;;  %v845_v32 = vsel %vm842_vm9, %v843_v62, %v3760_v38  ;;  %v3055_v38 = vstv %s2346_s29 }
 0x1d0   :  { %3757 = vst [vmem:[#allocation19_spill] sm:$0xff] %v2985_v45  ;;  %v598_v45 = vmul.f32 %v3018_v59, %v2631_v27  ;;  %v568_v57 = vadd.f32 %v2853_v7, %v543_v34  ;;  %v1227_v7 = vmul.f32 %v1224_v47, %v2702_v10 }
 0x1d1   :  { %3758 = vst [vmem:[#allocation20_spill] sm:$0xff] %v2987_v13  ;;  %v1152_v13 = vsel %vm842_vm9, %v1149_v60, %v1151_v53 }
 0x1d2   :  { %v641_v55 = vadd.f32 %v2831_v35, %v598_v45  ;;  %v1238_v35 = vrot.slane %v3026_v52, 2  ;;  %v851_v45 = vrot.slane %v835_v24, 2 }
 0x1d4   :  { %1200 = vrot.lane.b32.xlu2 %v1192_v9, %s2526_s30  ;;  %v1195_v9 = vrot.slane %v1181_v63, 2  ;;  %v1225_v63 = vmul.f32 %v1224_v47, %v2624_v22 }
 0x1d5   :  { %1161 = vrot.lane.b32.xlu0 %v1152_v13, %s2525_s27  ;;  %1204 = vrot.lane.b32.xlu1 %v1193_v56, %s2526_s30  ;;  %v1194_v13 = vsel %vm842_vm9, %v1191_v23, %v1193_v56  ;;  %v3042_v23 = vmul.f32 %v2992_v21, %v2652_v41  ;;  %v678_v56 = vadd.f32 %v2864_v25, %v641_v55 }
 0x1d6   :  { %v3007_v48 = vpop.permute.xlu2 %811  ;;  %v1237_v34 = vrot.slane %v1225_v63, 2  ;;  %v438_v25 = vmul.f32 %v2955_v40, %v2631_v27  ;;  %v3062_v55 = vmul.f32 %v3055_v38, %v2652_v41 }
 0x1d7   :  { %v3012_v60 = vpop.permute.xlu1 %772  ;;  %v3014_v53 = vpop.permute.xlu0 %739 }
 0x1d8   :  { %3759 = vst [vmem:[#allocation21_spill] sm:$0xff] %v3012_v60  ;;  %v1197_v60 = vsel %vm842_vm9, %v1195_v9, %v1196_v54  ;;  %v1239_v24 = vsel %vm842_vm9, %v1237_v34, %v1238_v35  ;;  %v467_v63 = vadd.f32 %v2756_v44, %v438_v25  ;;  %v1228_v44 = vmul.f32 %v1224_v47, %v2631_v27 }
 0x1dc   :  { %1206 = vrot.lane.b32.xlu2 %v1197_v60, %s2526_s30  ;;  %v857_v60 = vadd.f32 %v845_v32, %v590_v20  ;;  %v715_v20 = vadd.f32 %v2897_v28, %v678_v56  ;;  %v849_v32 = vrot.slane %v3042_v23, 2  ;;  %v1229_v28 = vmul.f32 %v1224_v47, %v2652_v41 }
 0x1dd   :  { %1202 = vrot.lane.b32.xlu0 %v1194_v13, %s2526_s30  ;;  %1210 = vrot.lane.b32.xlu1 %v1198_v29, %s2526_s30  ;;  %v593_v13 = vadd.f32 %v2851_v3, %v568_v57  ;;  %v1240_v3 = vrot.slane %v1227_v7, 2  ;;  %v1199_v57 = vsel %vm842_vm9, %v1196_v54, %v1198_v29  ;;  %v492_v7 = vadd.f32 %v2746_v36, %v467_v63 }
 0x1de   :  { %v885_v39 = vpop.permute.xlu2 %884  ;;  %v752_v52 = vadd.f32 %v2930_v51, %v715_v20  ;;  %v437_v54 = vmul.f32 %v2955_v40, %v2654_v43  ;;  %v1242_v40 = vrot.slane %v1228_v44, 2  ;;  %v1271_v63 = vstv %s2350_s4  ;;  %s2312_s4 = sshll.u32 %s3750_s2, 4  ;;  %s2313_s4 = int_to_ptr.hbm [resolvable:$true] %s2312_s4 }
 0x1df   :  { %v3045_v22 = vadd.f32 %v885_v39, %v857_v60  ;;  %v3047_v9 = vpop.permute.xlu1 %778  ;;  %v3049_v62 = vpop.permute.xlu0 %770  ;;  %v852_v60 = vsel %vm842_vm9, %v849_v32, %v851_v45  ;;  %v1099_v39 = vmul.f32 %v3055_v38, %v2631_v27  ;;  %v1114_v45 = vrot.slane %v3062_v55, 2 }
 0x1e0   :  { %v789_v51 = vadd.f32 %v2962_v30, %v752_v52  ;;  %v860_v56 = vadd.f32 %v852_v60, %v593_v13  ;;  %v1243_v52 = vrot.slane %v1229_v28, 2  ;;  %v1230_v13 = vmul.f32 %v1224_v47, %v2710_v14  ;;  %v3106_v28 = vld [vmem:[#allocation2] sm:$0xff] }
 0x1e1   :  { %v466_v27 = vadd.f32 %v2768_v50, %v437_v54  ;;  %v517_v36 = vadd.f32 %v2804_v6, %v492_v7  ;;  %v1241_v6 = vsel %vm842_vm9, %v1238_v35, %v1240_v3  ;;  %v3114_v54 = vld [vmem:[#allocation2 + $0x18] sm:$0xff] }
 0x1e2   :  { %v826_v20 = vadd.f32 %v3007_v48, %v789_v51  ;;  %v1245_v60 = vrot.slane %v1230_v13, 2  ;;  %v1273_v51 = vmul.f32 %v1271_v63, %v2654_v43  ;;  %v833_v35 = vmul.f32 %v3114_v54, %v2992_v21 }
 0x1e3   :  { %v491_v47 = vadd.f32 %v2766_v49, %v466_v27  ;;  %v542_v50 = vadd.f32 %v2802_v5, %v517_v36  ;;  %v1274_v5 = vmul.f32 %v1271_v63, %v2702_v10 }
 0x1e4   :  { %1247 = vrot.lane.b32.xlu2 %v1239_v24, %s2527_s3  ;;  %v1113_v24 = vrot.slane %v1099_v39, 2  ;;  %v1272_v39 = vmul.f32 %v3106_v28, %v1271_v63  ;;  %v1285_v49 = vrot.slane %v1273_v51, 2 }
 0x1e5   :  { %1208 = vrot.lane.b32.xlu0 %v1199_v57, %s2526_s30  ;;  %1251 = vrot.lane.b32.xlu1 %v1240_v3, %s2527_s3  ;;  %v1244_v57 = vsel %vm842_vm9, %v1242_v40, %v1243_v52  ;;  %v516_v3 = vadd.f32 %v2754_v42, %v491_v47  ;;  %v848_v40 = vrot.slane %v833_v35, 2 }
 0x1e6   :  { %v891_v29 = vpop.permute.xlu2 %890  ;;  %v1115_v48 = vsel %vm842_vm9, %v1113_v24, %v1114_v45  ;;  %v1287_v24 = vrot.slane %v1274_v5, 2  ;;  %v1318_v5 = vstv %s2351_s5 }
 0x1e7   :  { %v3084_v34 = vadd.f32 %v891_v29, %v860_v56  ;;  %v3086_v30 = vpop.permute.xlu1 %809  ;;  %v3088_v25 = vpop.permute.xlu0 %776  ;;  %v3098_v56 = vadd.f32 %v1115_v48, %v826_v20  ;;  %v567_v29 = vadd.f32 %v2788_v61, %v542_v50  ;;  %v1284_v20 = vrot.slane %v1272_v39, 2 }
 0x1e8   :  { %v541_v13 = vadd.f32 %v2820_v19, %v516_v3  ;;  %v1276_v48 = vmul.f32 %v1271_v63, %v2652_v41  ;;  %v850_v42 = vsel %vm842_vm9, %v848_v40, %v849_v32  ;;  %v1275_v61 = vmul.f32 %v3114_v54, %v1271_v63 }
 0x1e9   :  { %v592_v27 = vadd.f32 %v2869_v31, %v567_v29  ;;  %v1286_v36 = vsel %vm842_vm9, %v1284_v20, %v1285_v49  ;;  %v832_v19 = vmul.f32 %v2992_v21, %v2702_v10  ;;  %v1288_v20 = vsel %vm842_vm9, %v1285_v49, %v1287_v24 }
 0x1ea   :  { %v566_v31 = vadd.f32 %v2818_v18, %v541_v13  ;;  %v1289_v39 = vrot.slane %v1275_v61, 2  ;;  %v3142_v18 = vld [vmem:[#allocation2 + $0x8] sm:$0xff] }
 0x1eb   :  { %v859_v51 = vadd.f32 %v850_v42, %v592_v27  ;;  %v846_v23 = vrot.slane %v832_v19, 2  ;;  %v1320_v29 = vmul.f32 %v3142_v18, %v1318_v5 }
 0x1ec   :  { %1253 = vrot.lane.b32.xlu2 %v1244_v57, %s2527_s3  ;;  %v1246_v57 = vsel %vm842_vm9, %v1243_v52, %v1245_v60  ;;  %v1290_v52 = vrot.slane %v1276_v48, 2  ;;  %v591_v32 = vadd.f32 %v2800_v4, %v566_v31  ;;  %v3761_v4 = vrot.slane %v3001_v33, 2  ;;  %v3155_v31 = vld [vmem:[#allocation2 + $0x20] sm:$0xff] }
 0x1ed   :  { %1249 = vrot.lane.b32.xlu0 %v1241_v6, %s2527_s3  ;;  %1257 = vrot.lane.b32.xlu1 %v1245_v60, %s2527_s3  ;;  %v1277_v60 = vmul.f32 %v1271_v63, %v2710_v14  ;;  %v1332_v48 = vrot.slane %v1320_v29, 2  ;;  %v1323_v33 = vmul.f32 %v3155_v31, %v1318_v5  ;;  %v1324_v29 = vmul.f32 %v1318_v5, %v2710_v14 }
 0x1ee   :  { %v928_v44 = vpop.permute.xlu2 %927  ;;  %v1291_v21 = vsel %vm842_vm9, %v1289_v39, %v1290_v52  ;;  %v847_v63 = vsel %vm842_vm9, %v3761_v4, %v846_v23 }
 0x1ef   :  { %v3109_v43 = vpop.permute.xlu1 %815  ;;  %v3111_v7 = vpop.permute.xlu0 %807  ;;  %v1292_v3 = vrot.slane %v1277_v60, 2  ;;  %v858_v27 = vadd.f32 %v847_v63, %v591_v32  ;;  %v1322_v60 = vmul.f32 %v3114_v54, %v1318_v5  ;;  %v1365_v63 = vstv %s2352_s7 }
 0x1f4   :  { %1294 = vrot.lane.b32.xlu2 %v1286_v36, %s2528_s6 }
 0x1f5   :  { %1255 = vrot.lane.b32.xlu0 %v1246_v57, %s2527_s3  ;;  %1298 = vrot.lane.b32.xlu1 %v1287_v24, %s2528_s6  ;;  %v1321_v57 = vmul.f32 %v1318_v5, %v2702_v10 }
 0x1f6   :  { %v965_v41 = vpop.permute.xlu2 %964 }
 0x1f7   :  { %v889_v47 = vpop.permute.xlu1 %888  ;;  %v3135_v50 = vpop.permute.xlu0 %813  ;;  %v1334_v19 = vrot.slane %v1321_v57, 2 }
 0x1f8   :  { %v898_v6 = vadd.f32 %v889_v47, %v859_v51  ;;  %v1293_v51 = vsel %vm842_vm9, %v1290_v52, %v1292_v3  ;;  %v1336_v52 = vrot.slane %v1322_v60, 2 }
 0x1fa   :  { %v3139_v35 = vadd.f32 %v928_v44, %v898_v6  ;;  %v1319_v44 = vmul.f32 %v3106_v28, %v1318_v5  ;;  %v599_v6 = vmul.f32 %v3155_v31, %v3018_v59  ;;  %v1335_v5 = vsel %vm842_vm9, %v1332_v48, %v1334_v19 }
 0x1fc   :  { %1300 = vrot.lane.b32.xlu2 %v1291_v21, %s2528_s6  ;;  %v1331_v61 = vrot.slane %v1319_v44, 2  ;;  %v1337_v21 = vrot.slane %v1323_v33, 2 }
 0x1fd   :  { %1296 = vrot.lane.b32.xlu0 %v1288_v20, %s2528_s6  ;;  %1304 = vrot.lane.b32.xlu1 %v1292_v3, %s2528_s6  ;;  %v642_v20 = vadd.f32 %v2902_v37, %v599_v6  ;;  %v595_v37 = vmul.f32 %v3106_v28, %v3018_v59 }
 0x1fe   :  { %v1002_v13 = vpop.permute.xlu2 %1001  ;;  %v1333_v24 = vsel %vm842_vm9, %v1331_v61, %v1332_v48  ;;  %v1338_v44 = vsel %vm842_vm9, %v1336_v52, %v1337_v21 }
 0x1ff   :  { %v926_v36 = vpop.permute.xlu1 %925  ;;  %v887_v40 = vpop.permute.xlu0 %886  ;;  %v679_v3 = vadd.f32 %v2935_v11, %v642_v20  ;;  %v1366_v11 = vmul.f32 %v3106_v28, %v1365_v63  ;;  %v638_v48 = vadd.f32 %v2815_v16, %v595_v37  ;;  %v1443_v37 = vstv %s2354_s10 }
 0x200   :  { %v897_v42 = vadd.f32 %v887_v40, %v858_v27  ;;  %v1339_v27 = vrot.slane %v1324_v29, 2 }
 0x201   :  { %v716_v40 = vadd.f32 %v2968_v8, %v679_v3  ;;  %v1378_v60 = vrot.slane %v1366_v11, 2 }
 0x202   :  { %v936_v49 = vadd.f32 %v926_v36, %v897_v42  ;;  %v1367_v36 = vmul.f32 %v3142_v18, %v1365_v63 }
 0x203   :  { %v753_v8 = vadd.f32 %v3014_v53, %v716_v40 }
 0x204   :  { %1341 = vrot.lane.b32.xlu2 %v1333_v24, %s2529_s8  ;;  %v3160_v47 = vadd.f32 %v965_v41, %v936_v49  ;;  %v1379_v49 = vrot.slane %v1367_v36, 2  ;;  %v1368_v24 = vmul.f32 %v1365_v63, %v2702_v10  ;;  %v1370_v10 = vmul.f32 %v3155_v31, %v1365_v63 }
 0x205   :  { %1302 = vrot.lane.b32.xlu0 %v1293_v51, %s2528_s6  ;;  %1345 = vrot.lane.b32.xlu1 %v1334_v19, %s2529_s8  ;;  %v790_v19 = vadd.f32 %v3088_v25, %v753_v8  ;;  %v675_v51 = vadd.f32 %v2847_v0, %v638_v48  ;;  %v3202_v0 = vmul.f32 %v3142_v18, %v3055_v38 }
 0x206   :  { %v1008_v39 = vpop.permute.xlu2 %1007  ;;  %v1384_v3 = vrot.slane %v1370_v10, 2  ;;  %v1445_v8 = vmul.f32 %v3142_v18, %v1443_v37 }
 0x207   :  { %v963_v23 = vpop.permute.xlu1 %962  ;;  %v924_v32 = vpop.permute.xlu0 %923  ;;  %v827_v6 = vadd.f32 %v3135_v50, %v790_v19  ;;  %v712_v16 = vadd.f32 %v2880_v58, %v675_v51  ;;  %v1369_v58 = vmul.f32 %v3114_v54, %v1365_v63  ;;  %v1447_v19 = vmul.f32 %v3114_v54, %v1443_v37 }
 0x208   :  { %v935_v41 = vadd.f32 %v924_v32, %v3045_v22  ;;  %v3185_v22 = vmul.f32 %v3055_v38, %v2710_v14  ;;  %v1381_v32 = vrot.slane %v1368_v24, 2 }
 0x209   :  { %v749_v50 = vadd.f32 %v2913_v12, %v712_v16  ;;  %v1383_v36 = vrot.slane %v1369_v58, 2 }
 0x20a   :  { %v974_v4 = vadd.f32 %v963_v23, %v935_v41  ;;  %v1116_v14 = vrot.slane %v3185_v22, 2  ;;  %v1380_v23 = vsel %vm842_vm9, %v1378_v60, %v1379_v49  ;;  %v1457_v60 = vrot.slane %v1445_v8, 4 }
 0x20b   :  { %v786_v12 = vadd.f32 %v2945_v46, %v749_v50  ;;  %v1385_v11 = vsel %vm842_vm9, %v1383_v36, %v1384_v3 }
 0x20c   :  { %1347 = vrot.lane.b32.xlu2 %v1338_v44, %s2529_s8  ;;  %v3176_v57 = vadd.f32 %v1002_v13, %v974_v4  ;;  %v3222_v4 = vld [vmem:[#allocation2 + $0x28] sm:$0x3f] }
 0x20d   :  { %1343 = vrot.lane.b32.xlu0 %v1335_v5, %s2529_s8  ;;  %1351 = vrot.lane.b32.xlu1 %v1339_v27, %s2529_s8  ;;  %v1371_v44 = vmul.f32 %v3222_v4, %v1365_v63  ;;  %v1382_v63 = vsel %vm842_vm9, %v1379_v49, %v1381_v32  ;;  %v1449_v10 = vmul.f32 %v3222_v4, %v1443_v37 }
 0x20e   :  { %v1045_v42 = vpop.permute.xlu2 %1044 }
 0x20f   :  { %v969_v13 = vpop.permute.xlu1 %968  ;;  %v930_v61 = vpop.permute.xlu0 %929  ;;  %v1386_v46 = vrot.slane %v1371_v44, 2 }
 0x210   :  { %v938_v33 = vadd.f32 %v930_v61, %v3084_v34  ;;  %v1340_v34 = vsel %vm842_vm9, %v1337_v21, %v1339_v27  ;;  %v1117_v21 = vsel %vm842_vm9, %v1114_v45, %v1116_v14  ;;  %v1109_v45 = vrot.slane %v3202_v0, 2 }
 0x211   :  { %v3219_v20 = vadd.f32 %v1117_v21, %v827_v6  ;;  %v823_v27 = vadd.f32 %v2980_v26, %v786_v12  ;;  %v1448_v26 = vmul.f32 %v3155_v31, %v1443_v37  ;;  %v1444_v61 = vmul.f32 %v3106_v28, %v1443_v37  ;;  %v3250_v21 = vld [vmem:[#allocation2 + $0x10] sm:$0x3f] }
 0x212   :  { %v977_v53 = vadd.f32 %v969_v13, %v938_v33  ;;  %v1387_v50 = vsel %vm842_vm9, %v1384_v3, %v1386_v46  ;;  %v1464_v3 = vrot.slane %v1449_v10, 4 }
 0x213   :  { %v1456_v16 = vrot.slane %v1444_v61, 4  ;;  %v600_v61 = vmul.f32 %v3222_v4, %v3018_v59 }
 0x214   :  { %1388 = vrot.lane.b32.xlu2 %v1380_v23, %s2530_s9  ;;  %v3204_v25 = vadd.f32 %v1008_v39, %v977_v53  ;;  %v1096_v39 = vmul.f32 %v3106_v28, %v3055_v38  ;;  %v1462_v53 = vrot.slane %v1448_v26, 4  ;;  %v1461_v23 = vrot.slane %v1447_v19, 4 }
 0x215   :  { %1349 = vrot.lane.b32.xlu0 %v1340_v34, %s2529_s8  ;;  %1392 = vrot.lane.b32.xlu1 %v1381_v32, %s2530_s9  ;;  %v1458_v32 = vsel %vm56_vm0, %v1456_v16, %v1457_v60  ;;  %v1482_v34 = vstv %s2355_s11 }
 0x216   :  { %v3215_v29 = vpop.permute.xlu2 %1081  ;;  %v1108_v5 = vrot.slane %v1096_v39, 2  ;;  %v1463_v58 = vsel %vm56_vm0, %v1461_v23, %v1462_v53  ;;  %v1485_v39 = vmul.f32 %v3250_v21, %v1482_v34  ;;  %v3265_v8 = vmul.f32 %v3155_v31, %v1482_v34 }
 0x217   :  { %v1006_v41 = vpop.permute.xlu1 %1005  ;;  %v967_v52 = vpop.permute.xlu0 %966  ;;  %v1483_v26 = vmul.f32 %v3106_v28, %v1482_v34 }
 0x218   :  { %v976_v55 = vadd.f32 %v967_v52, %v3139_v35  ;;  %v1110_v35 = vsel %vm842_vm9, %v1108_v5, %v1109_v45 }
 0x219   :  { %v1124_v13 = vadd.f32 %v1110_v35, %v823_v27  ;;  %v1486_v35 = vmul.f32 %v3114_v54, %v1482_v34 }
 0x21a   :  { %v1015_v40 = vadd.f32 %v1006_v41, %v976_v55  ;;  %v1484_v41 = vmul.f32 %v3142_v18, %v1482_v34 }
 0x21b   :  { %v1500_v10 = vrot.slane %v1486_v35, 4 }
 0x21c   :  { %1394 = vrot.lane.b32.xlu2 %v1385_v11, %s2530_s9  ;;  %v3236_v48 = vadd.f32 %v1045_v42, %v1015_v40  ;;  %v1498_v40 = vrot.slane %v1485_v39, 4  ;;  %v3261_v11 = vstv %s2356_s12 }
 0x21d   :  { %1390 = vrot.lane.b32.xlu0 %v1382_v63, %s2530_s9  ;;  %1398 = vrot.lane.b32.xlu1 %v1386_v46, %s2530_s9  ;;  %v1465_v46 = vsel %vm56_vm0, %v1462_v53, %v1464_v3  ;;  %v643_v53 = vadd.f32 %v2884_v1, %v600_v61  ;;  %v3763_v3 = vld [vmem:[#allocation17_spill] sm:$0xff] }
 0x21e   :  { %v1154_v24 = vpop.permute.xlu2 %1153 }
 0x21f   :  { %v1171_v33 = vadd.f32 %v1154_v24, %v1124_v13  ;;  %v1043_v49 = vpop.permute.xlu1 %1042  ;;  %v1004_v51 = vpop.permute.xlu0 %1003  ;;  %v1522_v13 = vmul.f32 %v3106_v28, %v3261_v11  ;;  %v596_v24 = vmul.f32 %v3142_v18, %v3018_v59 }
 0x220   :  { %v1014_v6 = vadd.f32 %v1004_v51, %v3160_v47  ;;  %v1446_v47 = vmul.f32 %v3250_v21, %v1443_v37  ;;  %v1496_v37 = vrot.slane %v1484_v41, 4  ;;  %v1527_v41 = vmul.f32 %v3222_v4, %v3261_v11 }
 0x221   :  { %v639_v16 = vadd.f32 %v2886_v2, %v596_v24  ;;  %v1524_v2 = vmul.f32 %v3250_v21, %v3261_v11 }
 0x222   :  { %v3243_v42 = vadd.f32 %v1043_v49, %v1014_v6  ;;  %v1459_v36 = vrot.slane %v1446_v47, 4  ;;  %v1499_v63 = vsel %vm56_vm0, %v1496_v37, %v1498_v40  ;;  %v1501_v6 = vrot.slane %v3265_v8, 4  ;;  %v3765_v40 = vld [vmem:[#allocation19_spill] sm:$0xff]  ;;  %v3766_v8 = vld [vmem:[#allocation20_spill] sm:$0xff] }
 0x223   :  { %v680_v47 = vadd.f32 %v2917_v15, %v643_v53  ;;  %v676_v39 = vadd.f32 %v2919_v17, %v639_v16  ;;  %v1542_v24 = vrot.slane %v1527_v41, 4 }
 0x224   :  { %1466 = vrot.lane.b32.xlu2 %v1458_v32, %s2525_s27  ;;  %v1502_v1 = vsel %vm56_vm0, %v1500_v10, %v1501_v6  ;;  %v3768_v10 = vld [vmem:[#allocation15_spill] sm:$0xff] }
 0x225   :  { %1396 = vrot.lane.b32.xlu0 %v1387_v50, %s2530_s9  ;;  %1470 = vrot.lane.b32.xlu1 %v1463_v58, %s2525_s27  ;;  %v1495_v50 = vrot.slane %v1483_v26, 4  ;;  %v1534_v58 = vrot.slane %v1522_v13, 4  ;;  %v1537_v13 = vrot.slane %v1524_v2, 4 }
 0x226   :  { %v1160_v12 = vpop.permute.xlu2 %1159 }
 0x227   :  { %v1174_v52 = vadd.f32 %v1160_v12, %v3098_v56  ;;  %v1080_v44 = vpop.permute.xlu1 %1079  ;;  %v1041_v55 = vpop.permute.xlu0 %1040  ;;  %v1460_v56 = vsel %vm56_vm0, %v1457_v60, %v1459_v36  ;;  %v1497_v15 = vsel %vm56_vm0, %v1495_v50, %v1496_v37  ;;  %v1526_v37 = vmul.f32 %v3155_v31, %v3261_v11 }
 0x228   :  { %v1052_v27 = vadd.f32 %v1041_v55, %v3176_v57  ;;  %v1523_v57 = vmul.f32 %v3142_v18, %v3261_v11 }
 0x22a   :  { %v3259_v5 = vadd.f32 %v1080_v44, %v1052_v27  ;;  %v1535_v32 = vrot.slane %v1523_v57, 4  ;;  %v3762_v44 = vld [vmem:[#allocation16_spill] sm:$0xff]  ;;  %v3764_v27 = vld [vmem:[#allocation13_spill] sm:$0xff] }
 0x22b   :  { %v717_v55 = vadd.f32 %v3762_v44, %v680_v47 }
 0x22c   :  { %1472 = vrot.lane.b32.xlu2 %v1465_v46, %s2525_s27  ;;  %v1536_v17 = vsel %vm56_vm0, %v1534_v58, %v1535_v32  ;;  %v1538_v47 = vsel %vm56_vm0, %v1535_v32, %v1537_v13  ;;  %v1525_v32 = vmul.f32 %v3114_v54, %v3261_v11 }
 0x22d   :  { %1468 = vrot.lane.b32.xlu0 %v1460_v56, %s2525_s27  ;;  %1507 = vrot.lane.b32.xlu1 %v1499_v63, %s2526_s30  ;;  %v754_v46 = vadd.f32 %v3765_v40, %v717_v55 }
 0x22e   :  { %v1201_v19 = vpop.permute.xlu2 %1200  ;;  %v1539_v40 = vrot.slane %v1525_v32, 4 }
 0x22f   :  { %v3282_v49 = vadd.f32 %v1201_v19, %v1171_v33  ;;  %v1086_v51 = vpop.permute.xlu1 %1085  ;;  %v1047_v60 = vpop.permute.xlu0 %1046  ;;  %v597_v33 = vmul.f32 %v3250_v21, %v3018_v59  ;;  %v713_v59 = vadd.f32 %v3763_v3, %v676_v39  ;;  %v3767_v19 = vld [vmem:[#allocation14_spill] sm:$0xff] }
 0x230   :  { %v1055_v23 = vadd.f32 %v1047_v60, %v3204_v25  ;;  %v1488_v25 = vmul.f32 %v3222_v4, %v1482_v34  ;;  %v1098_v34 = vmul.f32 %v3250_v21, %v3055_v38  ;;  %v791_v38 = vadd.f32 %v3047_v9, %v754_v46  ;;  %v3769_v9 = vld [vmem:[#allocation18_spill] sm:$0xff] }
 0x231   :  { %v640_v36 = vadd.f32 %v3764_v27, %v597_v33  ;;  %v750_v56 = vadd.f32 %v3766_v8, %v713_v59  ;;  %v1540_v33 = vrot.slane %v1526_v37, 4 }
 0x232   :  { %v3294_v12 = vadd.f32 %v1086_v51, %v1055_v23  ;;  %v1503_v61 = vrot.slane %v1488_v25, 4  ;;  %v1111_v16 = vrot.slane %v1098_v34, 2  ;;  %v1560_v23 = vstv %s3288_s13  ;;  %v3770_v25 = vld [vmem:[#allocation21_spill] sm:$0xff] }
 0x233   :  { %v677_v51 = vadd.f32 %v3767_v19, %v640_v36  ;;  %v787_v60 = vadd.f32 %v3049_v62, %v750_v56  ;;  %v1562_v39 = vmul.f32 %v3142_v18, %v1560_v23  ;;  %v1565_v2 = vmul.f32 %v3155_v31, %v1560_v23 }
 0x234   :  { %1509 = vrot.lane.b32.xlu2 %v1502_v1, %s2526_s30  ;;  %v1504_v62 = vsel %vm56_vm0, %v1501_v6, %v1503_v61  ;;  %v1564_v3 = vmul.f32 %v3114_v54, %v1560_v23  ;;  %v1541_v22 = vsel %vm56_vm0, %v1539_v40, %v1540_v33  ;;  %v1599_v56 = vstv %s2358_s14 }
 0x235   :  { %1505 = vrot.lane.b32.xlu0 %v1497_v15, %s2526_s30  ;;  %1544 = vrot.lane.b32.xlu1 %v1536_v17, %s2527_s3  ;;  %v714_v50 = vadd.f32 %v3768_v10, %v677_v51  ;;  %v824_v58 = vadd.f32 %v3111_v7, %v787_v60  ;;  %v1561_v7 = vmul.f32 %v3106_v28, %v1560_v23  ;;  %v1574_v17 = vrot.slane %v1562_v39, 4 }
 0x236   :  { %v1207_v63 = vpop.permute.xlu2 %1206  ;;  %v1579_v36 = vrot.slane %v1565_v2, 4  ;;  %v1578_v46 = vrot.slane %v1564_v3, 4  ;;  %v1602_v37 = vmul.f32 %v3250_v21, %v1599_v56  ;;  %v1601_v61 = vmul.f32 %v3142_v18, %v1599_v56 }
 0x237   :  { %v1221_v57 = vadd.f32 %v1207_v63, %v1174_v52  ;;  %v1158_v35 = vpop.permute.xlu1 %1157  ;;  %v1084_v26 = vpop.permute.xlu0 %1083  ;;  %v828_v52 = vadd.f32 %v3109_v43, %v791_v38  ;;  %v751_v1 = vadd.f32 %v3769_v9, %v714_v50  ;;  %v1112_v43 = vsel %vm842_vm9, %v1109_v45, %v1111_v16 }
 0x238   :  { %v3320_v53 = vadd.f32 %v1084_v26, %v3236_v48  ;;  %v1543_v48 = vsel %vm56_vm0, %v1540_v33, %v1542_v24  ;;  %v1125_v55 = vadd.f32 %v1112_v43, %v824_v58  ;;  %v1573_v11 = vrot.slane %v1561_v7, 4 }
 0x239   :  { %v788_v41 = vadd.f32 %v3770_v25, %v751_v1  ;;  %v1129_v44 = vadd.f32 %v1116_v14, %v828_v52  ;;  %v1566_v14 = vmul.f32 %v3222_v4, %v1560_v23  ;;  %v1580_v63 = vsel %vm56_vm0, %v1578_v46, %v1579_v36 }
 0x23a   :  { %v1575_v8 = vsel %vm56_vm0, %v1573_v11, %v1574_v17  ;;  %v1615_v50 = vrot.slane %v1602_v37, 4  ;;  %v1604_v58 = vmul.f32 %v3155_v31, %v1599_v56  ;;  %v1638_v33 = vstv %s2359_s15 }
 0x23b   :  { %v825_v45 = vadd.f32 %v3086_v30, %v788_v41  ;;  %v1563_v30 = vmul.f32 %v3250_v21, %v1560_v23  ;;  %v1581_v38 = vrot.slane %v1566_v14, 4  ;;  %v1613_v23 = vrot.slane %v1601_v61, 4 }
 0x23c   :  { %1546 = vrot.lane.b32.xlu2 %v1538_v47, %s2527_s3  ;;  %v1640_v47 = vmul.f32 %v3142_v18, %v1638_v33  ;;  %v1600_v9 = vmul.f32 %v3106_v28, %v1599_v56  ;;  %v1639_v1 = vmul.f32 %v3106_v28, %v1638_v33  ;;  %v1618_v43 = vrot.slane %v1604_v58, 4 }
 0x23d   :  { %1511 = vrot.lane.b32.xlu0 %v1504_v62, %s2526_s30  ;;  %1550 = vrot.lane.b32.xlu1 %v1543_v48, %s2527_s3  ;;  %v1576_v10 = vrot.slane %v1563_v30, 4  ;;  %v1582_v52 = vsel %vm56_vm0, %v1579_v36, %v1581_v38  ;;  %v1641_v3 = vmul.f32 %v3250_v21, %v1638_v33 }
 0x23e   :  { %v1248_v6 = vpop.permute.xlu2 %1247  ;;  %v1652_v25 = vrot.slane %v1640_v47, 4 }
 0x23f   :  { %v1265_v59 = vadd.f32 %v1248_v6, %v3282_v49  ;;  %v1164_v15 = vpop.permute.xlu1 %1163  ;;  %v1156_v0 = vpop.permute.xlu0 %1155  ;;  %v1126_v49 = vadd.f32 %v1111_v16, %v825_v45  ;;  %v1612_v6 = vrot.slane %v1600_v9, 4  ;;  %v1654_v40 = vrot.slane %v1641_v3, 4 }
 0x240   :  { %v1176_v34 = vadd.f32 %v1164_v15, %v1129_v44  ;;  %v1172_v27 = vadd.f32 %v1156_v0, %v1125_v55  ;;  %v1651_v44 = vrot.slane %v1639_v1, 4  ;;  %v1605_v0 = vmul.f32 %v3222_v4, %v1599_v56 }
 0x241   :  { %v1173_v26 = vadd.f32 %v1158_v35, %v1126_v49  ;;  %v1577_v35 = vsel %vm56_vm0, %v1574_v17, %v1576_v10  ;;  %v1614_v15 = vsel %vm56_vm0, %v1612_v6, %v1613_v23  ;;  %v1644_v17 = vmul.f32 %v3222_v4, %v1638_v33 }
 0x243   :  { %v1659_v14 = vrot.slane %v1644_v17, 4 }
 0x244   :  { %1583 = vrot.lane.b32.xlu2 %v1575_v8, %s2528_s6 }
 0x245   :  { %1548 = vrot.lane.b32.xlu0 %v1541_v22, %s2527_s3  ;;  %1587 = vrot.lane.b32.xlu1 %v1580_v63, %s2528_s6  ;;  %v1620_v22 = vrot.slane %v1605_v0, 4  ;;  %v1712_v63 = vstv %s2361_s16 }
 0x246   :  { %v1254_v13 = vpop.permute.xlu2 %1253  ;;  %v1714_v30 = vmul.f32 %v3142_v18, %v1712_v63  ;;  %v1716_v47 = vmul.f32 %v3114_v54, %v1712_v63 }
 0x247   :  { %v1268_v24 = vadd.f32 %v1254_v13, %v1221_v57  ;;  %v1205_v19 = vpop.permute.xlu1 %1204  ;;  %v1162_v51 = vpop.permute.xlu0 %1161  ;;  %v1616_v57 = vsel %vm56_vm0, %v1613_v23, %v1615_v50  ;;  %v1621_v37 = vsel %vm56_vm0, %v1618_v43, %v1620_v22  ;;  %v1713_v13 = vmul.f32 %v3106_v28, %v1712_v63 }
 0x248   :  { %v1220_v60 = vadd.f32 %v1205_v19, %v1173_v26  ;;  %v1175_v16 = vadd.f32 %v1162_v51, %v3219_v20  ;;  %v1603_v20 = vmul.f32 %v3114_v54, %v1599_v56  ;;  %v1655_v56 = vsel %vm56_vm0, %v1652_v25, %v1654_v40 }
 0x249   :  { %v1725_v23 = vrot.slane %v1713_v13, 4 }
 0x24a   :  { %v1617_v41 = vrot.slane %v1603_v20, 4 }
 0x24c   :  { %1589 = vrot.lane.b32.xlu2 %v1582_v52, %s2528_s6  ;;  %v1619_v55 = vsel %vm56_vm0, %v1617_v41, %v1618_v43 }
 0x24d   :  { %1585 = vrot.lane.b32.xlu0 %v1577_v35, %s2528_s6  ;;  %1624 = vrot.lane.b32.xlu1 %v1616_v57, %s2529_s8  ;;  %v1717_v57 = vmul.f32 %v3155_v31, %v1712_v63 }
 0x24e   :  { %v1295_v39 = vpop.permute.xlu2 %1294 }
 0x24f   :  { %v1312_v62 = vadd.f32 %v1295_v39, %v1265_v59  ;;  %v1211_v48 = vpop.permute.xlu1 %1210  ;;  %v1203_v2 = vpop.permute.xlu0 %1202  ;;  %v1653_v59 = vsel %vm56_vm0, %v1651_v44, %v1652_v25 }
 0x250   :  { %v1223_v7 = vadd.f32 %v1211_v48, %v1176_v34  ;;  %v1219_v32 = vadd.f32 %v1203_v2, %v1172_v27  ;;  %v1643_v34 = vmul.f32 %v3155_v31, %v1638_v33  ;;  %v1718_v48 = vmul.f32 %v3222_v4, %v1712_v63 }
 0x252   :  { %v1657_v49 = vrot.slane %v1643_v34, 4  ;;  %v1733_v41 = vrot.slane %v1718_v48, 4 }
 0x254   :  { %1626 = vrot.lane.b32.xlu2 %v1619_v55, %s2529_s8  ;;  %v1660_v26 = vsel %vm56_vm0, %v1657_v49, %v1659_v14 }
 0x255   :  { %1622 = vrot.lane.b32.xlu0 %v1614_v15, %s2529_s8  ;;  %1661 = vrot.lane.b32.xlu1 %v1653_v59, %s2530_s9 }
 0x256   :  { %v1301_v45 = vpop.permute.xlu2 %1300 }
 0x257   :  { %v1315_v27 = vadd.f32 %v1301_v45, %v1268_v24  ;;  %v1252_v36 = vpop.permute.xlu1 %1251  ;;  %v1209_v11 = vpop.permute.xlu0 %1208  ;;  %v1642_v24 = vmul.f32 %v3114_v54, %v1638_v33 }
 0x258   :  { %v1267_v46 = vadd.f32 %v1252_v36, %v1220_v60  ;;  %v1222_v8 = vadd.f32 %v1209_v11, %v1175_v16  ;;  %v1726_v60 = vrot.slane %v1714_v30, 4  ;;  %v1715_v16 = vmul.f32 %v3250_v21, %v1712_v63 }
 0x259   :  { %v1656_v52 = vrot.slane %v1642_v24, 4 }
 0x25a   :  { %v1727_v58 = vsel %vm56_vm0, %v1725_v23, %v1726_v60  ;;  %v1728_v35 = vrot.slane %v1715_v16, 4  ;;  %v1806_v16 = vstv %s2363_s1 }
 0x25b   :  { %v1658_v33 = vsel %vm56_vm0, %v1656_v52, %v1657_v49  ;;  %v1808_v23 = vmul.f32 %v3142_v18, %v1806_v16  ;;  %v1809_v48 = vmul.f32 %v3250_v21, %v1806_v16 }
 0x25c   :  { %1663 = vrot.lane.b32.xlu2 %v1655_v56, %s2530_s9  ;;  %v1729_v44 = vsel %vm56_vm0, %v1726_v60, %v1728_v35 }
 0x25d   :  { %1628 = vrot.lane.b32.xlu0 %v1621_v37, %s2529_s8  ;;  %1667 = vrot.lane.b32.xlu1 %v1660_v26, %s2530_s9 }
 0x25e   :  { %v1342_v61 = vpop.permute.xlu2 %1341 }
 0x25f   :  { %v1359_v19 = vadd.f32 %v1342_v61, %v1312_v62  ;;  %v1258_v51 = vpop.permute.xlu1 %1257  ;;  %v1250_v38 = vpop.permute.xlu0 %1249  ;;  %v1731_v62 = vrot.slane %v1717_v57, 4 }
 0x260   :  { %v1270_v10 = vadd.f32 %v1258_v51, %v1223_v7  ;;  %v1266_v50 = vadd.f32 %v1250_v38, %v1219_v32  ;;  %v1730_v7 = vrot.slane %v1716_v47, 4  ;;  %v1759_v32 = vstv %s2362_s17 }
 0x261   :  { %v1761_v6 = vmul.f32 %v3142_v18, %v1759_v32  ;;  %v1760_v55 = vmul.f32 %v3106_v28, %v1759_v32  ;;  %v1762_v45 = vmul.f32 %v3250_v21, %v1759_v32  ;;  %v1734_v22 = vsel %vm56_vm0, %v1731_v62, %v1733_v41 }
 0x262   :  { %v1732_v25 = vsel %vm56_vm0, %v1730_v7, %v1731_v62  ;;  %v1763_v49 = vmul.f32 %v3114_v54, %v1759_v32  ;;  %v1765_v61 = vmul.f32 %v3222_v4, %v1759_v32  ;;  %v1820_v62 = vrot.slane %v1808_v23, 4 }
 0x263   :  { %v1773_v17 = vrot.slane %v1761_v6, 4  ;;  %v1772_v36 = vrot.slane %v1760_v55, 4  ;;  %v1775_v40 = vrot.slane %v1762_v45, 4  ;;  %v1811_v6 = vmul.f32 %v3155_v31, %v1806_v16 }
 0x264   :  { %1735 = vrot.lane.b32.xlu2 %v1727_v58, %s2525_s27  ;;  %v1777_v38 = vrot.slane %v1763_v49, 4 }
 0x265   :  { %1665 = vrot.lane.b32.xlu0 %v1658_v33, %s2530_s9  ;;  %1739 = vrot.lane.b32.xlu1 %v1728_v35, %s2525_s27  ;;  %v1774_v11 = vsel %vm56_vm0, %v1772_v36, %v1773_v17  ;;  %v1776_v52 = vsel %vm56_vm0, %v1773_v17, %v1775_v40  ;;  %v1807_v33 = vmul.f32 %v3106_v28, %v1806_v16 }
 0x266   :  { %v1348_v20 = vpop.permute.xlu2 %1347  ;;  %v1812_v36 = vmul.f32 %v3222_v4, %v1806_v16 }
 0x267   :  { %v1362_v39 = vadd.f32 %v1348_v20, %v1315_v27  ;;  %v1299_v9 = vpop.permute.xlu1 %1298  ;;  %v1256_v1 = vpop.permute.xlu0 %1255 }
 0x268   :  { %v1314_v2 = vadd.f32 %v1299_v9, %v1267_v46  ;;  %v1269_v43 = vadd.f32 %v1256_v1, %v1222_v8  ;;  %v1764_v46 = vmul.f32 %v3155_v31, %v1759_v32  ;;  %v3409_v8 = vstv %s2353_s0 }
 0x269   :  { %v3415_v14 = vmul.f32 %v3142_v18, %v3409_v8  ;;  %v1413_v56 = vmul.f32 %v3106_v28, %v3409_v8  ;;  %v1418_v35 = vmul.f32 %v3222_v4, %v3409_v8  ;;  %v1417_v20 = vmul.f32 %v3155_v31, %v3409_v8 }
 0x26a   :  { %v1778_v13 = vrot.slane %v1764_v46, 4  ;;  %v1819_v32 = vrot.slane %v1807_v33, 4  ;;  %v1415_v33 = vmul.f32 %v3250_v21, %v3409_v8 }
 0x26b   :  { %v1426_v51 = vrot.slane %v3415_v14, 4  ;;  %v1425_v60 = vrot.slane %v1413_v56, 4  ;;  %v1433_v7 = vrot.slane %v1418_v35, 4 }
 0x26c   :  { %1741 = vrot.lane.b32.xlu2 %v1732_v25, %s2525_s27  ;;  %v1431_v25 = vrot.slane %v1417_v20, 4 }
 0x26d   :  { %1737 = vrot.lane.b32.xlu0 %v1729_v44, %s2525_s27  ;;  %1745 = vrot.lane.b32.xlu1 %v1733_v41, %s2525_s27  ;;  %v1427_v58 = vsel %vm56_vm0, %v1425_v60, %v1426_v51  ;;  %v1822_v41 = vrot.slane %v1809_v48, 4 }
 0x26e   :  { %v1389_v3 = vpop.permute.xlu2 %1388  ;;  %v1439_v57 = vadd.f32 %v1427_v58, %v3259_v5  ;;  %v1821_v5 = vsel %vm56_vm0, %v1819_v32, %v1820_v62  ;;  %v1434_v55 = vsel %vm56_vm0, %v1431_v25, %v1433_v7  ;;  %v1428_v32 = vrot.slane %v1415_v33, 4 }
 0x26f   :  { %v3404_v15 = vadd.f32 %v1389_v3, %v1359_v19  ;;  %v1305_v59 = vpop.permute.xlu1 %1304  ;;  %v1297_v0 = vpop.permute.xlu0 %1296  ;;  %v1442_v3 = vadd.f32 %v1434_v55, %v3294_v12  ;;  %v1823_v56 = vsel %vm56_vm0, %v1820_v62, %v1822_v41 }
 0x270   :  { %v1317_v34 = vadd.f32 %v1305_v59, %v1270_v10  ;;  %v1313_v27 = vadd.f32 %v1297_v0, %v1266_v50  ;;  %v1779_v10 = vsel %vm56_vm0, %v1777_v38, %v1778_v13  ;;  %v1780_v50 = vrot.slane %v1765_v61, 4 }
 0x271   :  { %v1810_v59 = vmul.f32 %v3114_v54, %v1806_v16  ;;  %v1416_v38 = vmul.f32 %v3114_v54, %v3409_v8 }
 0x272   :  { %v1781_v44 = vsel %vm56_vm0, %v1778_v13, %v1780_v50 }
 0x273   :  { %v1824_v46 = vrot.slane %v1810_v59, 4 }
 0x274   :  { %1782 = vrot.lane.b32.xlu2 %v1774_v11, %s2526_s30 }
 0x275   :  { %1786 = vrot.lane.b32.xlu1 %v1775_v40, %s2526_s30  ;;  %1743 = vrot.lane.b32.xlu0 %v1734_v22, %s2525_s27  ;;  %v1853_v22 = vstv %s2364_s20 }
 0x276   :  { %v1395_v63 = vpop.permute.xlu2 %1394  ;;  %v1855_v12 = vmul.f32 %v3142_v18, %v1853_v22  ;;  %v1859_v48 = vmul.f32 %v3222_v4, %v1853_v22 }
 0x277   :  { %v3422_v30 = vadd.f32 %v1395_v63, %v1362_v39  ;;  %v1346_v37 = vpop.permute.xlu1 %1345  ;;  %v1303_v26 = vpop.permute.xlu0 %1302  ;;  %v1827_v63 = vrot.slane %v1812_v36, 4 }
 0x278   :  { %v1361_v24 = vadd.f32 %v1346_v37, %v1314_v2  ;;  %v1316_v19 = vadd.f32 %v1303_v26, %v1269_v43  ;;  %v1854_v37 = vmul.f32 %v3106_v28, %v1853_v22  ;;  %v1858_v28 = vmul.f32 %v3155_v31, %v1853_v22 }
 0x27a   :  { %v1872_v62 = vrot.slane %v1858_v28, 4 }
 0x27c   :  { %1788 = vrot.lane.b32.xlu2 %v1779_v10, %s2526_s30  ;;  %v1866_v10 = vrot.slane %v1854_v37, 4 }
 0x27d   :  { %1792 = vrot.lane.b32.xlu1 %v1780_v50, %s2526_s30  ;;  %1784 = vrot.lane.b32.xlu0 %v1776_v52, %s2526_s30  ;;  %v1430_v52 = vrot.slane %v1416_v38, 4 }
 0x27e   :  { %v1467_v47 = vpop.permute.xlu2 %1466 }
 0x27f   :  { %v3441_v39 = vadd.f32 %v1467_v47, %v1439_v57  ;;  %v1352_v9 = vpop.permute.xlu1 %1351  ;;  %v1344_v1 = vpop.permute.xlu0 %1343  ;;  %v1432_v35 = vsel %vm56_vm0, %v1430_v52, %v1431_v25  ;;  %v1857_v57 = vmul.f32 %v3114_v54, %v1853_v22  ;;  %v1092_v25 = vadd.f32 %v3215_v29, %v3243_v42  ;;  %v3499_v42 = vld [vmem:[#allocation2] sm:$0xff] }
 0x280   :  { %v1364_v2 = vadd.f32 %v1352_v9, %v1317_v34  ;;  %v1360_v43 = vadd.f32 %v1344_v1, %v1313_v27  ;;  %v1825_v27 = vrot.slane %v1811_v6, 4  ;;  %v1441_v20 = vadd.f32 %v1432_v35, %v3320_v53 }
 0x281   :  { %v1871_v7 = vrot.slane %v1857_v57, 4  ;;  %v1900_v54 = vstv %s2365_s21  ;;  %v1429_v29 = vsel %vm56_vm0, %v1426_v51, %v1428_v32 }
 0x282   :  { %v1826_v49 = vsel %vm56_vm0, %v1824_v46, %v1825_v27  ;;  %v1828_v58 = vsel %vm56_vm0, %v1825_v27, %v1827_v63  ;;  %v1902_v53 = vmul.f32 %v3142_v18, %v1900_v54  ;;  %v1905_v51 = vmul.f32 %v3155_v31, %v1900_v54 }
 0x283   :  { %v1873_v8 = vsel %vm56_vm0, %v1871_v7, %v1872_v62  ;;  %v3529_v7 = vstv %s2360_s23 }
 0x284   :  { %1829 = vrot.lane.b32.xlu2 %v1821_v5, %s2527_s3 }
 0x285   :  { %1833 = vrot.lane.b32.xlu1 %v1822_v41, %s2527_s3  ;;  %1790 = vrot.lane.b32.xlu0 %v1781_v44, %s2526_s30  ;;  %v1874_v41 = vrot.slane %v1859_v48, 4  ;;  %v1901_v44 = vmul.f32 %v3499_v42, %v1900_v54 }
 0x286   :  { %v1473_v0 = vpop.permute.xlu2 %1472 }
 0x287   :  { %v3453_v17 = vadd.f32 %v1473_v0, %v1442_v3  ;;  %v1393_v45 = vpop.permute.xlu1 %1392  ;;  %v1350_v34 = vpop.permute.xlu0 %1349  ;;  %v1440_v3 = vadd.f32 %v1429_v29, %v1092_v25  ;;  %v1913_v36 = vrot.slane %v1901_v44, 4  ;;  %v3533_v25 = vld [vmem:[#allocation2 + $0x8] sm:$0xff] }
 0x288   :  { %v3456_v11 = vadd.f32 %v1393_v45, %v1361_v24  ;;  %v1363_v40 = vadd.f32 %v1350_v34, %v1316_v19  ;;  %v1867_v24 = vrot.slane %v1855_v12, 4  ;;  %v1856_v19 = vmul.f32 %v3250_v21, %v1853_v22 }
 0x289   :  { %v1914_v45 = vrot.slane %v1902_v53, 4  ;;  %v1903_v34 = vmul.f32 %v3250_v21, %v1900_v54  ;;  %v1875_v22 = vsel %vm56_vm0, %v1872_v62, %v1874_v41 }
 0x28a   :  { %v1868_v50 = vsel %vm56_vm0, %v1866_v10, %v1867_v24  ;;  %v1869_v23 = vrot.slane %v1856_v19, 4  ;;  %v1947_v10 = vstv %s2366_s22 }
 0x28b   :  { %v1915_v46 = vsel %vm56_vm0, %v1913_v36, %v1914_v45  ;;  %v1916_v14 = vrot.slane %v1903_v34, 4  ;;  %v1949_v52 = vmul.f32 %v3142_v18, %v1947_v10  ;;  %v1953_v44 = vmul.f32 %v3222_v4, %v1947_v10 }
 0x28c   :  { %1835 = vrot.lane.b32.xlu2 %v1826_v49, %s2527_s3  ;;  %v1870_v6 = vsel %vm56_vm0, %v1867_v24, %v1869_v23  ;;  %v2026_v34 = vstv %s2368_s24 }
 0x28d   :  { %1839 = vrot.lane.b32.xlu1 %v1827_v63, %s2527_s3  ;;  %1831 = vrot.lane.b32.xlu0 %v1823_v56, %s2527_s3  ;;  %v3511_v63 = vld [vmem:[#allocation2 + $0x18] sm:$0xff]  ;;  %v1917_v28 = vsel %vm56_vm0, %v1914_v45, %v1916_v14  ;;  %v1968_v36 = vrot.slane %v1953_v44, 4 }
 0x28e   :  { %v1510_v26 = vpop.permute.xlu2 %1509  ;;  %v1904_v12 = vmul.f32 %v3511_v63, %v1900_v54 }
 0x28f   :  { %v1399_v13 = vpop.permute.xlu1 %1398  ;;  %v1391_v61 = vpop.permute.xlu0 %1390 }
 0x290   :  { %v3468_v60 = vadd.f32 %v1399_v13, %v1364_v2  ;;  %v3470_v16 = vadd.f32 %v1391_v61, %v1360_v43  ;;  %v1919_v13 = vrot.slane %v1905_v51, 4  ;;  %v1906_v61 = vmul.f32 %v3222_v4, %v1900_v54 }
 0x291   :  { %v1918_v19 = vrot.slane %v1904_v12, 4  ;;  %v3537_v54 = vmul.f32 %v3533_v25, %v3529_v7 }
 0x294   :  { %1876 = vrot.lane.b32.xlu2 %v1868_v50, %s2528_s6  ;;  %v1920_v50 = vsel %vm56_vm0, %v1918_v19, %v1919_v13 }
 0x295   :  { %1880 = vrot.lane.b32.xlu1 %v1869_v23, %s2528_s6  ;;  %1837 = vrot.lane.b32.xlu0 %v1828_v58, %s2527_s3  ;;  %v1921_v23 = vrot.slane %v1906_v61, 4  ;;  %v1681_v61 = vmul.f32 %v3511_v63, %v3529_v7 }
 0x296   :  { %v1547_v47 = vpop.permute.xlu2 %1546 }
 0x297   :  { %v1471_v9 = vpop.permute.xlu1 %1470  ;;  %v1397_v1 = vpop.permute.xlu0 %1396  ;;  %v1922_v32 = vsel %vm56_vm0, %v1919_v13, %v1921_v23 }
 0x298   :  { %v1480_v2 = vadd.f32 %v1471_v9, %v1441_v20  ;;  %v3484_v43 = vadd.f32 %v1397_v1, %v1363_v40  ;;  %v1950_v20 = vmul.f32 %v3250_v21, %v1947_v10 }
 0x29a   :  { %v3488_v5 = vadd.f32 %v1510_v26, %v1480_v2  ;;  %v1963_v48 = vrot.slane %v1950_v20, 4  ;;  %v1952_v2 = vmul.f32 %v3155_v31, %v1947_v10  ;;  %v1951_v31 = vmul.f32 %v3511_v63, %v1947_v10 }
 0x29b   :  { %v2065_v20 = vstv %s2369_s25 }
 0x29c   :  { %1882 = vrot.lane.b32.xlu2 %v1873_v8, %s2528_s6  ;;  %v1966_v29 = vrot.slane %v1952_v2, 4 }
 0x29d   :  { %1886 = vrot.lane.b32.xlu1 %v1874_v41, %s2528_s6  ;;  %1878 = vrot.lane.b32.xlu0 %v1870_v6, %s2528_s6  ;;  %v1678_v41 = vmul.f32 %v3499_v42, %v3529_v7 }
 0x29e   :  { %v1584_v55 = vpop.permute.xlu2 %1583 }
 0x29f   :  { %v1508_v59 = vpop.permute.xlu1 %1507  ;;  %v1469_v0 = vpop.permute.xlu0 %1468  ;;  %v1690_v45 = vrot.slane %v1678_v41, 4 }
 0x2a0   :  { %v1479_v27 = vadd.f32 %v1469_v0, %v1440_v3  ;;  %v1691_v3 = vrot.slane %v3537_v54, 4 }
 0x2a2   :  { %v1518_v40 = vadd.f32 %v1508_v59, %v1479_v27  ;;  %v1965_v59 = vrot.slane %v1951_v31, 4  ;;  %v1692_v51 = vsel %vm56_vm0, %v1690_v45, %v1691_v3 }
 0x2a4   :  { %1923 = vrot.lane.b32.xlu2 %v1915_v46, %s2529_s8  ;;  %v3507_v49 = vadd.f32 %v1547_v47, %v1518_v40  ;;  %v1961_v47 = vrot.slane %v1949_v52, 4  ;;  %v1967_v27 = vsel %vm56_vm0, %v1965_v59, %v1966_v29  ;;  %v2028_v40 = vmul.f32 %v3533_v25, %v2026_v34  ;;  %v3553_v46 = vld [vmem:[#allocation2 + $0x20] sm:$0xff] }
 0x2a5   :  { %1927 = vrot.lane.b32.xlu1 %v1916_v14, %s2529_s8  ;;  %1884 = vrot.lane.b32.xlu0 %v1875_v22, %s2528_s6  ;;  %v2031_v14 = vmul.f32 %v3553_v46, %v2026_v34  ;;  %v3563_v22 = vmul.f32 %v3553_v46, %v3529_v7  ;;  %v3595_v59 = vstv %s2370_s26 }
 0x2a6   :  { %v1590_v56 = vpop.permute.xlu2 %1589  ;;  %v2106_v45 = vmul.f32 %v3533_v25, %v3595_v59 }
 0x2a7   :  { %v1545_v37 = vpop.permute.xlu1 %1544  ;;  %v1506_v26 = vpop.permute.xlu0 %1505  ;;  %v1696_v52 = vrot.slane %v3563_v22, 4 }
 0x2a8   :  { %v1517_v24 = vadd.f32 %v1506_v26, %v3441_v39  ;;  %v1948_v39 = vmul.f32 %v3499_v42, %v1947_v10  ;;  %v2030_v26 = vmul.f32 %v3511_v63, %v2026_v34  ;;  %v2040_v10 = vrot.slane %v2028_v40, 6 }
 0x2aa   :  { %v1556_v38 = vadd.f32 %v1545_v37, %v1517_v24  ;;  %v1960_v9 = vrot.slane %v1948_v39, 4  ;;  %v2027_v37 = vmul.f32 %v3499_v42, %v2026_v34 }
 0x2ac   :  { %1929 = vrot.lane.b32.xlu2 %v1920_v50, %s2529_s8  ;;  %v3520_v58 = vadd.f32 %v1584_v55, %v1556_v38  ;;  %v1962_v62 = vsel %vm56_vm0, %v1960_v9, %v1961_v47  ;;  %v2045_v50 = vrot.slane %v2031_v14, 6  ;;  %v2068_v9 = vmul.f32 %v3250_v21, %v2065_v20 }
 0x2ad   :  { %1933 = vrot.lane.b32.xlu1 %v1921_v23, %s2529_s8  ;;  %1925 = vrot.lane.b32.xlu0 %v1917_v28, %s2529_s8  ;;  %v2039_v28 = vrot.slane %v2027_v37, 6  ;;  %v2066_v14 = vmul.f32 %v3499_v42, %v2065_v20 }
 0x2ae   :  { %v1627_v35 = vpop.permute.xlu2 %1626 }
 0x2af   :  { %v1551_v57 = vpop.permute.xlu1 %1550  ;;  %v1512_v33 = vpop.permute.xlu0 %1511 }
 0x2b0   :  { %v1520_v18 = vadd.f32 %v1512_v33, %v3453_v17 }
 0x2b2   :  { %v1559_v1 = vadd.f32 %v1551_v57, %v1520_v18  ;;  %v2041_v57 = vsel %vm2007_vm10, %v2039_v28, %v2040_v10 }
 0x2b4   :  { %1970 = vrot.lane.b32.xlu2 %v1962_v62, %s2530_s9  ;;  %v3539_v17 = vadd.f32 %v1590_v56, %v1559_v1  ;;  %v1706_v56 = vadd.f32 %v1692_v51, %v3404_v15  ;;  %v2044_v15 = vrot.slane %v2030_v26, 6  ;;  %v2029_v1 = vmul.f32 %v3250_v21, %v2026_v34 }
 0x2b5   :  { %1974 = vrot.lane.b32.xlu1 %v1963_v48, %s2530_s9  ;;  %1931 = vrot.lane.b32.xlu0 %v1922_v32, %s2529_s8  ;;  %v2118_v26 = vrot.slane %v2106_v45, 6 }
 0x2b6   :  { %v3544_v8 = vpop.permute.xlu2 %1663  ;;  %v2046_v33 = vsel %vm2007_vm10, %v2044_v15, %v2045_v50 }
 0x2b7   :  { %v1588_v53 = vpop.permute.xlu1 %1587  ;;  %v1549_v6 = vpop.permute.xlu0 %1548 }
 0x2b8   :  { %v1558_v55 = vadd.f32 %v1549_v6, %v3488_v5  ;;  %v1964_v5 = vsel %vm56_vm0, %v1961_v47, %v1963_v48  ;;  %v2032_v47 = vmul.f32 %v3222_v4, %v2026_v34  ;;  %v2067_v48 = vmul.f32 %v3533_v25, %v2065_v20 }
 0x2b9   :  { %v2081_v6 = vrot.slane %v2068_v9, 6 }
 0x2ba   :  { %v1597_v0 = vadd.f32 %v1588_v53, %v1558_v55  ;;  %v2047_v41 = vrot.slane %v2032_v47, 6  ;;  %v2079_v55 = vrot.slane %v2067_v48, 6 }
 0x2bc   :  { %1976 = vrot.lane.b32.xlu2 %v1967_v27, %s2530_s9  ;;  %v3565_v12 = vadd.f32 %v1627_v35, %v1597_v0  ;;  %v1695_v35 = vrot.slane %v1681_v61, 4  ;;  %v2048_v0 = vsel %vm2007_vm10, %v2045_v50, %v2047_v41  ;;  %v2082_v34 = vsel %vm2007_vm10, %v2079_v55, %v2081_v6 }
 0x2bd   :  { %1980 = vrot.lane.b32.xlu1 %v1968_v36, %s2530_s9  ;;  %1972 = vrot.lane.b32.xlu0 %v1964_v5, %s2530_s9  ;;  %v2069_v27 = vmul.f32 %v3511_v63, %v2065_v20  ;;  %v1680_v61 = vmul.f32 %v3250_v21, %v3529_v7  ;;  %v2078_v50 = vrot.slane %v2066_v14, 6 }
 0x2be   :  { %v1736_v13 = vpop.permute.xlu2 %1735  ;;  %v1697_v18 = vsel %vm56_vm0, %v1695_v35, %v1696_v52  ;;  %v3621_v35 = vld [vmem:[#allocation2 + $0x28] sm:$0x3f] }
 0x2bf   :  { %v1753_v24 = vadd.f32 %v1736_v13, %v1706_v56  ;;  %v1625_v19 = vpop.permute.xlu1 %1624  ;;  %v1586_v38 = vpop.permute.xlu0 %1585  ;;  %v1709_v62 = vadd.f32 %v1697_v18, %v3422_v30  ;;  %v2070_v30 = vmul.f32 %v3553_v46, %v2065_v20  ;;  %v1693_v15 = vrot.slane %v1680_v61, 4 }
 0x2c0   :  { %v1596_v23 = vadd.f32 %v1586_v38, %v3507_v49  ;;  %v1969_v49 = vsel %vm56_vm0, %v1966_v29, %v1968_v36  ;;  %v2042_v29 = vrot.slane %v2029_v1, 6  ;;  %v2105_v36 = vmul.f32 %v3499_v42, %v3595_v59 }
 0x2c1   :  { %v2084_v37 = vrot.slane %v2070_v30, 6 }
 0x2c2   :  { %v3576_v39 = vadd.f32 %v1625_v19, %v1596_v23  ;;  %v2083_v19 = vrot.slane %v2069_v27, 6  ;;  %v2117_v38 = vrot.slane %v2105_v36, 6  ;;  %v2108_v27 = vmul.f32 %v3511_v63, %v3595_v59 }
 0x2c4   :  { %2049 = vrot.lane.b32.xlu2 %v2041_v57, %s2525_s27  ;;  %v2085_v23 = vsel %vm2007_vm10, %v2083_v19, %v2084_v37  ;;  %v2119_v28 = vsel %vm2007_vm10, %v2117_v38, %v2118_v26  ;;  %v2110_v57 = vmul.f32 %v3621_v35, %v3595_v59  ;;  %v3658_v19 = vld [vmem:[#allocation2 + $0x10] sm:$0x3f] }
 0x2c5   :  { %2053 = vrot.lane.b32.xlu1 %v2046_v33, %s2525_s27  ;;  %1978 = vrot.lane.b32.xlu0 %v1969_v49, %s2530_s9  ;;  %v2071_v33 = vmul.f32 %v3621_v35, %v2065_v20  ;;  %v1708_v49 = vadd.f32 %v1693_v15, %v3456_v11 }
 0x2c6   :  { %v1742_v4 = vpop.permute.xlu2 %1741 }
 0x2c7   :  { %v1756_v2 = vadd.f32 %v1742_v4, %v1709_v62  ;;  %v1662_v32 = vpop.permute.xlu1 %1661  ;;  %v1623_v31 = vpop.permute.xlu0 %1622  ;;  %v1683_v4 = vmul.f32 %v3621_v35, %v3529_v7 }
 0x2c8   :  { %v1634_v53 = vadd.f32 %v1623_v31, %v3520_v58  ;;  %v2043_v58 = vsel %vm2007_vm10, %v2040_v10, %v2042_v29  ;;  %v2086_v31 = vrot.slane %v2071_v33, 6 }
 0x2c9   :  { %v1698_v7 = vrot.slane %v1683_v4, 4 }
 0x2ca   :  { %v3593_v44 = vadd.f32 %v1662_v32, %v1634_v53  ;;  %v2125_v32 = vrot.slane %v2110_v57, 6  ;;  %v2087_v29 = vsel %vm2007_vm10, %v2084_v37, %v2086_v31 }
 0x2cb   :  { %v1711_v45 = vadd.f32 %v1698_v7, %v3468_v60 }
 0x2cc   :  { %2055 = vrot.lane.b32.xlu2 %v2048_v0, %s2525_s27 }
 0x2cd   :  { %2090 = vrot.lane.b32.xlu1 %v2082_v34, %s2526_s30  ;;  %2051 = vrot.lane.b32.xlu0 %v2043_v58, %s2525_s27  ;;  %s2371_s27 = sld [smem:[#allocation4 + $0x2e]] }
 0x2ce   :  { %v1783_v40 = vpop.permute.xlu2 %1782 }
 0x2cf   :  { %v1800_v5 = vadd.f32 %v1783_v40, %v1753_v24  ;;  %v1668_v51 = vpop.permute.xlu1 %1667  ;;  %v1629_v56 = vpop.permute.xlu0 %1628  ;;  %v2107_v24 = vmul.f32 %v3250_v21, %v3595_v59  ;;  %v2109_v21 = vmul.f32 %v3553_v46, %v3595_v59 }
 0x2d0   :  { %v1637_v13 = vadd.f32 %v1629_v56, %v3539_v17  ;;  %v2080_v17 = vsel %vm2007_vm10, %v2078_v50, %v2079_v55 }
 0x2d1   :  { %v2120_v62 = vrot.slane %v2107_v24, 6  ;;  %v2123_v41 = vrot.slane %v2109_v21, 6 }
 0x2d2   :  { %v3613_v10 = vadd.f32 %v1668_v51, %v1637_v13  ;;  %v2122_v13 = vrot.slane %v2108_v27, 6 }
 0x2d3   :  { %v2143_v53 = vstv %s2371_s27  ;;  %v2121_v11 = vsel %vm2007_vm10, %v2118_v26, %v2120_v62 }
 0x2d4   :  { %2092 = vrot.lane.b32.xlu2 %v2085_v23, %s2526_s30  ;;  %v2145_v6 = vmul.f32 %v3533_v25, %v2143_v53  ;;  %v2148_v55 = vmul.f32 %v3553_v46, %v2143_v53  ;;  %v2144_v0 = vmul.f32 %v3499_v42, %v2143_v53  ;;  %v2147_v58 = vmul.f32 %v3511_v63, %v2143_v53 }
 0x2d5   :  { %2127 = vrot.lane.b32.xlu1 %v2119_v28, %s2527_s3  ;;  %2088 = vrot.lane.b32.xlu0 %v2080_v17, %s2526_s30  ;;  %v2149_v60 = vmul.f32 %v3621_v35, %v2143_v53  ;;  %v2146_v50 = vmul.f32 %v3658_v19, %v2143_v53  ;;  %v1699_v23 = vsel %vm56_vm0, %v1696_v52, %v1698_v7 }
 0x2d6   :  { %v1789_v47 = vpop.permute.xlu2 %1788  ;;  %v2157_v51 = vrot.slane %v2145_v6, 6  ;;  %v2162_v37 = vrot.slane %v2148_v55, 6  ;;  %v2161_v26 = vrot.slane %v2147_v58, 6  ;;  %v1710_v24 = vadd.f32 %v1699_v23, %v3484_v43 }
 0x2d7   :  { %v1803_v18 = vadd.f32 %v1789_v47, %v1756_v2  ;;  %v1740_v9 = vpop.permute.xlu1 %1739  ;;  %v1666_v1 = vpop.permute.xlu0 %1665  ;;  %v2126_v2 = vsel %vm2007_vm10, %v2123_v41, %v2125_v32  ;;  %v2164_v47 = vrot.slane %v2149_v60, 6 }
 0x2d8   :  { %v1755_v48 = vadd.f32 %v1740_v9, %v1708_v49  ;;  %v3634_v20 = vadd.f32 %v1666_v1, %v3565_v12  ;;  %v1694_v12 = vsel %vm56_vm0, %v1691_v3, %v1693_v15  ;;  %v2156_v3 = vrot.slane %v2144_v0, 6 }
 0x2d9   :  { %v1707_v34 = vadd.f32 %v1694_v12, %v3470_v16  ;;  %v2182_v16 = vstv %s2372_s28  ;;  %v2163_v59 = vsel %vm2007_vm10, %v2161_v26, %v2162_v37  ;;  %v2159_v1 = vrot.slane %v2146_v50, 6 }
 0x2da   :  { %v2158_v61 = vsel %vm2007_vm10, %v2156_v3, %v2157_v51  ;;  %v2185_v38 = vmul.f32 %v3658_v19, %v2182_v16  ;;  %v2184_v17 = vmul.f32 %v3533_v25, %v2182_v16  ;;  %v2165_v4 = vsel %vm2007_vm10, %v2162_v37, %v2164_v47 }
 0x2db   :  { %v2187_v22 = vmul.f32 %v3553_v46, %v2182_v16  ;;  %v2160_v52 = vsel %vm2007_vm10, %v2157_v51, %v2159_v1  ;;  %v2183_v53 = vmul.f32 %v3499_v42, %v2182_v16  ;;  %v2188_v51 = vmul.f32 %v3621_v35, %v2182_v16 }
 0x2dc   :  { %2129 = vrot.lane.b32.xlu2 %v2121_v11, %s2527_s3  ;;  %v2198_v9 = vrot.slane %v2185_v38, 6  ;;  %v2196_v62 = vrot.slane %v2184_v17, 6 }
 0x2dd   :  { %2133 = vrot.lane.b32.xlu1 %v2126_v2, %s2527_s3  ;;  %2094 = vrot.lane.b32.xlu0 %v2087_v29, %s2526_s30  ;;  %s2373_s30 = sld [smem:[#allocation4 + $0x30]]  ;;  %v2201_v29 = vrot.slane %v2187_v22, 6  ;;  %v2203_v38 = vrot.slane %v2188_v51, 6 }
 0x2de   :  { %v1830_v30 = vpop.permute.xlu2 %1829  ;;  %v2199_v43 = vsel %vm2007_vm10, %v2196_v62, %v2198_v9 }
 0x2df   :  { %v1847_v36 = vadd.f32 %v1830_v30, %v1800_v5  ;;  %v1746_v40 = vpop.permute.xlu1 %1745  ;;  %v1738_v14 = vpop.permute.xlu0 %1737  ;;  %v2124_v5 = vsel %vm2007_vm10, %v2122_v13, %v2123_v41  ;;  %v2204_v17 = vsel %vm2007_vm10, %v2201_v29, %v2203_v38 }
 0x2e0   :  { %v1758_v56 = vadd.f32 %v1746_v40, %v1711_v45  ;;  %v1754_v54 = vadd.f32 %v1738_v14, %v1707_v34  ;;  %v2195_v45 = vrot.slane %v2183_v53, 6 }
 0x2e3   :  { %v2221_v32 = vstv %s2373_s30 }
 0x2e4   :  { %2166 = vrot.lane.b32.xlu2 %v2158_v61, %s2528_s6  ;;  %v2222_v41 = vmul.f32 %v3499_v42, %v2221_v32  ;;  %v2224_v58 = vmul.f32 %v3658_v19, %v2221_v32  ;;  %v2227_v14 = vmul.f32 %v3621_v35, %v2221_v32  ;;  %v2226_v37 = vmul.f32 %v3553_v46, %v2221_v32 }
 0x2e5   :  { %2170 = vrot.lane.b32.xlu1 %v2163_v59, %s2528_s6  ;;  %2131 = vrot.lane.b32.xlu0 %v2124_v5, %s2527_s3  ;;  %s2367_s3 = sld [smem:[#allocation4 + $0x2a]] }
 0x2e6   :  { %v1836_v28 = vpop.permute.xlu2 %1835  ;;  %v2234_v30 = vrot.slane %v2222_v41, 6  ;;  %v2237_v61 = vrot.slane %v2224_v58, 6  ;;  %v2242_v5 = vrot.slane %v2227_v14, 6  ;;  %v2240_v23 = vrot.slane %v2226_v37, 6 }
 0x2e7   :  { %v1850_v15 = vadd.f32 %v1836_v28, %v1803_v18  ;;  %v1787_v57 = vpop.permute.xlu1 %1786  ;;  %v1744_v33 = vpop.permute.xlu0 %1743  ;;  %v2223_v18 = vmul.f32 %v3533_v25, %v2221_v32 }
 0x2e8   :  { %v1802_v49 = vadd.f32 %v1787_v57, %v1755_v48  ;;  %v1757_v21 = vadd.f32 %v1744_v33, %v1710_v24  ;;  %v2186_v48 = vmul.f32 %v3511_v63, %v2182_v16  ;;  %v2243_v24 = vsel %vm2007_vm10, %v2240_v23, %v2242_v5 }
 0x2e9   :  { %v2235_v12 = vrot.slane %v2223_v18, 6  ;;  %v2225_v33 = vmul.f32 %v3511_v63, %v2221_v32 }
 0x2ea   :  { %v2200_v0 = vrot.slane %v2186_v48, 6 }
 0x2eb   :  { %v3682_v27 = vstv %s2367_s3  ;;  %v2236_v40 = vsel %vm2007_vm10, %v2234_v30, %v2235_v12 }
 0x2ec   :  { %2172 = vrot.lane.b32.xlu2 %v2165_v4, %s2528_s6  ;;  %v2202_v34 = vsel %vm2007_vm10, %v2200_v0, %v2201_v29  ;;  %v1995_v60 = vmul.f32 %v3499_v42, %v3682_v27  ;;  %v1999_v1 = vmul.f32 %v3553_v46, %v3682_v27  ;;  %v1997_v51 = vmul.f32 %v3658_v19, %v3682_v27 }
 0x2ed   :  { %2207 = vrot.lane.b32.xlu1 %v2199_v43, %s2529_s8  ;;  %2168 = vrot.lane.b32.xlu0 %v2160_v52, %s2528_s6  ;;  %v2239_v43 = vrot.slane %v2225_v33, 6  ;;  %s2531_s6 = smov [#allocation9]  }
 0x2ee   :  { %v1877_v31 = vpop.permute.xlu2 %1876  ;;  %v2008_v28 = vrot.slane %v1995_v60, 6  ;;  %v2014_v52 = vrot.slane %v1999_v1, 6 }
 0x2ef   :  { %v1894_v11 = vadd.f32 %v1877_v31, %v1847_v36  ;;  %v1793_v6 = vpop.permute.xlu1 %1792  ;;  %v1785_v2 = vpop.permute.xlu0 %1784  ;;  %v2197_v36 = vsel %vm2007_vm10, %v2195_v45, %v2196_v62  ;;  %v2241_v18 = vsel %vm2007_vm10, %v2239_v43, %v2240_v23 }
 0x2f0   :  { %v1805_v7 = vadd.f32 %v1793_v6, %v1758_v56  ;;  %v1801_v55 = vadd.f32 %v1785_v2, %v1754_v54  ;;  %v3693_v56 = vmul.f32 %v3533_v25, %v3682_v27  ;;  %v2238_v25 = vsel %vm2007_vm10, %v2235_v12, %v2237_v61 }
 0x2f1   :  { %v1998_v12 = vmul.f32 %v3511_v63, %v3682_v27  ;;  %v1674_v63 = vadd.f32 %v3544_v8, %v3576_v39 }
 0x2f2   :  { %v2009_v50 = vrot.slane %v3693_v56, 6  ;;  %v2011_v56 = vrot.slane %v1997_v51, 6 }
 0x2f3   :  { %v2013_v0 = vrot.slane %v1998_v12, 6 }
 0x2f4   :  { %2209 = vrot.lane.b32.xlu2 %v2202_v34, %s2529_s8  ;;  %v2010_v42 = vsel %vm2007_vm10, %v2008_v28, %v2009_v50 }
 0x2f5   :  { %2244 = vrot.lane.b32.xlu1 %v2236_v40, %s2530_s9  ;;  %2205 = vrot.lane.b32.xlu0 %v2197_v36, %s2529_s8  ;;  %v3710_v47 = vadd.f32 %v2010_v42, %v3593_v44  ;;  %v2015_v45 = vsel %vm2007_vm10, %v2013_v0, %v2014_v52 }
 0x2f6   :  { %v1883_v54 = vpop.permute.xlu2 %1882  ;;  %v3724_v40 = vadd.f32 %v2015_v45, %v3634_v20 }
 0x2f7   :  { %v1897_v3 = vadd.f32 %v1883_v54, %v1850_v15  ;;  %v1834_v26 = vpop.permute.xlu1 %1833  ;;  %v1791_v13 = vpop.permute.xlu0 %1790  ;;  %v2000_v15 = vmul.f32 %v3621_v35, %v3682_v27 }
 0x2f8   :  { %v1849_v59 = vadd.f32 %v1834_v26, %v1802_v49  ;;  %v1804_v16 = vadd.f32 %v1791_v13, %v1757_v21  ;;  %v2012_v13 = vsel %vm2007_vm10, %v2009_v50, %v2011_v56 }
 0x2f9   :  { %v2016_v22 = vrot.slane %v2000_v15, 6  ;;  %v2023_v61 = vadd.f32 %v2012_v13, %v1674_v63 }
 0x2fb   :  { %v2017_v35 = vsel %vm2007_vm10, %v2014_v52, %v2016_v22 }
 0x2fc   :  { %2246 = vrot.lane.b32.xlu2 %v2238_v25, %s2530_s9  ;;  %v3718_v44 = vadd.f32 %v2017_v35, %v3613_v10 }
 0x2fd   :  { %2250 = vrot.lane.b32.xlu1 %v2243_v24, %s2530_s9  ;;  %2211 = vrot.lane.b32.xlu0 %v2204_v17, %s2529_s8  ;;  %s2310_s8 = sshll.u32 %s2531_s6, 4  ;;  %s2311_s8 = int_to_ptr.vmem [resolvable:$true] %s2310_s8 }
 0x2fe   :  { %v1924_v57 = vpop.permute.xlu2 %1923 }
 0x2ff   :  { %v1941_v49 = vadd.f32 %v1924_v57, %v1894_v11  ;;  %v1840_v21 = vpop.permute.xlu1 %1839  ;;  %v1832_v9 = vpop.permute.xlu0 %1831 }
 0x300   :  { %v1852_v62 = vadd.f32 %v1840_v21, %v1805_v7  ;;  %v1848_v4 = vadd.f32 %v1832_v9, %v1801_v55 }
 0x305   :  { %2248 = vrot.lane.b32.xlu0 %v2241_v18, %s2530_s9 }
 0x306   :  { %v1930_v32 = vpop.permute.xlu2 %1929 }
 0x307   :  { %v1944_v48 = vadd.f32 %v1930_v32, %v1897_v3  ;;  %v1881_v31 = vpop.permute.xlu1 %1880  ;;  %v1838_v41 = vpop.permute.xlu0 %1837 }
 0x308   :  { %v1896_v53 = vadd.f32 %v1881_v31, %v1849_v59  ;;  %v1851_v46 = vadd.f32 %v1838_v41, %v1804_v16 }
 0x30e   :  { %v1971_v11 = vpop.permute.xlu2 %1970 }
 0x30f   :  { %v1988_v6 = vadd.f32 %v1971_v11, %v1941_v49  ;;  %v1887_v2 = vpop.permute.xlu1 %1886  ;;  %v1879_v29 = vpop.permute.xlu0 %1878 }
 0x310   :  { %v1899_v7 = vadd.f32 %v1887_v2, %v1852_v62  ;;  %v1895_v55 = vadd.f32 %v1879_v29, %v1848_v4 }
 0x311   :  { %v2267_v62 = vrot.slane %v1988_v6, 1 }
 0x316   :  { %v1977_v30 = vpop.permute.xlu2 %1976 }
 0x317   :  { %v1991_v10 = vadd.f32 %v1977_v30, %v1944_v48  ;;  %v1928_v34 = vpop.permute.xlu1 %1927  ;;  %v1885_v58 = vpop.permute.xlu0 %1884 }
 0x318   :  { %v1943_v36 = vadd.f32 %v1928_v34, %v1896_v53  ;;  %v1898_v14 = vadd.f32 %v1885_v58, %v1851_v46 }
 0x319   :  { %v2272_v29 = vrot.slane %v1991_v10, 1 }
 0x31e   :  { %v2050_v54 = vpop.permute.xlu2 %2049 }
 0x31f   :  { %v1934_v37 = vpop.permute.xlu1 %1933  ;;  %v1926_v3 = vpop.permute.xlu0 %1925  ;;  %v2061_v46 = vadd.f32 %v2050_v54, %v3710_v47 }
 0x320   :  { %v1946_v26 = vadd.f32 %v1934_v37, %v1899_v7  ;;  %v1942_v5 = vadd.f32 %v1926_v3, %v1895_v55 }
 0x326   :  { %v2056_v60 = vpop.permute.xlu2 %2055 }
 0x327   :  { %v1975_v59 = vpop.permute.xlu1 %1974  ;;  %v1932_v20 = vpop.permute.xlu0 %1931  ;;  %v2064_v34 = vadd.f32 %v2056_v60, %v3718_v44 }
 0x328   :  { %v1945_v16 = vadd.f32 %v1932_v20, %v1898_v14  ;;  %v1990_v38 = vadd.f32 %v1975_v59, %v1943_v36 }
 0x32a   :  { %v2270_v28 = vrot.slane %v1990_v38, 1 }
 0x32e   :  { %v2093_v19 = vpop.permute.xlu2 %2092 }
 0x32f   :  { %v1981_v23 = vpop.permute.xlu1 %1980  ;;  %v1973_v25 = vpop.permute.xlu0 %1972 }
 0x330   :  { %v1989_v27 = vadd.f32 %v1973_v25, %v1942_v5  ;;  %v1993_v22 = vadd.f32 %v1981_v23, %v1946_v26 }
 0x332   :  { %v2268_v24 = vrot.slane %v1989_v27, 1  ;;  %v2275_v35 = vrot.slane %v1993_v22, 1 }
 0x334   :  { %v2271_v17 = vsel %vm2266_vm11, %v2268_v24, %v2270_v28  ;;  %v2269_v43 = vsel %vm2266_vm11, %v2267_v62, %v2268_v24 }
 0x336   :  { %v2130_v42 = vpop.permute.xlu2 %2129 }
 0x337   :  { %v2054_v8 = vpop.permute.xlu1 %2053  ;;  %v1979_v39 = vpop.permute.xlu0 %1978 }
 0x338   :  { %v1992_v4 = vadd.f32 %v1979_v39, %v1945_v16  ;;  %v2063_v47 = vadd.f32 %v2054_v8, %v3724_v40 }
 0x33a   :  { %v2273_v52 = vrot.slane %v1992_v4, 1  ;;  %v2102_v26 = vadd.f32 %v2093_v19, %v2063_v47 }
 0x33c   :  { %v2276_v41 = vsel %vm2266_vm11, %v2273_v52, %v2275_v35  ;;  %v2274_v12 = vsel %vm2266_vm11, %v2272_v29, %v2273_v52 }
 0x33e   :  { %v2167_v57 = vpop.permute.xlu2 %2166 }
 0x33f   :  { %v2091_v50 = vpop.permute.xlu1 %2090  ;;  %v2052_v15 = vpop.permute.xlu0 %2051 }
 0x340   :  { %v2062_v18 = vadd.f32 %v2052_v15, %v2023_v61 }
 0x342   :  { %v2101_v53 = vadd.f32 %v2091_v50, %v2062_v18 }
 0x344   :  { %v2140_v2 = vadd.f32 %v2130_v42, %v2101_v53 }
 0x346   :  { %v2173_v21 = vpop.permute.xlu2 %2172 }
 0x347   :  { %v2128_v33 = vpop.permute.xlu1 %2127  ;;  %v2089_v49 = vpop.permute.xlu0 %2088 }
 0x348   :  { %v2100_v11 = vadd.f32 %v2089_v49, %v2061_v46 }
 0x34a   :  { %v2139_v0 = vadd.f32 %v2128_v33, %v2100_v11 }
 0x34c   :  { %v2178_v51 = vadd.f32 %v2167_v57, %v2139_v0 }
 0x34e   :  { %v2210_v31 = vpop.permute.xlu2 %2209 }
 0x34f   :  { %v2134_v9 = vpop.permute.xlu1 %2133  ;;  %v2095_v1 = vpop.permute.xlu0 %2094 }
 0x350   :  { %v2103_v36 = vadd.f32 %v2095_v1, %v2064_v34 }
 0x352   :  { %v2142_v3 = vadd.f32 %v2134_v9, %v2103_v36 }
 0x354   :  { %v2181_v20 = vadd.f32 %v2173_v21, %v2142_v3 }
 0x356   :  { %v2247_v45 = vpop.permute.xlu2 %2246 }
 0x357   :  { %v2171_v32 = vpop.permute.xlu1 %2170  ;;  %v2132_v48 = vpop.permute.xlu0 %2131 }
 0x358   :  { %v2141_v61 = vadd.f32 %v2132_v48, %v2102_v26 }
 0x35a   :  { %v2180_v23 = vadd.f32 %v2171_v32, %v2141_v61 }
 0x35c   :  { %v2219_v19 = vadd.f32 %v2210_v31, %v2180_v23 }
 0x35f   :  { %v2208_v7 = vpop.permute.xlu1 %2207  ;;  %v2169_v6 = vpop.permute.xlu0 %2168 }
 0x360   :  { %v2179_v55 = vadd.f32 %v2169_v6, %v2140_v2 }
 0x362   :  { %v2218_v30 = vadd.f32 %v2208_v7, %v2179_v55 }
 0x364   :  { %v2257_v58 = vadd.f32 %v2247_v45, %v2218_v30 }
 0x366   :  { %v2282_v14 = vadd.f32 %v2271_v17, %v2257_v58 }
 0x367   :  { %v2245_v56 = vpop.permute.xlu1 %2244  ;;  %v2206_v37 = vpop.permute.xlu0 %2205 }
 0x368   :  { %v2286_v54 = vmul.f32 0.5, %v2282_v14  ;;  %v2217_v10 = vadd.f32 %v2206_v37, %v2178_v51 }
 0x36a   :  { %2426 = vtanh.f32 %v2286_v54  ;;  %v2256_v63 = vadd.f32 %v2245_v56, %v2217_v10 }
 0x36c   :  { %v2281_v13 = vadd.f32 %v2269_v43, %v2256_v63 }
 0x36e   :  { %v2285_v59 = vmul.f32 0.5, %v2281_v13 }
 0x36f   :  { %v2212_v16 = vpop.permute.xlu0 %2211  ;;  %v2251_v38 = vpop.permute.xlu1 %2250 }
 0x370   :  { %v2427_v44 = vpop.eup %2426  ;;  %2428 = vtanh.f32 %v2285_v59  ;;  %v2220_v60 = vadd.f32 %v2212_v16, %v2181_v20 }
 0x371   :  { %v2294_v5 = vadd.f32 1.0, %v2427_v44 }
 0x372   :  { %v2259_v25 = vadd.f32 %v2251_v38, %v2220_v60 }
 0x373   :  { %v2298_v40 = vmul.f32 0.5, %v2294_v5 }
 0x374   :  { %v2284_v27 = vadd.f32 %v2276_v41, %v2259_v25 }
 0x375   :  { %2303 = vst.msk [vmem:[#allocation9 + $0x8] sm:$0xff] %vm2301_vm12, %v2298_v40 }
 0x376   :  { %v2429_v28 = vpop.eup %2428  ;;  %v2288_v24 = vmul.f32 0.5, %v2284_v27 }
 0x377   :  { %v2293_v17 = vadd.f32 1.0, %v2429_v28  ;;  %v2249_v8 = vpop.permute.xlu0 %2248 }
 0x378   :  { %2430 = vtanh.f32 %v2288_v24  ;;  %v2258_v39 = vadd.f32 %v2249_v8, %v2219_v19 }
 0x379   :  { %v2297_v42 = vmul.f32 0.5, %v2293_v17 }
 0x37a   :  { %v2283_v50 = vadd.f32 %v2274_v12, %v2258_v39 }
 0x37b   :  { %2302 = vst.msk [vmem:[#allocation9] sm:$0xff] %vm2301_vm12, %v2297_v42 }
 0x37c   :  { %v2287_v15 = vmul.f32 0.5, %v2283_v50 }
 0x37e   :  { %v2431_v57 = vpop.eup %2430  ;;  %2432 = vtanh.f32 %v2287_v15 }
 0x37f   :  { %v2296_v33 = vadd.f32 1.0, %v2431_v57 }
 0x381   :  { %v2300_v49 = vmul.f32 0.5, %v2296_v33 }
 0x383   :  { %2305 = vst.msk [vmem:[#allocation9 + $0x18] sm:$0xff] %vm2301_vm12, %v2300_v49 }
 0x384   :  { %v2433_v21 = vpop.eup %2432 }
 0x385   :  { %v2295_v9 = vadd.f32 1.0, %v2433_v21 }
 0x387   :  { %v2299_v1 = vmul.f32 0.5, %v2295_v9 }
 0x389   :  { %2304 = vst.msk [vmem:[#allocation9 + $0x10] sm:$0xff] %vm2301_vm12, %v2299_v1 }
 0x38a   :  { %2318 = dma.vmem_to_hbm [thread:$0]  %s2311_s8, 512, %s2313_s4, [#allocation6], %s2514_s18, %s2514_s18, %s2515_s19  }
 0x38b   :  { %2510 = dma.done.wait [#allocation6], 512  }
 0x38c   :  { %2511 = vsyncadd [#allocation6], 4294966784 }
 0x38d   :  { %2323 = vsyncpa [#allocation5], 1 }
 0x38e   :  { %2324 = vsyncpa [#allocation6], 1 }
 0x38f   :  { %2325 = vsyncpa [#allocation7], 1 }

</bundles_post_ra>
